<compile_context>
chip_gen: v6e
topology: v6e:2x2x1
jax: 0.10.0
libtpu: 0.0.40
codegen_flags: <defaults>
</compile_context>

<pallas_src>
import math
import numpy as np
import jax
import jax.numpy as jnp
from jax.experimental import pallas as pl
from jax.experimental.pallas import tpu as pltpu

# ----------------------------- config (small, synthetic) ---------------------
B = 2
SEQ_LEN = 16
PRED_LEN = 8
LABEL_LEN = 8
ENC_IN = 4
C_OUT = 4
D_MODEL = 16
D_FF = 16
TOP_K = 2
E_LAYERS = 2
NUM_KERNELS = 2                  # Inception kernel sizes 1, 3
MARK_DIM = 4                     # embed='timeF', freq='h' -> 4 time features
T_FULL = SEQ_LEN + PRED_LEN      # 24
EMB_IN = 3 * ENC_IN + MARK_DIM   # token-conv im2col (12) + time features (4)

# Fixed canvas that holds every possible (T/period, period) folding
# (period in [2, T_FULL] after the top-index guard -> H <= T_FULL//2).
HM = T_FULL // 2                 # 12 rows max
WM = T_FULL                      # 24 cols max
HW = HM * WM                     # 288 cells per canvas
G = TOP_K * B * HW               # 1152: all (k, b) canvases folded into one axis

# ------------------------ static fold / conv geometry ------------------------
_H = np.arange(HW) // WM                      # canvas row of each cell
_W = np.arange(HW) % WM                       # canvas col of each cell
_DY = np.repeat(np.arange(3) - 1, 3)          # per-tap row offset  [-1..1]
_DX = np.tile(np.arange(3) - 1, 3)            # per-tap col offset  [-1..1]
SHIFTS = [int(dy * WM + dx) for dy, dx in zip(_DY, _DX)]   # flat-canvas shift per tap
# tap validity mask (neighbor inside the canvas), identical for every (k, b) image
_tap_ok = ((_H[:, None] + _DY[None, :] >= 0) & (_H[:, None] + _DY[None, :] < HM) &
           (_W[:, None] + _DX[None, :] >= 0) & (_W[:, None] + _DX[None, :] < WM))
TAPMASK_T_NP = np.tile(_tap_ok.T.astype(np.float32), (1, TOP_K * B))   # (9, G)


# ----------------------------- Pallas kernels --------------------------------
def _gelu_erf(x):
    # exact GELU 0.5*x*(1+erf(x/sqrt(2))); erf via Abramowitz&Stegun 7.1.26
    # (|err| < 1.5e-7) using only exp / mul / add so it lowers cleanly.
    z = x * 0.7071067811865476
    s = jnp.where(z < 0.0, -1.0, 1.0)
    a = jnp.abs(z)
    t = 1.0 / (1.0 + 0.3275911 * a)
    poly = t * (0.254829592 + t * (-0.284496736 + t * (1.421413741 +
                t * (-1.453152027 + t * 1.061405429))))
    erf = s * (1.0 - poly * jnp.exp(-a * a))
    return 0.5 * x * (1.0 + erf)


def _embed_predict_kernel(xe_ref, we_ref, pos_ref, plw_ref, plb_ref, o_ref):
    # Fused DataEmbedding (token circular conv + temporal linear + positional)
    # and predict_linear along time (seq_len -> seq_len + pred_len).
    we = we_ref[...]
    pos = pos_ref[...]
    plw = plw_ref[...]
    plb = plb_ref[...]
    for b in range(B):                               # B=2, static unroll
        emb = jnp.dot(xe_ref[b], we, preferred_element_type=jnp.float32) + pos
        o_ref[b] = (jnp.dot(plw, emb, preferred_element_type=jnp.float32)
                    + plb).astype(o_ref.dtype)


def _times_block_kernel(p1t_ref, rmt_ref, tmt_ref, w1t_ref, b1t_ref,
                        w2t_ref, b2t_ref, aggt_ref, xt_ref, g_ref, bt_ref, o_ref):
    # One fused TimesBlock layer, all (k, b) period-images folded into G cols:
    #   inception1 (1x1 folded into 3x3) as ONE K=144 matmul -> /num_kernels
    #   -> GELU -> real-image mask -> in-vreg im2col via lane rolls
    #   -> inception2 as ONE K=144 matmul -> softmax-weighted unfold back to
    #   time (selection matmul) -> residual -> LayerNorm.
    acc1 = jnp.dot(w1t_ref[...], p1t_ref[...],
                   preferred_element_type=jnp.float32)           # (D_FF, G)
    mid = _gelu_erf((acc1 + b1t_ref[...]) * (1.0 / NUM_KERNELS)) * rmt_ref[...]
    tmt = tmt_ref[...]                                           # (9, G)
    pieces = []
    for tap in range(9):
        s = SHIFTS[tap]
        if s == 0:                                   # centre tap, mask is all-ones
            pieces.append(mid)
        else:
            rolled = pltpu.roll(mid, shift=(-s) % G, axis=1)     # XLU lane roll
            pieces.append(rolled * tmt[tap:tap + 1, :])
    patches2 = jnp.concatenate(pieces, axis=0)                   # (9*D_FF, G)
    out2 = (jnp.dot(w2t_ref[...], patches2, preferred_element_type=jnp.float32)
            + b2t_ref[...]) * (1.0 / NUM_KERNELS)                # (D_MODEL, G)
    # weighted unfold-back + aggregation over top-k periods + residual
    res = jnp.dot(out2, aggt_ref[...],
                  preferred_element_type=jnp.float32) + xt_ref[...]   # (D_MODEL, B*T)
    mu = jnp.mean(res, axis=0, keepdims=True)
    xc = res - mu
    var = jnp.mean(xc * xc, axis=0, keepdims=True)
    inv = jax.lax.rsqrt(var + 1e-5)
    o_ref[...] = (xc * inv * g_ref[...] + bt_ref[...]).astype(o_ref.dtype)


def _proj_denorm_kernel(x_ref, w_ref, b_ref, sc_ref, sh_ref, o_ref):
    # Final projection fused with de-normalization (*stdev + means); stdev and
    # means come in as small (B,1,C) blocks and broadcast in-kernel.
    w = w_ref[...]
    bb = b_ref[...]
    for b in range(B):
        y = jnp.dot(x_ref[b], w, preferred_element_type=jnp.float32) + bb
        o_ref[b] = (y * sc_ref[b] + sh_ref[b]).astype(o_ref.dtype)


# ----------------------------- pallas_call wrappers --------------------------
def embed_predict(xe, we, pos, plw, plb):
    return pl.pallas_call(
        _embed_predict_kernel,
        out_shape=jax.ShapeDtypeStruct((B, T_FULL, D_MODEL), jnp.float32),
        grid=(1,),
        in_specs=[pl.BlockSpec((B, SEQ_LEN, EMB_IN), lambda i: (0, 0, 0)),
                  pl.BlockSpec((EMB_IN, D_MODEL), lambda i: (0, 0)),
                  pl.BlockSpec((SEQ_LEN, D_MODEL), lambda i: (0, 0)),
                  pl.BlockSpec((T_FULL, SEQ_LEN), lambda i: (0, 0)),
                  pl.BlockSpec((T_FULL, 1), lambda i: (0, 0))],
        out_specs=pl.BlockSpec((B, T_FULL, D_MODEL), lambda i: (0, 0, 0)),
    )(xe, we, pos, plw, plb)


def times_block_call(p1t, rmt, tmt, w1t, b1t, w2t, b2t, aggt, xt, ln_g, ln_b):
    return pl.pallas_call(
        _times_block_kernel,
        out_shape=jax.ShapeDtypeStruct((D_MODEL, B * T_FULL), jnp.float32),
        grid=(1,),
        in_specs=[pl.BlockSpec((9 * D_MODEL, G), lambda i: (0, 0)),
                  pl.BlockSpec((1, G), lambda i: (0, 0)),
                  pl.BlockSpec((9, G), lambda i: (0, 0)),
                  pl.BlockSpec((D_FF, 9 * D_MODEL), lambda i: (0, 0)),
                  pl.BlockSpec((D_FF, 1), lambda i: (0, 0)),
                  pl.BlockSpec((D_MODEL, 9 * D_FF), lambda i: (0, 0)),
                  pl.BlockSpec((D_MODEL, 1), lambda i: (0, 0)),
                  pl.BlockSpec((G, B * T_FULL), lambda i: (0, 0)),
                  pl.BlockSpec((D_MODEL, B * T_FULL), lambda i: (0, 0)),
                  pl.BlockSpec((D_MODEL, 1), lambda i: (0, 0)),
                  pl.BlockSpec((D_MODEL, 1), lambda i: (0, 0))],
        out_specs=pl.BlockSpec((D_MODEL, B * T_FULL), lambda i: (0, 0)),
    )(p1t, rmt, tmt, w1t, b1t, w2t, b2t, aggt, xt, ln_g, ln_b)


def proj_denorm(xp, w, b, sc, sh):
    return pl.pallas_call(
        _proj_denorm_kernel,
        out_shape=jax.ShapeDtypeStruct((B, PRED_LEN, C_OUT), jnp.float32),
        grid=(1,),
        in_specs=[pl.BlockSpec((B, PRED_LEN, D_MODEL), lambda i: (0, 0, 0)),
                  pl.BlockSpec((D_MODEL, C_OUT), lambda i: (0, 0)),
                  pl.BlockSpec((1, C_OUT), lambda i: (0, 0)),
                  pl.BlockSpec((B, 1, C_OUT), lambda i: (0, 0, 0)),
                  pl.BlockSpec((B, 1, C_OUT), lambda i: (0, 0, 0))],
        out_specs=pl.BlockSpec((B, PRED_LEN, C_OUT), lambda i: (0, 0, 0)),
    )(xp, w, b, sc, sh)


# ----------------------------- model glue (JAX, jitted) ----------------------
def fft_period_weights(x):
    # FFT_for_Period, fully on-device: no host round-trip, no recompiles.
    # TODO(synk): rfft / top_k have no Pallas equivalent; they stay in plain
    # JAX (fused by XLA under the surrounding jit).
    xf = jnp.fft.rfft(x, axis=1)
    amp = jnp.abs(xf)                                   # (B, T//2+1, N)
    freq = amp.mean(axis=0).mean(axis=-1)
    freq = freq.at[0].set(0.0)
    _, top_idx = jax.lax.top_k(freq, TOP_K)             # (K,) int32
    safe_idx = jnp.maximum(top_idx, 1)                  # guard DC / div-by-zero
    periods = (T_FULL // safe_idx).astype(jnp.int32)    # (K,) dynamic periods
    period_weight = jnp.take(amp.mean(axis=-1), safe_idx, axis=1)  # (B, K)
    return periods, period_weight


def times_block(x, blk, ln_g, ln_b, tapmask_t):
    # Builds the data-dependent pieces (stage-1 im2col, real-image mask, the
    # softmax-weighted unfold-back selection matrix) in JAX, then one fused
    # Pallas call does the whole TimesBlock layer.
    periods, pweight = fft_period_weights(x)
    w_sm = jax.nn.softmax(pweight, axis=1)              # (B, K)
    h = jnp.asarray(_H, jnp.int32)
    w = jnp.asarray(_W, jnp.int32)
    dy = jnp.asarray(_DY, jnp.int32)
    dx = jnp.asarray(_DX, jnp.int32)
    tt = jnp.arange(T_FULL, dtype=jnp.int32)
    hw_ar = jnp.arange(HW, dtype=jnp.int32)
    eyeB = jnp.eye(B, dtype=jnp.float32)

    p1_list, rm_list, agg_list = [], [], []
    for k in range(TOP_K):
        p = periods[k]
        n_rows = (T_FULL + p - 1) // p                  # real image height
        hh = h[:, None] + dy[None, :]                   # (HW, 9) neighbor rows
        ww = w[:, None] + dx[None, :]                   # (HW, 9) neighbor cols
        t9 = hh * p + ww                                # neighbor seq index
        valid = (hh >= 0) & (ww >= 0) & (ww < p) & (t9 < T_FULL)
        tc = jnp.clip(t9, 0, T_FULL - 1).reshape(-1)    # (HW*9,)
        gat = jnp.take(x, tc, axis=1).reshape(B, HW, 9, D_MODEL)
        gat = gat * valid[None, :, :, None].astype(x.dtype)
        # -> (9*D_MODEL, B*HW): rows tap*D_MODEL + c, cols b*HW + cell
        p1_list.append(jnp.transpose(gat, (2, 3, 0, 1)).reshape(9 * D_MODEL, B * HW))
        # real-image mask (zeros outside the (n_rows, period) image act as
        # 'same' padding for the second conv; GELU(bias) there must be killed)
        rm = ((h < n_rows) & (w < p)).astype(jnp.float32)          # (HW,)
        rm_list.append(jnp.broadcast_to(rm[None, :], (B, HW)).reshape(B * HW))
        # softmax-weighted unfold-back selection: res[b,t] += w[b,k]*out2[cell_k(t)]
        cell = (tt // p) * WM + (tt % p)                           # (T,)
        onehot = (cell[:, None] == hw_ar[None, :]).astype(jnp.float32)  # (T, HW)
        a_k = (eyeB[:, None, :, None] * w_sm[:, k][:, None, None, None]
               * onehot[None, :, None, :])                         # (B, T, B', HW)
        agg_list.append(jnp.transpose(a_k, (2, 3, 0, 1)).reshape(B * HW, B * T_FULL))

    p1t = jnp.concatenate(p1_list, axis=1)              # (144, G), cols (k*B+b)*HW+cell
    rmt = jnp.concatenate(rm_list, axis=0).reshape(1, G)
    aggt = jnp.concatenate(agg_list, axis=0)            # (G, B*T)
    xt = jnp.transpose(x.reshape(B * T_FULL, D_MODEL))  # (D_MODEL, B*T)

    out = times_block_call(p1t, rmt, tmt := tapmask_t, blk['w1t'], blk['b1t'],
                           blk['w2t'], blk['b2t'], aggt, xt, ln_g, ln_b)
    return jnp.transpose(out).reshape(B, T_FULL, D_MODEL)


def positional_embedding(seq_len, d_model):
    position = np.arange(seq_len)[:, None].astype(np.float32)
    div_term = np.exp(np.arange(0, d_model, 2).astype(np.float32)
                      * -(math.log(10000.0) / d_model))
    pe = np.zeros((seq_len, d_model), np.float32)
    pe[:, 0::2] = np.sin(position * div_term)
    pe[:, 1::2] = np.cos(position * div_term)
    return jnp.asarray(pe)


def model_forward(params, x_enc, x_mark_enc, x_dec, x_mark_dec):
    # task_name == 'long_term_forecast'
    means = jnp.mean(x_enc, axis=1, keepdims=True)
    xn = x_enc - means
    stdev = jnp.sqrt(jnp.var(xn, axis=1, keepdims=True) + 1e-5)   # unbiased=False
    xn = xn / stdev

    # circular-pad im2col of the token conv + time features, concatenated so
    # the fused embed+predict kernel only needs single matmuls.
    idx = (jnp.arange(SEQ_LEN)[:, None] + jnp.arange(3)[None, :] - 1) % SEQ_LEN
    tok = jnp.take(xn, idx.reshape(-1), axis=1).reshape(B, SEQ_LEN, 3 * ENC_IN)
    xe = jnp.concatenate([tok, x_mark_enc], axis=-1)              # (B, S, EMB_IN)

    enc_out = embed_predict(xe, params['emb_w'], params['pos_emb'],
                            params['pl_w'], params['pl_b'])       # (B, T_FULL, D)

    tapmask_t = jnp.asarray(TAPMASK_T_NP)
    for blk in params['blocks']:
        enc_out = times_block(enc_out, blk, params['ln_g'], params['ln_b'],
                              tapmask_t)

    # project + de-normalize only the pred_len horizon that is returned.
    dec = proj_denorm(enc_out[:, -PRED_LEN:, :], params['proj_w'],
                      params['proj_b'], stdev, means)
    return dec                                                    # (B, PRED_LEN, C_OUT)


# ----------------------------- deterministic params --------------------------
def init_params(key):
    keys = jax.random.split(key, 32)
    kit = iter(keys)

    def nrm(shape, scale=0.1):
        return scale * jax.random.normal(next(kit), shape, dtype=jnp.float32)

    token_w = nrm((3, ENC_IN, D_MODEL))          # Conv1d k=3 taps (tap, Cin, Cout)
    temporal_w = nrm((MARK_DIM, D_MODEL))
    params = {
        # token-conv im2col weights and temporal-linear weights concatenated
        'emb_w': jnp.concatenate([token_w.reshape(3 * ENC_IN, D_MODEL),
                                  temporal_w], axis=0),           # (EMB_IN, D)
        'pos_emb': positional_embedding(SEQ_LEN, D_MODEL),
        'pl_w': nrm((T_FULL, SEQ_LEN)),          # predict_linear weight (out, in)
        'pl_b': nrm((T_FULL, 1)),
        'ln_g': jnp.ones((D_MODEL, 1), jnp.float32),
        'ln_b': jnp.zeros((D_MODEL, 1), jnp.float32),
        'proj_w': nrm((D_MODEL, C_OUT)),
        'proj_b': nrm((1, C_OUT)),
    }
    blocks = []
    for _ in range(E_LAYERS):
        # Inception_Block_V1 (num_kernels=2): 1x1 and 3x3 branches, averaged.
        w1_1, b1_1 = nrm((1, 1, D_MODEL, D_FF)), nrm((D_FF,))
        w1_3, b1_3 = nrm((3, 3, D_MODEL, D_FF)), nrm((D_FF,))
        w2_1, b2_1 = nrm((1, 1, D_FF, D_MODEL)), nrm((D_MODEL,))
        w2_3, b2_3 = nrm((3, 3, D_FF, D_MODEL)), nrm((D_MODEL,))
        # Fold the 1x1 branch into the centre tap of the 3x3 branch:
        # (conv1x1 + conv3x3)/2 == conv3x3'(x)/2 with centre += w1x1, biases summed.
        w1 = w1_3.at[1, 1].add(w1_1[0, 0])
        w2 = w2_3.at[1, 1].add(w2_1[0, 0])
        blocks.append({
            'w1t': jnp.transpose(w1.reshape(9 * D_MODEL, D_FF)),      # (D_FF, 144)
            'b1t': (b1_1 + b1_3).reshape(D_FF, 1),
            'w2t': jnp.transpose(w2.reshape(9 * D_FF, D_MODEL)),      # (D, 144)
            'b2t': (b2_1 + b2_3).reshape(D_MODEL, 1),
        })
    params['blocks'] = blocks
    return params


# ----------------------------- main -------------------------------------------
if __name__ == "__main__":
    key = jax.random.PRNGKey(0)
    k1, k2, k3, k4, kp = jax.random.split(key, 5)
    x_enc = jax.random.normal(k1, (B, SEQ_LEN, ENC_IN), dtype=jnp.float32)
    x_mark_enc = jax.random.normal(k2, (B, SEQ_LEN, MARK_DIM), dtype=jnp.float32)
    x_dec = jax.random.normal(k3, (B, LABEL_LEN + PRED_LEN, ENC_IN), dtype=jnp.float32)
    x_mark_dec = jax.random.normal(k4, (B, LABEL_LEN + PRED_LEN, MARK_DIM),
                                   dtype=jnp.float32)

    params = init_params(kp)
    fwd = jax.jit(model_forward)      # single compiled executable, no host syncs
    out = jax.block_until_ready(fwd(params, x_enc, x_mark_enc, x_dec, x_mark_dec))
    assert out.shape == (B, PRED_LEN, C_OUT), out.shape
    assert bool(jnp.all(jnp.isfinite(out)))
    print("KERNEL_OK")
</pallas_src>

<mosaic_0001>
module attributes {stable_mosaic.version = 11 : i64} {
  func.func @_embed_predict_kernel(%arg0: i32, %arg1: memref<2x16x16xf32, #tpu.memory_space<vmem>>, %arg2: memref<16x16xf32, #tpu.memory_space<vmem>>, %arg3: memref<16x16xf32, #tpu.memory_space<vmem>>, %arg4: memref<24x16xf32, #tpu.memory_space<vmem>>, %arg5: memref<24x1xf32, #tpu.memory_space<vmem>>, %arg6: memref<2x24x16xf32, #tpu.memory_space<vmem>>) attributes {dimension_semantics = [#tpu.dimension_semantics<arbitrary>], iteration_bounds = array<i64: 1>, scalar_prefetch = 0 : i64, scratch_operands = 0 : i64, tpu.core_type = #tpu.core_type<tc>, window_params = [{pipeline_mode = #tpu.pipeline_mode<synchronous>, transform_indices = @transform_0, window_bounds = array<i64: 2, 16, 16>}, {pipeline_mode = #tpu.pipeline_mode<synchronous>, transform_indices = @transform_1, window_bounds = array<i64: 16, 16>}, {pipeline_mode = #tpu.pipeline_mode<synchronous>, transform_indices = @transform_2, window_bounds = array<i64: 16, 16>}, {pipeline_mode = #tpu.pipeline_mode<synchronous>, transform_indices = @transform_3, window_bounds = array<i64: 24, 16>}, {pipeline_mode = #tpu.pipeline_mode<synchronous>, transform_indices = @transform_4, window_bounds = array<i64: 24, 1>}, {pipeline_mode = #tpu.pipeline_mode<synchronous>, transform_indices = @transform_5, window_bounds = array<i64: 2, 24, 16>}]} {
    %c0 = arith.constant 0 : index
    %c0_0 = arith.constant 0 : index
    %0 = vector.load %arg2[%c0, %c0_0] : memref<16x16xf32, #tpu.memory_space<vmem>>, vector<16x16xf32>
    %c0_1 = arith.constant 0 : index
    %c0_2 = arith.constant 0 : index
    %1 = vector.load %arg3[%c0_1, %c0_2] : memref<16x16xf32, #tpu.memory_space<vmem>>, vector<16x16xf32>
    %c0_3 = arith.constant 0 : index
    %c0_4 = arith.constant 0 : index
    %2 = vector.load %arg4[%c0_3, %c0_4] : memref<24x16xf32, #tpu.memory_space<vmem>>, vector<24x16xf32>
    %c0_5 = arith.constant 0 : index
    %c0_6 = arith.constant 0 : index
    %3 = vector.load %arg5[%c0_5, %c0_6] : memref<24x1xf32, #tpu.memory_space<vmem>>, vector<24x1xf32>
    %c0_7 = arith.constant 0 : index
    %c0_8 = arith.constant 0 : index
    %c0_9 = arith.constant 0 : index
    %4 = vector.load %arg1[%c0_7, %c0_8, %c0_9] : memref<2x16x16xf32, #tpu.memory_space<vmem>>, vector<1x16x16xf32>
    %5 = vector.shape_cast %4 : vector<1x16x16xf32> to vector<16x16xf32>
    %cst = arith.constant dense<0.000000e+00> : vector<16x16xf32>
    %6 = tpu.matmul %5, %0, %cst {dimension_numbers = #tpu.dot_dimension_numbers<[1], [0], [0], [1], [0, 0, 1, 1], [], []>} : vector<16x16xf32>, vector<16x16xf32>, vector<16x16xf32> -> vector<16x16xf32>
    %7 = arith.addf %6, %1 : vector<16x16xf32>
    %cst_10 = arith.constant dense<0.000000e+00> : vector<24x16xf32>
    %8 = tpu.matmul %2, %7, %cst_10 {dimension_numbers = #tpu.dot_dimension_numbers<[1], [0], [0], [1], [0, 0, 1, 1], [], []>} : vector<24x16xf32>, vector<16x16xf32>, vector<24x16xf32> -> vector<24x16xf32>
    %9 = vector.broadcast %3 : vector<24x1xf32> to vector<24x16xf32>
    %10 = arith.addf %8, %9 : vector<24x16xf32>
    %c0_11 = arith.constant 0 : index
    %c0_12 = arith.constant 0 : index
    %c0_13 = arith.constant 0 : index
    %11 = vector.load %arg6[%c0_11, %c0_12, %c0_13] : memref<2x24x16xf32, #tpu.memory_space<vmem>>, vector<1x24x16xf32>
    %12 = vector.shape_cast %11 : vector<1x24x16xf32> to vector<24x16xf32>
    %13 = vector.shape_cast %10 : vector<24x16xf32> to vector<1x24x16xf32>
    tpu.vector_store %arg6[%c0_11, %c0_12, %c0_13], %13 {strides = array<i32>} : memref<2x24x16xf32, #tpu.memory_space<vmem>>, vector<1x24x16xf32>,
    %c1 = arith.constant 1 : index
    %c0_14 = arith.constant 0 : index
    %c0_15 = arith.constant 0 : index
    %14 = vector.load %arg1[%c1, %c0_14, %c0_15] : memref<2x16x16xf32, #tpu.memory_space<vmem>>, vector<1x16x16xf32>
    %15 = vector.shape_cast %14 : vector<1x16x16xf32> to vector<16x16xf32>
    %cst_16 = arith.constant dense<0.000000e+00> : vector<16x16xf32>
    %16 = tpu.matmul %15, %0, %cst_16 {dimension_numbers = #tpu.dot_dimension_numbers<[1], [0], [0], [1], [0, 0, 1, 1], [], []>} : vector<16x16xf32>, vector<16x16xf32>, vector<16x16xf32> -> vector<16x16xf32>
    %17 = arith.addf %16, %1 : vector<16x16xf32>
    %cst_17 = arith.constant dense<0.000000e+00> : vector<24x16xf32>
    %18 = tpu.matmul %2, %17, %cst_17 {dimension_numbers = #tpu.dot_dimension_numbers<[1], [0], [0], [1], [0, 0, 1, 1], [], []>} : vector<24x16xf32>, vector<16x16xf32>, vector<24x16xf32> -> vector<24x16xf32>
    %19 = vector.broadcast %3 : vector<24x1xf32> to vector<24x16xf32>
    %20 = arith.addf %18, %19 : vector<24x16xf32>
    %c1_18 = arith.constant 1 : index
    %c0_19 = arith.constant 0 : index
    %c0_20 = arith.constant 0 : index
    %21 = vector.load %arg6[%c1_18, %c0_19, %c0_20] : memref<2x24x16xf32, #tpu.memory_space<vmem>>, vector<1x24x16xf32>
    %22 = vector.shape_cast %21 : vector<1x24x16xf32> to vector<24x16xf32>
    %23 = vector.shape_cast %20 : vector<24x16xf32> to vector<1x24x16xf32>
    tpu.vector_store %arg6[%c1_18, %c0_19, %c0_20], %23 {strides = array<i32>} : memref<2x24x16xf32, #tpu.memory_space<vmem>>, vector<1x24x16xf32>,
    return
  }
  func.func @transform_0(%arg0: i32) -> (i32, i32, i32) {
    %c0_i32 = arith.constant 0 : i32
    %c0_i32_0 = arith.constant 0 : i32
    %c0_i32_1 = arith.constant 0 : i32
    %c0_i32_2 = arith.constant 0 : i32
    return %c0_i32, %c0_i32_0, %c0_i32_1 : i32, i32, i32
  }
  func.func @transform_1(%arg0: i32) -> (i32, i32) {
    %c0_i32 = arith.constant 0 : i32
    %c0_i32_0 = arith.constant 0 : i32
    %c0_i32_1 = arith.constant 0 : i32
    return %c0_i32, %c0_i32_0 : i32, i32
  }
  func.func @transform_2(%arg0: i32) -> (i32, i32) {
    %c0_i32 = arith.constant 0 : i32
    %c0_i32_0 = arith.constant 0 : i32
    %c0_i32_1 = arith.constant 0 : i32
    return %c0_i32, %c0_i32_0 : i32, i32
  }
  func.func @transform_3(%arg0: i32) -> (i32, i32) {
    %c0_i32 = arith.constant 0 : i32
    %c0_i32_0 = arith.constant 0 : i32
    %c0_i32_1 = arith.constant 0 : i32
    return %c0_i32, %c0_i32_0 : i32, i32
  }
  func.func @transform_4(%arg0: i32) -> (i32, i32) {
    %c0_i32 = arith.constant 0 : i32
    %c0_i32_0 = arith.constant 0 : i32
    %c0_i32_1 = arith.constant 0 : i32
    return %c0_i32, %c0_i32_0 : i32, i32
  }
  func.func @transform_5(%arg0: i32) -> (i32, i32, i32) {
    %c0_i32 = arith.constant 0 : i32
    %c0_i32_0 = arith.constant 0 : i32
    %c0_i32_1 = arith.constant 0 : i32
    %c0_i32_2 = arith.constant 0 : i32
    return %c0_i32, %c0_i32_0, %c0_i32_1 : i32, i32, i32
  }
}

module attributes {stable_mosaic.version = 11 : i64} {
  func.func @_times_block_kernel(%arg0: i32, %arg1: memref<144x1152xf32, #tpu.memory_space<vmem>>, %arg2: memref<1x1152xf32, #tpu.memory_space<vmem>>, %arg3: memref<9x1152xf32, #tpu.memory_space<vmem>>, %arg4: memref<16x144xf32, #tpu.memory_space<vmem>>, %arg5: memref<16x1xf32, #tpu.memory_space<vmem>>, %arg6: memref<16x144xf32, #tpu.memory_space<vmem>>, %arg7: memref<16x1xf32, #tpu.memory_space<vmem>>, %arg8: memref<1152x48xf32, #tpu.memory_space<vmem>>, %arg9: memref<16x48xf32, #tpu.memory_space<vmem>>, %arg10: memref<16x1xf32, #tpu.memory_space<vmem>>, %arg11: memref<16x1xf32, #tpu.memory_space<vmem>>, %arg12: memref<16x48xf32, #tpu.memory_space<vmem>>) attributes {dimension_semantics = [#tpu.dimension_semantics<arbitrary>], iteration_bounds = array<i64: 1>, scalar_prefetch = 0 : i64, scratch_operands = 0 : i64, tpu.core_type = #tpu.core_type<tc>, window_params = [{pipeline_mode = #tpu.pipeline_mode<synchronous>, transform_indices = @transform_0, window_bounds = array<i64: 144, 1152>}, {pipeline_mode = #tpu.pipeline_mode<synchronous>, transform_indices = @transform_1, window_bounds = array<i64: 1, 1152>}, {pipeline_mode = #tpu.pipeline_mode<synchronous>, transform_indices = @transform_2, window_bounds = array<i64: 9, 1152>}, {pipeline_mode = #tpu.pipeline_mode<synchronous>, transform_indices = @transform_3, window_bounds = array<i64: 16, 144>}, {pipeline_mode = #tpu.pipeline_mode<synchronous>, transform_indices = @transform_4, window_bounds = array<i64: 16, 1>}, {pipeline_mode = #tpu.pipeline_mode<synchronous>, transform_indices = @transform_5, window_bounds = array<i64: 16, 144>}, {pipeline_mode = #tpu.pipeline_mode<synchronous>, transform_indices = @transform_6, window_bounds = array<i64: 16, 1>}, {pipeline_mode = #tpu.pipeline_mode<synchronous>, transform_indices = @transform_7, window_bounds = array<i64: 1152, 48>}, {pipeline_mode = #tpu.pipeline_mode<synchronous>, transform_indices = @transform_8, window_bounds = array<i64: 16, 48>}, {pipeline_mode = #tpu.pipeline_mode<synchronous>, transform_indices = @transform_9, window_bounds = array<i64: 16, 1>}, {pipeline_mode = #tpu.pipeline_mode<synchronous>, transform_indices = @transform_10, window_bounds = array<i64: 16, 1>}, {pipeline_mode = #tpu.pipeline_mode<synchronous>, transform_indices = @transform_11, window_bounds = array<i64: 16, 48>}]} {
    %c0 = arith.constant 0 : index
    %c0_0 = arith.constant 0 : index
    %0 = vector.load %arg4[%c0, %c0_0] : memref<16x144xf32, #tpu.memory_space<vmem>>, vector<16x144xf32>
    %c0_1 = arith.constant 0 : index
    %c0_2 = arith.constant 0 : index
    %1 = vector.load %arg1[%c0_1, %c0_2] : memref<144x1152xf32, #tpu.memory_space<vmem>>, vector<144x1152xf32>
    %cst = arith.constant dense<0.000000e+00> : vector<16x1152xf32>
    %2 = tpu.matmul %0, %1, %cst {dimension_numbers = #tpu.dot_dimension_numbers<[1], [0], [0], [1], [0, 0, 1, 1], [], []>} : vector<16x144xf32>, vector<144x1152xf32>, vector<16x1152xf32> -> vector<16x1152xf32>
    %c0_3 = arith.constant 0 : index
    %c0_4 = arith.constant 0 : index
    %3 = vector.load %arg5[%c0_3, %c0_4] : memref<16x1xf32, #tpu.memory_space<vmem>>, vector<16x1xf32>
    %4 = vector.broadcast %3 : vector<16x1xf32> to vector<16x1152xf32>
    %5 = arith.addf %2, %4 : vector<16x1152xf32>
    %cst_5 = arith.constant 5.000000e-01 : f32
    %6 = vector.broadcast %cst_5 : f32 to vector<16x1152xf32>
    %7 = arith.mulf %5, %6 : vector<16x1152xf32>
    %cst_6 = arith.constant 0.707106769 : f32
    %8 = vector.broadcast %cst_6 : f32 to vector<16x1152xf32>
    %9 = arith.mulf %7, %8 : vector<16x1152xf32>
    %cst_7 = arith.constant 0.000000e+00 : f32
    %10 = vector.broadcast %cst_7 : f32 to vector<16x1152xf32>
    %11 = arith.cmpf olt, %9, %10 : vector<16x1152xf32>
    %cst_8 = arith.constant -1.000000e+00 : f32
    %cst_9 = arith.constant 1.000000e+00 : f32
    %12 = vector.broadcast %cst_8 : f32 to vector<16x1152xf32>
    %13 = vector.broadcast %cst_9 : f32 to vector<16x1152xf32>
    %14 = arith.select %11, %12, %13 : vector<16x1152xi1>, vector<16x1152xf32>
    %15 = math.absf %9 : vector<16x1152xf32>
    %cst_10 = arith.constant 0.327591091 : f32
    %16 = vector.broadcast %cst_10 : f32 to vector<16x1152xf32>
    %17 = arith.mulf %16, %15 : vector<16x1152xf32>
    %cst_11 = arith.constant 1.000000e+00 : f32
    %18 = vector.broadcast %cst_11 : f32 to vector<16x1152xf32>
    %19 = arith.addf %18, %17 : vector<16x1152xf32>
    %cst_12 = arith.constant 1.000000e+00 : f32
    %20 = vector.broadcast %cst_12 : f32 to vector<16x1152xf32>
    %21 = arith.divf %20, %19 : vector<16x1152xf32>
    %cst_13 = arith.constant 1.06140542 : f32
    %22 = vector.broadcast %cst_13 : f32 to vector<16x1152xf32>
    %23 = arith.mulf %21, %22 : vector<16x1152xf32>
    %cst_14 = arith.constant -1.45315206 : f32
    %24 = vector.broadcast %cst_14 : f32 to vector<16x1152xf32>
    %25 = arith.addf %24, %23 : vector<16x1152xf32>
    %26 = arith.mulf %21, %25 : vector<16x1152xf32>
    %cst_15 = arith.constant 1.42141378 : f32
    %27 = vector.broadcast %cst_15 : f32 to vector<16x1152xf32>
    %28 = arith.addf %27, %26 : vector<16x1152xf32>
    %29 = arith.mulf %21, %28 : vector<16x1152xf32>
    %cst_16 = arith.constant -0.284496725 : f32
    %30 = vector.broadcast %cst_16 : f32 to vector<16x1152xf32>
    %31 = arith.addf %30, %29 : vector<16x1152xf32>
    %32 = arith.mulf %21, %31 : vector<16x1152xf32>
    %cst_17 = arith.constant 0.254829586 : f32
    %33 = vector.broadcast %cst_17 : f32 to vector<16x1152xf32>
    %34 = arith.addf %33, %32 : vector<16x1152xf32>
    %35 = arith.mulf %21, %34 : vector<16x1152xf32>
    %cst_18 = arith.constant 0.000000e+00 : f32
    %36 = vector.broadcast %cst_18 : f32 to vector<16x1152xf32>
    %37 = arith.subf %36, %15 : vector<16x1152xf32>
    %38 = arith.mulf %37, %15 : vector<16x1152xf32>
    %39 = math.exp %38 : vector<16x1152xf32>
    %40 = arith.mulf %35, %39 : vector<16x1152xf32>
    %cst_19 = arith.constant 1.000000e+00 : f32
    %41 = vector.broadcast %cst_19 : f32 to vector<16x1152xf32>
    %42 = arith.subf %41, %40 : vector<16x1152xf32>
    %43 = arith.mulf %14, %42 : vector<16x1152xf32>
    %cst_20 = arith.constant 5.000000e-01 : f32
    %44 = vector.broadcast %cst_20 : f32 to vector<16x1152xf32>
    %45 = arith.mulf %44, %7 : vector<16x1152xf32>
    %cst_21 = arith.constant 1.000000e+00 : f32
    %46 = vector.broadcast %cst_21 : f32 to vector<16x1152xf32>
    %47 = arith.addf %46, %43 : vector<16x1152xf32>
    %48 = arith.mulf %45, %47 : vector<16x1152xf32>
    %c0_22 = arith.constant 0 : index
    %c0_23 = arith.constant 0 : index
    %49 = vector.load %arg2[%c0_22, %c0_23] : memref<1x1152xf32, #tpu.memory_space<vmem>>, vector<1x1152xf32>
    %50 = vector.broadcast %49 : vector<1x1152xf32> to vector<16x1152xf32>
    %51 = arith.mulf %48, %50 : vector<16x1152xf32>
    %c0_24 = arith.constant 0 : index
    %c0_25 = arith.constant 0 : index
    %52 = vector.load %arg3[%c0_24, %c0_25] : memref<9x1152xf32, #tpu.memory_space<vmem>>, vector<9x1152xf32>
    %c25_i32 = arith.constant 25 : i32
    %53 = tpu.dynamic_rotate %51 by %c25_i32 dim 1 : vector<16x1152xf32>, i32 -> vector<16x1152xf32>
    %54 = vector.extract_strided_slice %52 {offsets = [0, 0], sizes = [1, 1152], strides = [1, 1]} : vector<9x1152xf32> to vector<1x1152xf32>
    %55 = vector.broadcast %54 : vector<1x1152xf32> to vector<16x1152xf32>
    %56 = arith.mulf %53, %55 : vector<16x1152xf32>
    %c24_i32 = arith.constant 24 : i32
    %57 = tpu.dynamic_rotate %51 by %c24_i32 dim 1 : vector<16x1152xf32>, i32 -> vector<16x1152xf32>
    %58 = vector.extract_strided_slice %52 {offsets = [1, 0], sizes = [1, 1152], strides = [1, 1]} : vector<9x1152xf32> to vector<1x1152xf32>
    %59 = vector.broadcast %58 : vector<1x1152xf32> to vector<16x1152xf32>
    %60 = arith.mulf %57, %59 : vector<16x1152xf32>
    %c23_i32 = arith.constant 23 : i32
    %61 = tpu.dynamic_rotate %51 by %c23_i32 dim 1 : vector<16x1152xf32>, i32 -> vector<16x1152xf32>
    %62 = vector.extract_strided_slice %52 {offsets = [2, 0], sizes = [1, 1152], strides = [1, 1]} : vector<9x1152xf32> to vector<1x1152xf32>
    %63 = vector.broadcast %62 : vector<1x1152xf32> to vector<16x1152xf32>
    %64 = arith.mulf %61, %63 : vector<16x1152xf32>
    %c1_i32 = arith.constant 1 : i32
    %65 = tpu.dynamic_rotate %51 by %c1_i32 dim 1 : vector<16x1152xf32>, i32 -> vector<16x1152xf32>
    %66 = vector.extract_strided_slice %52 {offsets = [3, 0], sizes = [1, 1152], strides = [1, 1]} : vector<9x1152xf32> to vector<1x1152xf32>
    %67 = vector.broadcast %66 : vector<1x1152xf32> to vector<16x1152xf32>
    %68 = arith.mulf %65, %67 : vector<16x1152xf32>
    %c1151_i32 = arith.constant 1151 : i32
    %69 = tpu.dynamic_rotate %51 by %c1151_i32 dim 1 : vector<16x1152xf32>, i32 -> vector<16x1152xf32>
    %70 = vector.extract_strided_slice %52 {offsets = [5, 0], sizes = [1, 1152], strides = [1, 1]} : vector<9x1152xf32> to vector<1x1152xf32>
    %71 = vector.broadcast %70 : vector<1x1152xf32> to vector<16x1152xf32>
    %72 = arith.mulf %69, %71 : vector<16x1152xf32>
    %c1129_i32 = arith.constant 1129 : i32
    %73 = tpu.dynamic_rotate %51 by %c1129_i32 dim 1 : vector<16x1152xf32>, i32 -> vector<16x1152xf32>
    %74 = vector.extract_strided_slice %52 {offsets = [6, 0], sizes = [1, 1152], strides = [1, 1]} : vector<9x1152xf32> to vector<1x1152xf32>
    %75 = vector.broadcast %74 : vector<1x1152xf32> to vector<16x1152xf32>
    %76 = arith.mulf %73, %75 : vector<16x1152xf32>
    %c1128_i32 = arith.constant 1128 : i32
    %77 = tpu.dynamic_rotate %51 by %c1128_i32 dim 1 : vector<16x1152xf32>, i32 -> vector<16x1152xf32>
    %78 = vector.extract_strided_slice %52 {offsets = [7, 0], sizes = [1, 1152], strides = [1, 1]} : vector<9x1152xf32> to vector<1x1152xf32>
    %79 = vector.broadcast %78 : vector<1x1152xf32> to vector<16x1152xf32>
    %80 = arith.mulf %77, %79 : vector<16x1152xf32>
    %c1127_i32 = arith.constant 1127 : i32
    %81 = tpu.dynamic_rotate %51 by %c1127_i32 dim 1 : vector<16x1152xf32>, i32 -> vector<16x1152xf32>
    %82 = vector.extract_strided_slice %52 {offsets = [8, 0], sizes = [1, 1152], strides = [1, 1]} : vector<9x1152xf32> to vector<1x1152xf32>
    %83 = vector.broadcast %82 : vector<1x1152xf32> to vector<16x1152xf32>
    %84 = arith.mulf %81, %83 : vector<16x1152xf32>
    %85 = tpu.concatenate %56, %60, %64, %68, %51, %72, %76, %80, %84 in 0 : vector<16x1152xf32>, vector<16x1152xf32>, vector<16x1152xf32>, vector<16x1152xf32>, vector<16x1152xf32>, vector<16x1152xf32>, vector<16x1152xf32>, vector<16x1152xf32>, vector<16x1152xf32> -> vector<144x1152xf32>
    %c0_26 = arith.constant 0 : index
    %c0_27 = arith.constant 0 : index
    %86 = vector.load %arg6[%c0_26, %c0_27] : memref<16x144xf32, #tpu.memory_space<vmem>>, vector<16x144xf32>
    %cst_28 = arith.constant dense<0.000000e+00> : vector<16x1152xf32>
    %87 = tpu.matmul %86, %85, %cst_28 {dimension_numbers = #tpu.dot_dimension_numbers<[1], [0], [0], [1], [0, 0, 1, 1], [], []>} : vector<16x144xf32>, vector<144x1152xf32>, vector<16x1152xf32> -> vector<16x1152xf32>
    %c0_29 = arith.constant 0 : index
    %c0_30 = arith.constant 0 : index
    %88 = vector.load %arg7[%c0_29, %c0_30] : memref<16x1xf32, #tpu.memory_space<vmem>>, vector<16x1xf32>
    %89 = vector.broadcast %88 : vector<16x1xf32> to vector<16x1152xf32>
    %90 = arith.addf %87, %89 : vector<16x1152xf32>
    %cst_31 = arith.constant 5.000000e-01 : f32
    %91 = vector.broadcast %cst_31 : f32 to vector<16x1152xf32>
    %92 = arith.mulf %90, %91 : vector<16x1152xf32>
    %c0_32 = arith.constant 0 : index
    %c0_33 = arith.constant 0 : index
    %93 = vector.load %arg8[%c0_32, %c0_33] : memref<1152x48xf32, #tpu.memory_space<vmem>>, vector<1152x48xf32>
    %cst_34 = arith.constant dense<0.000000e+00> : vector<16x48xf32>
    %94 = tpu.matmul %92, %93, %cst_34 {dimension_numbers = #tpu.dot_dimension_numbers<[1], [0], [0], [1], [0, 0, 1, 1], [], []>} : vector<16x1152xf32>, vector<1152x48xf32>, vector<16x48xf32> -> vector<16x48xf32>
    %c0_35 = arith.constant 0 : index
    %c0_36 = arith.constant 0 : index
    %95 = vector.load %arg9[%c0_35, %c0_36] : memref<16x48xf32, #tpu.memory_space<vmem>>, vector<16x48xf32>
    %96 = arith.addf %94, %95 : vector<16x48xf32>
    %cst_37 = arith.constant dense<0.000000e+00> : vector<48xf32>
    %97 = vector.multi_reduction <add>, %96, %cst_37 [0] : vector<16x48xf32> to vector<48xf32>
    %98 = vector.shape_cast %97 : vector<48xf32> to vector<1x48xf32>
    %cst_38 = arith.constant 1.600000e+01 : f32
    %99 = vector.broadcast %cst_38 : f32 to vector<1x48xf32>
    %100 = arith.divf %98, %99 : vector<1x48xf32>
    %101 = vector.broadcast %100 : vector<1x48xf32> to vector<16x48xf32>
    %102 = arith.subf %96, %101 : vector<16x48xf32>
    %103 = arith.mulf %102, %102 : vector<16x48xf32>
    %cst_39 = arith.constant dense<0.000000e+00> : vector<48xf32>
    %104 = vector.multi_reduction <add>, %103, %cst_39 [0] : vector<16x48xf32> to vector<48xf32>
    %105 = vector.shape_cast %104 : vector<48xf32> to vector<1x48xf32>
    %cst_40 = arith.constant 1.600000e+01 : f32
    %106 = vector.broadcast %cst_40 : f32 to vector<1x48xf32>
    %107 = arith.divf %105, %106 : vector<1x48xf32>
    %cst_41 = arith.constant 9.99999974E-6 : f32
    %108 = vector.broadcast %cst_41 : f32 to vector<1x48xf32>
    %109 = arith.addf %107, %108 : vector<1x48xf32>
    %110 = math.rsqrt %109 : vector<1x48xf32>
    %111 = vector.broadcast %110 : vector<1x48xf32> to vector<16x48xf32>
    %112 = arith.mulf %102, %111 : vector<16x48xf32>
    %c0_42 = arith.constant 0 : index
    %c0_43 = arith.constant 0 : index
    %113 = vector.load %arg10[%c0_42, %c0_43] : memref<16x1xf32, #tpu.memory_space<vmem>>, vector<16x1xf32>
    %114 = vector.broadcast %113 : vector<16x1xf32> to vector<16x48xf32>
    %115 = arith.mulf %112, %114 : vector<16x48xf32>
    %c0_44 = arith.constant 0 : index
    %c0_45 = arith.constant 0 : index
    %116 = vector.load %arg11[%c0_44, %c0_45] : memref<16x1xf32, #tpu.memory_space<vmem>>, vector<16x1xf32>
    %117 = vector.broadcast %116 : vector<16x1xf32> to vector<16x48xf32>
    %118 = arith.addf %115, %117 : vector<16x48xf32>
    %c0_46 = arith.constant 0 : index
    %c0_47 = arith.constant 0 : index
    %119 = vector.load %arg12[%c0_46, %c0_47] : memref<16x48xf32, #tpu.memory_space<vmem>>, vector<16x48xf32>
    tpu.vector_store %arg12[%c0_46, %c0_47], %118 {strides = array<i32>} : memref<16x48xf32, #tpu.memory_space<vmem>>, vector<16x48xf32>,
    return
  }
  func.func @transform_0(%arg0: i32) -> (i32, i32) {
    %c0_i32 = arith.constant 0 : i32
    %c0_i32_0 = arith.constant 0 : i32
    %c0_i32_1 = arith.constant 0 : i32
    return %c0_i32, %c0_i32_0 : i32, i32
  }
  func.func @transform_1(%arg0: i32) -> (i32, i32) {
    %c0_i32 = arith.constant 0 : i32
    %c0_i32_0 = arith.constant 0 : i32
    %c0_i32_1 = arith.constant 0 : i32
    return %c0_i32, %c0_i32_0 : i32, i32
  }
  func.func @transform_2(%arg0: i32) -> (i32, i32) {
    %c0_i32 = arith.constant 0 : i32
    %c0_i32_0 = arith.constant 0 : i32
    %c0_i32_1 = arith.constant 0 : i32
    return %c0_i32, %c0_i32_0 : i32, i32
  }
  func.func @transform_3(%arg0: i32) -> (i32, i32) {
    %c0_i32 = arith.constant 0 : i32
    %c0_i32_0 = arith.constant 0 : i32
    %c0_i32_1 = arith.constant 0 : i32
    return %c0_i32, %c0_i32_0 : i32, i32
  }
  func.func @transform_4(%arg0: i32) -> (i32, i32) {
    %c0_i32 = arith.constant 0 : i32
    %c0_i32_0 = arith.constant 0 : i32
    %c0_i32_1 = arith.constant 0 : i32
    return %c0_i32, %c0_i32_0 : i32, i32
  }
  func.func @transform_5(%arg0: i32) -> (i32, i32) {
    %c0_i32 = arith.constant 0 : i32
    %c0_i32_0 = arith.constant 0 : i32
    %c0_i32_1 = arith.constant 0 : i32
    return %c0_i32, %c0_i32_0 : i32, i32
  }
  func.func @transform_6(%arg0: i32) -> (i32, i32) {
    %c0_i32 = arith.constant 0 : i32
    %c0_i32_0 = arith.constant 0 : i32
    %c0_i32_1 = arith.constant 0 : i32
    return %c0_i32, %c0_i32_0 : i32, i32
  }
  func.func @transform_7(%arg0: i32) -> (i32, i32) {
    %c0_i32 = arith.constant 0 : i32
    %c0_i32_0 = arith.constant 0 : i32
    %c0_i32_1 = arith.constant 0 : i32
    return %c0_i32, %c0_i32_0 : i32, i32
  }
  func.func @transform_8(%arg0: i32) -> (i32, i32) {
    %c0_i32 = arith.constant 0 : i32
    %c0_i32_0 = arith.constant 0 : i32
    %c0_i32_1 = arith.constant 0 : i32
    return %c0_i32, %c0_i32_0 : i32, i32
  }
  func.func @transform_9(%arg0: i32) -> (i32, i32) {
    %c0_i32 = arith.constant 0 : i32
    %c0_i32_0 = arith.constant 0 : i32
    %c0_i32_1 = arith.constant 0 : i32
    return %c0_i32, %c0_i32_0 : i32, i32
  }
  func.func @transform_10(%arg0: i32) -> (i32, i32) {
    %c0_i32 = arith.constant 0 : i32
    %c0_i32_0 = arith.constant 0 : i32
    %c0_i32_1 = arith.constant 0 : i32
    return %c0_i32, %c0_i32_0 : i32, i32
  }
  func.func @transform_11(%arg0: i32) -> (i32, i32) {
    %c0_i32 = arith.constant 0 : i32
    %c0_i32_0 = arith.constant 0 : i32
    %c0_i32_1 = arith.constant 0 : i32
    return %c0_i32, %c0_i32_0 : i32, i32
  }
}

module attributes {stable_mosaic.version = 11 : i64} {
  func.func @_proj_denorm_kernel(%arg0: i32, %arg1: memref<2x8x16xf32, #tpu.memory_space<vmem>>, %arg2: memref<16x4xf32, #tpu.memory_space<vmem>>, %arg3: memref<1x4xf32, #tpu.memory_space<vmem>>, %arg4: memref<2x1x4xf32, #tpu.memory_space<vmem>>, %arg5: memref<2x1x4xf32, #tpu.memory_space<vmem>>, %arg6: memref<2x8x4xf32, #tpu.memory_space<vmem>>) attributes {dimension_semantics = [#tpu.dimension_semantics<arbitrary>], iteration_bounds = array<i64: 1>, scalar_prefetch = 0 : i64, scratch_operands = 0 : i64, tpu.core_type = #tpu.core_type<tc>, window_params = [{pipeline_mode = #tpu.pipeline_mode<synchronous>, transform_indices = @transform_0, window_bounds = array<i64: 2, 8, 16>}, {pipeline_mode = #tpu.pipeline_mode<synchronous>, transform_indices = @transform_1, window_bounds = array<i64: 16, 4>}, {pipeline_mode = #tpu.pipeline_mode<synchronous>, transform_indices = @transform_2, window_bounds = array<i64: 1, 4>}, {pipeline_mode = #tpu.pipeline_mode<synchronous>, transform_indices = @transform_3, window_bounds = array<i64: 2, 1, 4>}, {pipeline_mode = #tpu.pipeline_mode<synchronous>, transform_indices = @transform_4, window_bounds = array<i64: 2, 1, 4>}, {pipeline_mode = #tpu.pipeline_mode<synchronous>, transform_indices = @transform_5, window_bounds = array<i64: 2, 8, 4>}]} {
    %c0 = arith.constant 0 : index
    %c0_0 = arith.constant 0 : index
    %0 = vector.load %arg2[%c0, %c0_0] : memref<16x4xf32, #tpu.memory_space<vmem>>, vector<16x4xf32>
    %c0_1 = arith.constant 0 : index
    %c0_2 = arith.constant 0 : index
    %1 = vector.load %arg3[%c0_1, %c0_2] : memref<1x4xf32, #tpu.memory_space<vmem>>, vector<1x4xf32>
    %c0_3 = arith.constant 0 : index
    %c0_4 = arith.constant 0 : index
    %c0_5 = arith.constant 0 : index
    %2 = vector.load %arg1[%c0_3, %c0_4, %c0_5] : memref<2x8x16xf32, #tpu.memory_space<vmem>>, vector<1x8x16xf32>
    %3 = vector.shape_cast %2 : vector<1x8x16xf32> to vector<8x16xf32>
    %cst = arith.constant dense<0.000000e+00> : vector<8x4xf32>
    %4 = tpu.matmul %3, %0, %cst {dimension_numbers = #tpu.dot_dimension_numbers<[1], [0], [0], [1], [0, 0, 1, 1], [], []>} : vector<8x16xf32>, vector<16x4xf32>, vector<8x4xf32> -> vector<8x4xf32>
    %5 = vector.broadcast %1 : vector<1x4xf32> to vector<8x4xf32>
    %6 = arith.addf %4, %5 : vector<8x4xf32>
    %c0_6 = arith.constant 0 : index
    %c0_7 = arith.constant 0 : index
    %c0_8 = arith.constant 0 : index
    %7 = vector.load %arg4[%c0_6, %c0_7, %c0_8] : memref<2x1x4xf32, #tpu.memory_space<vmem>>, vector<1x1x4xf32>
    %8 = vector.shape_cast %7 : vector<1x1x4xf32> to vector<1x4xf32>
    %9 = vector.broadcast %8 : vector<1x4xf32> to vector<8x4xf32>
    %10 = arith.mulf %6, %9 : vector<8x4xf32>
    %c0_9 = arith.constant 0 : index
    %c0_10 = arith.constant 0 : index
    %c0_11 = arith.constant 0 : index
    %11 = vector.load %arg5[%c0_9, %c0_10, %c0_11] : memref<2x1x4xf32, #tpu.memory_space<vmem>>, vector<1x1x4xf32>
    %12 = vector.shape_cast %11 : vector<1x1x4xf32> to vector<1x4xf32>
    %13 = vector.broadcast %12 : vector<1x4xf32> to vector<8x4xf32>
    %14 = arith.addf %10, %13 : vector<8x4xf32>
    %c0_12 = arith.constant 0 : index
    %c0_13 = arith.constant 0 : index
    %c0_14 = arith.constant 0 : index
    %15 = vector.load %arg6[%c0_12, %c0_13, %c0_14] : memref<2x8x4xf32, #tpu.memory_space<vmem>>, vector<1x8x4xf32>
    %16 = vector.shape_cast %15 : vector<1x8x4xf32> to vector<8x4xf32>
    %17 = vector.shape_cast %14 : vector<8x4xf32> to vector<1x8x4xf32>
    tpu.vector_store %arg6[%c0_12, %c0_13, %c0_14], %17 {strides = array<i32>} : memref<2x8x4xf32, #tpu.memory_space<vmem>>, vector<1x8x4xf32>,
    %c1 = arith.constant 1 : index
    %c0_15 = arith.constant 0 : index
    %c0_16 = arith.constant 0 : index
    %18 = vector.load %arg1[%c1, %c0_15, %c0_16] : memref<2x8x16xf32, #tpu.memory_space<vmem>>, vector<1x8x16xf32>
    %19 = vector.shape_cast %18 : vector<1x8x16xf32> to vector<8x16xf32>
    %cst_17 = arith.constant dense<0.000000e+00> : vector<8x4xf32>
    %20 = tpu.matmul %19, %0, %cst_17 {dimension_numbers = #tpu.dot_dimension_numbers<[1], [0], [0], [1], [0, 0, 1, 1], [], []>} : vector<8x16xf32>, vector<16x4xf32>, vector<8x4xf32> -> vector<8x4xf32>
    %21 = vector.broadcast %1 : vector<1x4xf32> to vector<8x4xf32>
    %22 = arith.addf %20, %21 : vector<8x4xf32>
    %c1_18 = arith.constant 1 : index
    %c0_19 = arith.constant 0 : index
    %c0_20 = arith.constant 0 : index
    %23 = vector.load %arg4[%c1_18, %c0_19, %c0_20] : memref<2x1x4xf32, #tpu.memory_space<vmem>>, vector<1x1x4xf32>
    %24 = vector.shape_cast %23 : vector<1x1x4xf32> to vector<1x4xf32>
    %25 = vector.broadcast %24 : vector<1x4xf32> to vector<8x4xf32>
    %26 = arith.mulf %22, %25 : vector<8x4xf32>
    %c1_21 = arith.constant 1 : index
    %c0_22 = arith.constant 0 : index
    %c0_23 = arith.constant 0 : index
    %27 = vector.load %arg5[%c1_21, %c0_22, %c0_23] : memref<2x1x4xf32, #tpu.memory_space<vmem>>, vector<1x1x4xf32>
    %28 = vector.shape_cast %27 : vector<1x1x4xf32> to vector<1x4xf32>
    %29 = vector.broadcast %28 : vector<1x4xf32> to vector<8x4xf32>
    %30 = arith.addf %26, %29 : vector<8x4xf32>
    %c1_24 = arith.constant 1 : index
    %c0_25 = arith.constant 0 : index
    %c0_26 = arith.constant 0 : index
    %31 = vector.load %arg6[%c1_24, %c0_25, %c0_26] : memref<2x8x4xf32, #tpu.memory_space<vmem>>, vector<1x8x4xf32>
    %32 = vector.shape_cast %31 : vector<1x8x4xf32> to vector<8x4xf32>
    %33 = vector.shape_cast %30 : vector<8x4xf32> to vector<1x8x4xf32>
    tpu.vector_store %arg6[%c1_24, %c0_25, %c0_26], %33 {strides = array<i32>} : memref<2x8x4xf32, #tpu.memory_space<vmem>>, vector<1x8x4xf32>,
    return
  }
  func.func @transform_0(%arg0: i32) -> (i32, i32, i32) {
    %c0_i32 = arith.constant 0 : i32
    %c0_i32_0 = arith.constant 0 : i32
    %c0_i32_1 = arith.constant 0 : i32
    %c0_i32_2 = arith.constant 0 : i32
    return %c0_i32, %c0_i32_0, %c0_i32_1 : i32, i32, i32
  }
  func.func @transform_1(%arg0: i32) -> (i32, i32) {
    %c0_i32 = arith.constant 0 : i32
    %c0_i32_0 = arith.constant 0 : i32
    %c0_i32_1 = arith.constant 0 : i32
    return %c0_i32, %c0_i32_0 : i32, i32
  }
  func.func @transform_2(%arg0: i32) -> (i32, i32) {
    %c0_i32 = arith.constant 0 : i32
    %c0_i32_0 = arith.constant 0 : i32
    %c0_i32_1 = arith.constant 0 : i32
    return %c0_i32, %c0_i32_0 : i32, i32
  }
  func.func @transform_3(%arg0: i32) -> (i32, i32, i32) {
    %c0_i32 = arith.constant 0 : i32
    %c0_i32_0 = arith.constant 0 : i32
    %c0_i32_1 = arith.constant 0 : i32
    %c0_i32_2 = arith.constant 0 : i32
    return %c0_i32, %c0_i32_0, %c0_i32_1 : i32, i32, i32
  }
  func.func @transform_4(%arg0: i32) -> (i32, i32, i32) {
    %c0_i32 = arith.constant 0 : i32
    %c0_i32_0 = arith.constant 0 : i32
    %c0_i32_1 = arith.constant 0 : i32
    %c0_i32_2 = arith.constant 0 : i32
    return %c0_i32, %c0_i32_0, %c0_i32_1 : i32, i32, i32
  }
  func.func @transform_5(%arg0: i32) -> (i32, i32, i32) {
    %c0_i32 = arith.constant 0 : i32
    %c0_i32_0 = arith.constant 0 : i32
    %c0_i32_1 = arith.constant 0 : i32
    %c0_i32_2 = arith.constant 0 : i32
    return %c0_i32, %c0_i32_0, %c0_i32_1 : i32, i32, i32
  }
}

</mosaic_0001>

<bundles_post_ra>
// kernel: model_forward.4
= control target key start
LH: loop header
LB: loop body
LE: loop exit
PB: predicated region body
PF: predicated region fallthrough
CT: control target
= control target key end

     0   :  { %10 = vsyncpa [#allocation3], 0  ;;  %s662_s0 = inlined_call_operand.vmem [shape: f32[2,16,16], index: 0, kind: input, shape index: {}]   ;;  %s663_s1 = inlined_call_operand.hbm [shape: f32[16,16], index: 1, kind: input, shape index: {}]   ;;  %s664_s2 = inlined_call_operand.hbm [shape: f32[16,16], index: 2, kind: input, shape index: {}]   ;;  %s665_s3 = inlined_call_operand.vmem [shape: f32[24,16], index: 3, kind: input, shape index: {}]   ;;  %s666_s4 = inlined_call_operand.vmem [shape: f32[24,1], index: 4, kind: input, shape index: {}]   ;;  %s667_s5 = inlined_call_operand.vmem [shape: f32[2,24,16], index: 5, kind: output, shape index: {}]  }
   0x1   :  { %11 = vsyncpa [#allocation5], 0  ;;  %s549_s18 = smov [#allocation2]  }
   0x2   :  { %s19_s19 = sshll.u32 %s549_s18, 4  ;;  %s20_s19 = int_to_ptr.vmem [resolvable:$true] %s19_s19 }
   0x3   :  { %s513_s20 = scalar_lea.vmem %s20_s19, 256  ;;  %p518_p1 = scmp.lt.s32.totalorder %s20_s19, %s20_s19 }
   0x4   :  { %p514_p0 = scmp.ne.s32.totalorder %s20_s19, %s513_s20  ;;  %p519_p2 = scmp.lt.s32.totalorder %s513_s20, %s513_s20 }
   0x6   :  { %p520_p3 = por %p519_p2, %p518_p1 }
   0x8   :  { %p521_p4 = pnand %p520_p3, %p514_p0 }
   0xa   :  { %524 = shalt.err (!%p521_p4)
}
   0xb   :  { %s550_s21 = smov 128   ;;  %s551_s22 = smov 8  }
   0xc   :  { %25 = dma.hbm_to_vmem [thread:$0]  %s663_s1, 256, %s20_s19, [#allocation3], %s550_s21, %s550_s21, %s551_s22  }
   0xd   :  { %s552_s25 = smov [#allocation4]  }
   0xe   :  { %s31_s26 = sshll.u32 %s552_s25, 4  ;;  %s32_s26 = int_to_ptr.vmem [resolvable:$true] %s31_s26 }
   0xf   :  { %s533_s27 = scalar_lea.vmem %s32_s26, 256  ;;  %p538_p6 = scmp.lt.s32.totalorder %s32_s26, %s32_s26 }
  0x10   :  { %p534_p5 = scmp.ne.s32.totalorder %s32_s26, %s533_s27  ;;  %p539_p7 = scmp.lt.s32.totalorder %s533_s27, %s533_s27 }
  0x12   :  { %p540_p8 = por %p539_p7, %p538_p6 }
  0x14   :  { %p541_p9 = pnand %p540_p8, %p534_p5 }
  0x16   :  { %544 = shalt.err (!%p541_p9)
}
  0x17   :  { %37 = dma.hbm_to_vmem [thread:$0]  %s664_s2, 256, %s32_s26, [#allocation5], %s550_s21, %s550_s21, %s551_s22  }
  0x18   :  { %545 = dma.done.wait [#allocation3], 256  }
  0x19   :  { %546 = vsyncadd [#allocation3], 4294967040 }
  0x1a   :  { %547 = dma.done.wait [#allocation5], 256  }
  0x1b   :  { %548 = vsyncadd [#allocation5], 4294967040  ;;  %v49_v0 = vld [vmem:[#allocation2 + $0x8] sm:$0xff]  ;;  %v48_v1 = vld [vmem:[#allocation2] sm:$0xff]  ;;  %vm60_vm0 = vcmask 130048   ;;  %v553_v6 = vmov 0.0  }
  0x1c   :  { %456 = vmatprep.subr.mxu1 %v49_v0  ;;  %476 = vmatprep.subr.mxu0 %v49_v0  ;;  %v58_v2 = vld [vmem:[%s662_s0] sm:$0xff]  ;;  %v428_v3 = vld [vmem:[%s662_s0 + $0x10] sm:$0xff]  ;;  %v59_v4 = vld [vmem:[%s662_s0 + $0x8] sm:$0xff]  ;;  %vm554_vm1 = vmmov 0   ;;  %v555_v9 = vmov 0  }
  0x1d   :  { %457 = vmatpush3.msra.mxu1 %v49_v0  ;;  %477 = vmatpush3.msra.mxu0 %v49_v0  ;;  %v429_v5 = vld [vmem:[%s662_s0 + $0x18] sm:$0xff]  ;;  %v55_v7 = vld [vmem:[%s666_s4] sm:$0xff]  ;;  %v57_v8 = vld [vmem:[%s666_s4 + $0x10] sm:$0xff] }
  0x1e   :  { %458 = vmatprep.subr.mxu1 %v48_v1  ;;  %478 = vmatprep.subr.mxu0 %v48_v1  ;;  %v56_v10 = vld [vmem:[%s666_s4 + $0x8] sm:$0xff]  ;;  %v51_v11 = vld [vmem:[#allocation4 + $0x8] sm:$0xff]  ;;  %v50_v14 = vld [vmem:[#allocation4] sm:$0xff] }
  0x1f   :  { %459 = vmatpush3.msra.mxu1 %v48_v1  ;;  %460 = vmatprep.mubr.msk.f32.mxu1 %vm60_vm0, %v58_v2  ;;  %v52_v21 = vld [vmem:[%s665_s3] sm:$0xff]  ;;  %v53_v22 = vld [vmem:[%s665_s3 + $0x8] sm:$0xff]  ;;  %v54_v23 = vld [vmem:[%s665_s3 + $0x10] sm:$0xff] }
  0x20   :  { %479 = vmatpush3.msra.mxu0 %v48_v1  ;;  %480 = vmatprep.mubr.msk.f32.mxu0 %vm60_vm0, %v428_v3 }
  0x21   :  { %461 = vmatmul.mubr.msk.f32.vlgmr.msra.gmra.mxu1 %vm60_vm0, %v59_v4  ;;  %481 = vmatmul.mubr.msk.f32.vlgmr.msra.gmra.mxu0 %vm60_vm0, %v429_v5 }
  0x22   :  { %463 = vmatprep.subr.mxu1 %v553_v6  ;;  %483 = vmatprep.subr.mxu0 %v553_v6 }
  0x23   :  { %467 = vmatprep.mubr.msk.f32.mxu1 %vm554_vm1, %v553_v6  ;;  %487 = vmatprep.mubr.msk.f32.mxu0 %vm554_vm1, %v553_v6 }
  0x24   :  { %503 = vset.pattern.permute.xlu0 %v555_v9  ;;  %504 = vset.pattern.permute.xlu1 %v555_v9 }
  0x25   :  { %144 = vperm.xlu0 %503, %v55_v7   ;;  %154 = vperm.xlu1 %504, %v57_v8  }
  0x29   :  { %149 = vperm.xlu0 %503, %v56_v10  }
  0xa0   :  { %v145_v24 = vpop.permute.xlu0 %144  ;;  %v155_v36 = vpop.permute.xlu1 %154 }
  0xa4   :  { %v150_v29 = vpop.permute.xlu0 %149 }
  0xe1   :  { %v462_v12 = vpop.f32.mrf.mxu1  ;;  %v482_v13 = vpop.f32.mrf.mxu0 }
  0xe2   :  { %v139_v15 = vadd.f32 %v462_v12, %v51_v11  ;;  %v330_v16 = vadd.f32 %v482_v13, %v51_v11 }
  0xe3   :  { %v133_v17 = vpop.f32.mrf.mxu1  ;;  %v324_v18 = vpop.f32.mrf.mxu0 }
  0xe4   :  { %v134_v19 = vadd.f32 %v133_v17, %v50_v14  ;;  %v325_v20 = vadd.f32 %v324_v18, %v50_v14  ;;  %464 = vmatpush3.msra.mxu1 %v139_v15  ;;  %484 = vmatpush3.msra.mxu0 %v330_v16 }
  0xe5   :  { %465 = vmatprep.subr.mxu1 %v553_v6  ;;  %485 = vmatprep.subr.mxu0 %v553_v6 }
  0xe6   :  { %466 = vmatpush3.msra.mxu1 %v134_v19  ;;  %486 = vmatpush3.msra.mxu0 %v325_v20 }
  0xe7   :  { %468 = vmatmul.mubr.msk.f32.vlgmr.msra.gmra.mxu1 %vm60_vm0, %v52_v21  ;;  %488 = vmatmul.mubr.msk.f32.vlgmr.msra.gmra.mxu0 %vm60_vm0, %v52_v21 }
  0xe8   :  { %470 = vmatprep.mubr.msk.f32.mxu1 %vm554_vm1, %v553_v6  ;;  %490 = vmatprep.mubr.msk.f32.mxu0 %vm554_vm1, %v553_v6 }
  0xeb   :  { %471 = vmatmul.mubr.msk.f32.gmra.mxu1 %vm60_vm0, %v53_v22  ;;  %491 = vmatmul.mubr.msk.f32.gmra.mxu0 %vm60_vm0, %v53_v22 }
  0xec   :  { %473 = vmatprep.mubr.msk.f32.mxu1 %vm554_vm1, %v553_v6  ;;  %493 = vmatprep.mubr.msk.f32.mxu0 %vm554_vm1, %v553_v6 }
  0xef   :  { %474 = vmatmul.mubr.msk.f32.gmra.mxu1 %vm60_vm0, %v54_v23  ;;  %494 = vmatmul.mubr.msk.f32.gmra.mxu0 %vm60_vm0, %v54_v23 }
 0x1a7   :  { %v232_v25 = vpop.f32.mrf.mxu1  ;;  %v399_v26 = vpop.f32.mrf.mxu0 }
 0x1a8   :  { %v233_v27 = vadd.f32 %v232_v25, %v145_v24  ;;  %v400_v28 = vadd.f32 %v399_v26, %v145_v24 }
 0x1a9   :  { %v469_v30 = vpop.f32.mrf.mxu1  ;;  %v489_v31 = vpop.f32.mrf.mxu0 }
 0x1aa   :  { %246 = vst.msk [vmem:[%s667_s5] sm:$0xff] %vm60_vm0, %v233_v27  ;;  %435 = vst.msk [vmem:[%s667_s5 + $0x18] sm:$0xff] %vm60_vm0, %v400_v28 }
 0x1ab   :  { %v237_v32 = vpop.f32.mrf.mxu1  ;;  %v404_v33 = vpop.f32.mrf.mxu0 }
 0x1ac   :  { %v238_v34 = vadd.f32 %v237_v32, %v150_v29  ;;  %v405_v35 = vadd.f32 %v404_v33, %v150_v29 }
 0x1ad   :  { %v472_v37 = vpop.f32.mrf.mxu1  ;;  %v492_v38 = vpop.f32.mrf.mxu0 }
 0x1ae   :  { %247 = vst.msk [vmem:[%s667_s5 + $0x8] sm:$0xff] %vm60_vm0, %v238_v34  ;;  %436 = vst.msk [vmem:[%s667_s5 + $0x20] sm:$0xff] %vm60_vm0, %v405_v35 }
 0x1af   :  { %v242_v39 = vpop.f32.mrf.mxu1  ;;  %v409_v40 = vpop.f32.mrf.mxu0 }
 0x1b0   :  { %v243_v41 = vadd.f32 %v242_v39, %v155_v36  ;;  %v410_v42 = vadd.f32 %v409_v40, %v155_v36 }
 0x1b1   :  { %v475_v43 = vpop.f32.mrf.mxu1  ;;  %v495_v44 = vpop.f32.mrf.mxu0 }
 0x1b2   :  { %248 = vst.msk [vmem:[%s667_s5 + $0x10] sm:$0xff] %vm60_vm0, %v243_v41  ;;  %437 = vst.msk [vmem:[%s667_s5 + $0x28] sm:$0xff] %vm60_vm0, %v410_v42 }
 0x1b3   :  { %421 = vsyncpa [#allocation3], 1 }
 0x1b4   :  { %422 = vsyncpa [#allocation5], 1 }

// kernel: model_forward.7
= control target key start
LH: loop header
LB: loop body
LE: loop exit
PB: predicated region body
PF: predicated region fallthrough
CT: control target
= control target key end

     0   :  { %v254_v0 = vmov 0.0   ;;  %vm30_vm0 = vcmask 130048   ;;  %vm255_vm1 = vmmov 0   ;;  %vm120_vm2 = vcmask 31744   ;;  %s319_s1 = inlined_call_operand.vmem [shape: f32[16,4], index: 1, kind: input, shape index: {}]   ;;  %s320_s0 = inlined_call_operand.vmem [shape: f32[2,8,16], index: 0, kind: input, shape index: {}]   ;;  %s321_s2 = inlined_call_operand.vmem [shape: f32[1,4], index: 2, kind: input, shape index: {}]   ;;  %s322_s3 = inlined_call_operand.vmem [shape: f32[2,1,4], index: 3, kind: input, shape index: {}]   ;;  %s323_s4 = inlined_call_operand.vmem [shape: f32[2,1,4], index: 4, kind: input, shape index: {}]   ;;  %s324_s5 = inlined_call_operand.vmem [shape: f32[2,8,4], index: 5, kind: output, shape index: {}]  }
   0x1   :  { %238 = vmatprep.subr.mxu0 %v254_v0  ;;  %245 = vmatprep.subr.mxu1 %v254_v0  ;;  %v21_v1 = vld [vmem:[%s319_s1 + $0x8] sm:$0xff]  ;;  %v20_v2 = vld [vmem:[%s319_s1] sm:$0xff] }
   0x2   :  { %239 = vmatpush3.msra.mxu0 %v21_v1  ;;  %246 = vmatpush3.msra.mxu1 %v21_v1  ;;  %v23_v3 = vld [vmem:[%s320_s0] sm:$0xff]  ;;  %v225_v4 = vld [vmem:[%s320_s0 + $0x8] sm:$0xff] }
   0x3   :  { %240 = vmatprep.subr.mxu0 %v254_v0  ;;  %247 = vmatprep.subr.mxu1 %v254_v0  ;;  %v221_v5 = vld [vmem:[%s321_s2] ss:$0 sm:$0xff]  ;;  %v228_v9 = vld [vmem:[%s322_s3 + $0x1] ss:$0 sm:$0xff] }
   0x4   :  { %241 = vmatpush3.msra.mxu0 %v20_v2  ;;  %242 = vmatprep.mubr.msk.f32.mxu0 %vm255_vm1, %v254_v0  ;;  %v223_v7 = vld [vmem:[%s322_s3] ss:$0 sm:$0xff]  ;;  %v230_v13 = vld [vmem:[%s323_s4 + $0x1] ss:$0 sm:$0xff] }
   0x5   :  { %248 = vmatpush3.msra.mxu1 %v20_v2  ;;  %249 = vmatprep.mubr.msk.f32.mxu1 %vm255_vm1, %v254_v0  ;;  %v224_v12 = vld [vmem:[%s323_s4] ss:$0 sm:$0xff] }
   0x6   :  { %243 = vmatmul.mubr.msk.f32.vlgmr.msra.gmra.mxu0 %vm30_vm0, %v23_v3  ;;  %250 = vmatmul.mubr.msk.f32.vlgmr.msra.gmra.mxu1 %vm30_vm0, %v225_v4 }
  0xc6   :  { %v100_v6 = vpop.f32.mrf.mxu0  ;;  %v193_v8 = vpop.f32.mrf.mxu1 }
  0xc7   :  { %v101_v10 = vadd.f32 %v221_v5, %v100_v6  ;;  %v194_v11 = vadd.f32 %v221_v5, %v193_v8 }
  0xc8   :  { %v244_v14 = vpop.f32.mrf.mxu0  ;;  %v251_v15 = vpop.f32.mrf.mxu1 }
  0xc9   :  { %v111_v16 = vmul.f32 %v223_v7, %v101_v10  ;;  %v205_v17 = vmul.f32 %v228_v9, %v194_v11 }
  0xcb   :  { %v119_v18 = vadd.f32 %v224_v12, %v111_v16  ;;  %v214_v19 = vadd.f32 %v230_v13, %v205_v17 }
  0xcd   :  { %121 = vst.msk [vmem:[%s324_s5] sm:$0xff] %vm120_vm2, %v119_v18  ;;  %231 = vst.msk [vmem:[%s324_s5 + $0x8] sm:$0xff] %vm120_vm2, %v214_v19 }

// kernel: model_forward.5
= control target key start
LH: loop header
LB: loop body
LE: loop exit
PB: predicated region body
PF: predicated region fallthrough
CT: control target
= control target key end

     0   :  { %v3401_v3 = vmov 0   ;;  %vm216_vm0 = vcmask 130048   ;;  %s3405_s21 = smov 105   ;;  %s3406_s22 = smov 127   ;;  %s6477_s0 = inlined_call_operand.vmem [shape: f32[144,1152], index: 0, kind: input, shape index: {}]   ;;  %s6478_s3 = inlined_call_operand.vmem [shape: f32[16,144], index: 3, kind: input, shape index: {}]   ;;  %s6479_s4 = inlined_call_operand.vmem [shape: f32[16,1], index: 4, kind: input, shape index: {}]   ;;  %s6480_s1 = inlined_call_operand.vmem [shape: f32[1,1152], index: 1, kind: input, shape index: {}]   ;;  %s6481_s5 = inlined_call_operand.vmem [shape: f32[16,144], index: 5, kind: input, shape index: {}]   ;;  %s6482_s2 = inlined_call_operand.vmem [shape: f32[9,1152], index: 2, kind: input, shape index: {}]   ;;  %s6483_s6 = inlined_call_operand.vmem [shape: f32[16,1], index: 6, kind: input, shape index: {}]   ;;  %s6484_s9 = inlined_call_operand.vmem [shape: f32[16,1], index: 9, kind: input, shape index: {}]   ;;  %s6485_s10 = inlined_call_operand.vmem [shape: f32[16,1], index: 10, kind: input, shape index: {}]   ;;  %s6486_s7 = inlined_call_operand.vmem [shape: f32[1152,48], index: 7, kind: input, shape index: {}]   ;;  %s6487_s8 = inlined_call_operand.vmem [shape: f32[16,48], index: 8, kind: input, shape index: {}]   ;;  %s6488_s11 = inlined_call_operand.vmem [shape: f32[16,48], index: 11, kind: output, shape index: {}]  }
   0x1   :  { %v178_v0 = vld [vmem:[%s6477_s0 + $0x440] sm:$0xff]  ;;  %v180_v1 = vld [vmem:[%s6477_s0 + $0x450] sm:$0xff]  ;;  %v177_v2 = vld [vmem:[%s6477_s0 + $0x438] sm:$0xff]  ;;  %3323 = vset.pattern.permute.xlu0 %v3401_v3  ;;  %3324 = vset.pattern.permute.xlu1 %v3401_v3  ;;  %s3407_s23 = smov 1   ;;  %s3408_s24 = smov 103  }
   0x2   :  { %223 = vmatprep.subr.mxu0 %v178_v0  ;;  %300 = vmatprep.subr.mxu1 %v180_v1  ;;  %v179_v4 = vld [vmem:[%s6477_s0 + $0x448] sm:$0xff]  ;;  %v169_v5 = vld [vmem:[%s6477_s0 + $0x3f8] sm:$0xff]  ;;  %v168_v7 = vld [vmem:[%s6477_s0 + $0x3f0] sm:$0xff]  ;;  %s3409_s25 = smov 23   ;;  %s3410_s26 = smov 24  }
   0x3   :  { %v171_v6 = vld [vmem:[%s6477_s0 + $0x408] sm:$0xff]  ;;  %224 = vmatpush1.msra.mxu0 %v177_v2  ;;  %301 = vmatpush1.msra.mxu1 %v179_v4  ;;  %v170_v8 = vld [vmem:[%s6477_s0 + $0x400] sm:$0xff]  ;;  %v160_v9 = vld [vmem:[%s6477_s0 + $0x3b0] sm:$0xff]  ;;  %s3411_s27 = smov 25  }
   0x4   :  { %225 = vmatprep.subr.mxu0 %v169_v5  ;;  %302 = vmatprep.subr.mxu1 %v171_v6  ;;  %v162_v10 = vld [vmem:[%s6477_s0 + $0x3c0] sm:$0xff]  ;;  %v159_v11 = vld [vmem:[%s6477_s0 + $0x3a8] sm:$0xff]  ;;  %v161_v12 = vld [vmem:[%s6477_s0 + $0x3b8] sm:$0xff] }
   0x5   :  { %226 = vmatpush1.msra.mxu0 %v168_v7  ;;  %303 = vmatpush1.msra.mxu1 %v170_v8  ;;  %v151_v13 = vld [vmem:[%s6477_s0 + $0x368] sm:$0xff]  ;;  %v153_v14 = vld [vmem:[%s6477_s0 + $0x378] sm:$0xff]  ;;  %v150_v15 = vld [vmem:[%s6477_s0 + $0x360] sm:$0xff] }
   0x6   :  { %227 = vmatprep.subr.mxu0 %v160_v9  ;;  %304 = vmatprep.subr.mxu1 %v162_v10  ;;  %v152_v16 = vld [vmem:[%s6477_s0 + $0x370] sm:$0xff]  ;;  %v142_v17 = vld [vmem:[%s6477_s0 + $0x320] sm:$0xff]  ;;  %v141_v19 = vld [vmem:[%s6477_s0 + $0x318] sm:$0xff] }
   0x7   :  { %228 = vmatpush1.msra.mxu0 %v159_v11  ;;  %305 = vmatpush1.msra.mxu1 %v161_v12  ;;  %v144_v18 = vld [vmem:[%s6477_s0 + $0x330] sm:$0xff]  ;;  %v143_v20 = vld [vmem:[%s6477_s0 + $0x328] sm:$0xff]  ;;  %v133_v21 = vld [vmem:[%s6477_s0 + $0x2d8] sm:$0xff] }
   0x8   :  { %229 = vmatprep.subr.mxu0 %v151_v13  ;;  %306 = vmatprep.subr.mxu1 %v153_v14  ;;  %v135_v22 = vld [vmem:[%s6477_s0 + $0x2e8] sm:$0xff]  ;;  %v132_v23 = vld [vmem:[%s6477_s0 + $0x2d0] sm:$0xff]  ;;  %v134_v24 = vld [vmem:[%s6477_s0 + $0x2e0] sm:$0xff] }
   0x9   :  { %230 = vmatpush1.msra.mxu0 %v150_v15  ;;  %307 = vmatpush1.msra.mxu1 %v152_v16  ;;  %v124_v25 = vld [vmem:[%s6477_s0 + $0x290] sm:$0xff]  ;;  %v126_v26 = vld [vmem:[%s6477_s0 + $0x2a0] sm:$0xff]  ;;  %v123_v27 = vld [vmem:[%s6477_s0 + $0x288] sm:$0xff] }
   0xa   :  { %231 = vmatprep.subr.mxu0 %v142_v17  ;;  %308 = vmatprep.subr.mxu1 %v144_v18  ;;  %v125_v28 = vld [vmem:[%s6477_s0 + $0x298] sm:$0xff]  ;;  %v115_v29 = vld [vmem:[%s6477_s0 + $0x248] sm:$0xff]  ;;  %v114_v31 = vld [vmem:[%s6477_s0 + $0x240] sm:$0xff] }
   0xb   :  { %232 = vmatpush1.msra.mxu0 %v141_v19  ;;  %309 = vmatpush1.msra.mxu1 %v143_v20  ;;  %v117_v30 = vld [vmem:[%s6477_s0 + $0x258] sm:$0xff]  ;;  %v116_v32 = vld [vmem:[%s6477_s0 + $0x250] sm:$0xff]  ;;  %v106_v33 = vld [vmem:[%s6477_s0 + $0x200] sm:$0xff] }
   0xc   :  { %233 = vmatprep.subr.mxu0 %v133_v21  ;;  %310 = vmatprep.subr.mxu1 %v135_v22  ;;  %v108_v34 = vld [vmem:[%s6477_s0 + $0x210] sm:$0xff]  ;;  %v105_v35 = vld [vmem:[%s6477_s0 + $0x1f8] sm:$0xff]  ;;  %v107_v36 = vld [vmem:[%s6477_s0 + $0x208] sm:$0xff] }
   0xd   :  { %234 = vmatpush1.msra.mxu0 %v132_v23  ;;  %311 = vmatpush1.msra.mxu1 %v134_v24  ;;  %v97_v37 = vld [vmem:[%s6477_s0 + $0x1b8] sm:$0xff]  ;;  %v99_v38 = vld [vmem:[%s6477_s0 + $0x1c8] sm:$0xff]  ;;  %v96_v39 = vld [vmem:[%s6477_s0 + $0x1b0] sm:$0xff] }
   0xe   :  { %235 = vmatprep.subr.mxu0 %v124_v25  ;;  %312 = vmatprep.subr.mxu1 %v126_v26  ;;  %v98_v40 = vld [vmem:[%s6477_s0 + $0x1c0] sm:$0xff]  ;;  %v88_v41 = vld [vmem:[%s6477_s0 + $0x170] sm:$0xff]  ;;  %v87_v43 = vld [vmem:[%s6477_s0 + $0x168] sm:$0xff] }
   0xf   :  { %236 = vmatpush1.msra.mxu0 %v123_v27  ;;  %313 = vmatpush1.msra.mxu1 %v125_v28  ;;  %v90_v42 = vld [vmem:[%s6477_s0 + $0x180] sm:$0xff]  ;;  %v89_v44 = vld [vmem:[%s6477_s0 + $0x178] sm:$0xff]  ;;  %v79_v45 = vld [vmem:[%s6477_s0 + $0x128] sm:$0xff] }
  0x10   :  { %237 = vmatprep.subr.mxu0 %v115_v29  ;;  %314 = vmatprep.subr.mxu1 %v117_v30  ;;  %v81_v46 = vld [vmem:[%s6477_s0 + $0x138] sm:$0xff]  ;;  %v78_v47 = vld [vmem:[%s6477_s0 + $0x120] sm:$0xff]  ;;  %v80_v48 = vld [vmem:[%s6477_s0 + $0x130] sm:$0xff] }
  0x11   :  { %238 = vmatpush1.msra.mxu0 %v114_v31  ;;  %315 = vmatpush1.msra.mxu1 %v116_v32  ;;  %v70_v49 = vld [vmem:[%s6477_s0 + $0xe0] sm:$0xff]  ;;  %v72_v50 = vld [vmem:[%s6477_s0 + $0xf0] sm:$0xff]  ;;  %v69_v51 = vld [vmem:[%s6477_s0 + $0xd8] sm:$0xff] }
  0x12   :  { %239 = vmatprep.subr.mxu0 %v106_v33  ;;  %316 = vmatprep.subr.mxu1 %v108_v34  ;;  %v71_v52 = vld [vmem:[%s6477_s0 + $0xe8] sm:$0xff]  ;;  %v61_v53 = vld [vmem:[%s6477_s0 + $0x98] sm:$0xff]  ;;  %v60_v55 = vld [vmem:[%s6477_s0 + $0x90] sm:$0xff] }
  0x13   :  { %240 = vmatpush1.msra.mxu0 %v105_v35  ;;  %317 = vmatpush1.msra.mxu1 %v107_v36  ;;  %v63_v54 = vld [vmem:[%s6477_s0 + $0xa8] sm:$0xff]  ;;  %v62_v56 = vld [vmem:[%s6477_s0 + $0xa0] sm:$0xff]  ;;  %v52_v57 = vld [vmem:[%s6477_s0 + $0x50] sm:$0xff] }
  0x14   :  { %241 = vmatprep.subr.mxu0 %v97_v37  ;;  %318 = vmatprep.subr.mxu1 %v99_v38  ;;  %v54_v58 = vld [vmem:[%s6477_s0 + $0x60] sm:$0xff]  ;;  %v51_v59 = vld [vmem:[%s6477_s0 + $0x48] sm:$0xff]  ;;  %v53_v60 = vld [vmem:[%s6477_s0 + $0x58] sm:$0xff] }
  0x15   :  { %242 = vmatpush1.msra.mxu0 %v96_v39  ;;  %319 = vmatpush1.msra.mxu1 %v98_v40  ;;  %v43_v61 = vld [vmem:[%s6477_s0 + $0x8] sm:$0xff]  ;;  %v45_v62 = vld [vmem:[%s6477_s0 + $0x18] sm:$0xff]  ;;  %v42_v63 = vld [vmem:[%s6477_s0] sm:$0xff] }
  0x16   :  { %243 = vmatprep.subr.mxu0 %v88_v41  ;;  %320 = vmatprep.subr.mxu1 %v90_v42  ;;  %v44_v0 = vld [vmem:[%s6477_s0 + $0x10] sm:$0xff]  ;;  %v198_v2 = vld [vmem:[%s6477_s0 + $0x4e0] sm:$0xff]  ;;  %v195_v3 = vld [vmem:[%s6477_s0 + $0x4c8] sm:$0xff] }
  0x17   :  { %244 = vmatpush1.msra.mxu0 %v87_v43  ;;  %321 = vmatpush1.msra.mxu1 %v89_v44  ;;  %v196_v1 = vld [vmem:[%s6477_s0 + $0x4d0] sm:$0xff]  ;;  %v197_v4 = vld [vmem:[%s6477_s0 + $0x4d8] sm:$0xff]  ;;  %v187_v5 = vld [vmem:[%s6477_s0 + $0x488] sm:$0xff] }
  0x18   :  { %245 = vmatprep.subr.mxu0 %v79_v45  ;;  %322 = vmatprep.subr.mxu1 %v81_v46  ;;  %v189_v6 = vld [vmem:[%s6477_s0 + $0x498] sm:$0xff]  ;;  %v186_v7 = vld [vmem:[%s6477_s0 + $0x480] sm:$0xff]  ;;  %v3688_v8 = vld [vmem:[%s6478_s3 + $0x8] sm:$0xff] }
  0x19   :  { %246 = vmatpush1.msra.mxu0 %v78_v47  ;;  %323 = vmatpush1.msra.mxu1 %v80_v48  ;;  %v188_v9 = vld [vmem:[%s6477_s0 + $0x490] sm:$0xff]  ;;  %v3696_v10 = vld [vmem:[%s6478_s3] sm:$0xff]  ;;  %v181_v13 = vld [vmem:[%s6477_s0 + $0x458] sm:$0xff] }
  0x1a   :  { %247 = vmatprep.subr.mxu0 %v70_v49  ;;  %324 = vmatprep.subr.mxu1 %v72_v50  ;;  %v182_v11 = vld [vmem:[%s6477_s0 + $0x460] sm:$0xff]  ;;  %v184_v12 = vld [vmem:[%s6477_s0 + $0x470] sm:$0xff]  ;;  %v183_v14 = vld [vmem:[%s6477_s0 + $0x468] sm:$0xff] }
  0x1b   :  { %248 = vmatpush1.msra.mxu0 %v69_v51  ;;  %325 = vmatpush1.msra.mxu1 %v71_v52  ;;  %v173_v15 = vld [vmem:[%s6477_s0 + $0x418] sm:$0xff]  ;;  %v175_v16 = vld [vmem:[%s6477_s0 + $0x428] sm:$0xff]  ;;  %v172_v18 = vld [vmem:[%s6477_s0 + $0x410] sm:$0xff] }
  0x1c   :  { %249 = vmatprep.subr.mxu0 %v61_v53  ;;  %326 = vmatprep.subr.mxu1 %v63_v54  ;;  %v3725_v17 = vld [vmem:[%s6478_s3 + $0x18] sm:$0xff]  ;;  %v174_v19 = vld [vmem:[%s6477_s0 + $0x420] sm:$0xff]  ;;  %v3736_v20 = vld [vmem:[%s6478_s3 + $0x10] sm:$0xff] }
  0x1d   :  { %250 = vmatpush1.msra.mxu0 %v60_v55  ;;  %327 = vmatpush1.msra.mxu1 %v62_v56  ;;  %v164_v21 = vld [vmem:[%s6477_s0 + $0x3d0] sm:$0xff]  ;;  %v166_v22 = vld [vmem:[%s6477_s0 + $0x3e0] sm:$0xff]  ;;  %v163_v23 = vld [vmem:[%s6477_s0 + $0x3c8] sm:$0xff] }
  0x1e   :  { %251 = vmatprep.subr.mxu0 %v52_v57  ;;  %328 = vmatprep.subr.mxu1 %v54_v58  ;;  %v165_v24 = vld [vmem:[%s6477_s0 + $0x3d8] sm:$0xff]  ;;  %v155_v25 = vld [vmem:[%s6477_s0 + $0x388] sm:$0xff]  ;;  %v154_v27 = vld [vmem:[%s6477_s0 + $0x380] sm:$0xff] }
  0x1f   :  { %252 = vmatpush1.msra.mxu0 %v51_v59  ;;  %329 = vmatpush1.msra.mxu1 %v53_v60  ;;  %v157_v26 = vld [vmem:[%s6477_s0 + $0x398] sm:$0xff]  ;;  %v156_v28 = vld [vmem:[%s6477_s0 + $0x390] sm:$0xff]  ;;  %v146_v29 = vld [vmem:[%s6477_s0 + $0x340] sm:$0xff] }
  0x20   :  { %253 = vmatprep.subr.mxu0 %v43_v61  ;;  %330 = vmatprep.subr.mxu1 %v45_v62  ;;  %v148_v30 = vld [vmem:[%s6477_s0 + $0x350] sm:$0xff]  ;;  %v145_v31 = vld [vmem:[%s6477_s0 + $0x338] sm:$0xff]  ;;  %v147_v32 = vld [vmem:[%s6477_s0 + $0x348] sm:$0xff] }
  0x21   :  { %254 = vmatpush1.msra.mxu0 %v42_v63  ;;  %331 = vmatpush1.msra.mxu1 %v44_v0  ;;  %v137_v33 = vld [vmem:[%s6477_s0 + $0x2f8] sm:$0xff]  ;;  %v139_v34 = vld [vmem:[%s6477_s0 + $0x308] sm:$0xff]  ;;  %v136_v35 = vld [vmem:[%s6477_s0 + $0x2f0] sm:$0xff] }
  0x22   :  { %283 = vmatprep.subr.mxu0 %v196_v1  ;;  %360 = vmatprep.subr.mxu1 %v198_v2  ;;  %v138_v36 = vld [vmem:[%s6477_s0 + $0x300] sm:$0xff]  ;;  %v128_v37 = vld [vmem:[%s6477_s0 + $0x2b0] sm:$0xff]  ;;  %v127_v39 = vld [vmem:[%s6477_s0 + $0x2a8] sm:$0xff] }
  0x23   :  { %284 = vmatpush2.msra.mxu0 %v195_v3  ;;  %361 = vmatpush2.msra.mxu1 %v197_v4  ;;  %v130_v38 = vld [vmem:[%s6477_s0 + $0x2c0] sm:$0xff]  ;;  %v129_v40 = vld [vmem:[%s6477_s0 + $0x2b8] sm:$0xff]  ;;  %v119_v41 = vld [vmem:[%s6477_s0 + $0x268] sm:$0xff] }
  0x24   :  { %285 = vmatprep.subr.mxu0 %v187_v5  ;;  %362 = vmatprep.subr.mxu1 %v189_v6  ;;  %v121_v42 = vld [vmem:[%s6477_s0 + $0x278] sm:$0xff]  ;;  %v118_v43 = vld [vmem:[%s6477_s0 + $0x260] sm:$0xff]  ;;  %v120_v44 = vld [vmem:[%s6477_s0 + $0x270] sm:$0xff] }
  0x25   :  { %286 = vmatpush2.msra.mxu0 %v186_v7  ;;  %3077 = vmatprep.mubr.msk.f32.mxu0 %vm216_vm0, %v3688_v8  ;;  %v110_v45 = vld [vmem:[%s6477_s0 + $0x220] sm:$0xff]  ;;  %v112_v46 = vld [vmem:[%s6477_s0 + $0x230] sm:$0xff]  ;;  %v109_v47 = vld [vmem:[%s6477_s0 + $0x218] sm:$0xff] }
  0x26   :  { %363 = vmatpush2.msra.mxu1 %v188_v9  ;;  %3079 = vmatprep.mubr.msk.f32.mxu1 %vm216_vm0, %v3688_v8  ;;  %v111_v48 = vld [vmem:[%s6477_s0 + $0x228] sm:$0xff]  ;;  %v101_v49 = vld [vmem:[%s6477_s0 + $0x1d8] sm:$0xff]  ;;  %v100_v51 = vld [vmem:[%s6477_s0 + $0x1d0] sm:$0xff] }
  0x27   :  { %288 = vmatmul.mubr.f32.vlgmr.msra.gmra.mxu0 %v3696_v10  ;;  %365 = vmatmul.mubr.f32.vlgmr.msra.gmra.mxu1 %v3696_v10  ;;  %v103_v50 = vld [vmem:[%s6477_s0 + $0x1e8] sm:$0xff]  ;;  %v102_v52 = vld [vmem:[%s6477_s0 + $0x1e0] sm:$0xff]  ;;  %v92_v53 = vld [vmem:[%s6477_s0 + $0x190] sm:$0xff] }
  0x28   :  { %377 = vmatprep.subr.mxu0 %v182_v11  ;;  %454 = vmatprep.subr.mxu1 %v184_v12  ;;  %v94_v54 = vld [vmem:[%s6477_s0 + $0x1a0] sm:$0xff]  ;;  %v91_v55 = vld [vmem:[%s6477_s0 + $0x188] sm:$0xff]  ;;  %v93_v56 = vld [vmem:[%s6477_s0 + $0x198] sm:$0xff] }
  0x29   :  { %378 = vmatpush1.msra.mxu0 %v181_v13  ;;  %455 = vmatpush1.msra.mxu1 %v183_v14  ;;  %v83_v57 = vld [vmem:[%s6477_s0 + $0x148] sm:$0xff]  ;;  %v85_v58 = vld [vmem:[%s6477_s0 + $0x158] sm:$0xff]  ;;  %v82_v59 = vld [vmem:[%s6477_s0 + $0x140] sm:$0xff] }
  0x2a   :  { %379 = vmatprep.subr.mxu0 %v173_v15  ;;  %456 = vmatprep.subr.mxu1 %v175_v16  ;;  %v84_v60 = vld [vmem:[%s6477_s0 + $0x150] sm:$0xff]  ;;  %v74_v61 = vld [vmem:[%s6477_s0 + $0x100] sm:$0xff]  ;;  %v73_v63 = vld [vmem:[%s6477_s0 + $0xf8] sm:$0xff] }
  0x2b   :  { %3078 = vmatprep.mubr.msk.f32.mxu0 %vm216_vm0, %v3725_v17  ;;  %3080 = vmatprep.mubr.msk.f32.mxu1 %vm216_vm0, %v3725_v17  ;;  %v76_v62 = vld [vmem:[%s6477_s0 + $0x110] sm:$0xff]  ;;  %v75_v0 = vld [vmem:[%s6477_s0 + $0x108] sm:$0xff]  ;;  %v65_v1 = vld [vmem:[%s6477_s0 + $0xb8] sm:$0xff] }
  0x2c   :  { %380 = vmatpush1.msra.mxu0 %v172_v18  ;;  %457 = vmatpush1.msra.mxu1 %v174_v19  ;;  %v67_v2 = vld [vmem:[%s6477_s0 + $0xc8] sm:$0xff]  ;;  %v64_v3 = vld [vmem:[%s6477_s0 + $0xb0] sm:$0xff]  ;;  %v66_v4 = vld [vmem:[%s6477_s0 + $0xc0] sm:$0xff] }
  0x2d   :  { %294 = vmatmul.mubr.f32.gmra.mxu0 %v3736_v20  ;;  %371 = vmatmul.mubr.f32.gmra.mxu1 %v3736_v20  ;;  %v56_v5 = vld [vmem:[%s6477_s0 + $0x70] sm:$0xff]  ;;  %v58_v6 = vld [vmem:[%s6477_s0 + $0x80] sm:$0xff]  ;;  %v55_v7 = vld [vmem:[%s6477_s0 + $0x68] sm:$0xff] }
  0x2e   :  { %381 = vmatprep.subr.mxu0 %v164_v21  ;;  %458 = vmatprep.subr.mxu1 %v166_v22  ;;  %v57_v9 = vld [vmem:[%s6477_s0 + $0x78] sm:$0xff]  ;;  %v47_v11 = vld [vmem:[%s6477_s0 + $0x28] sm:$0xff]  ;;  %v46_v13 = vld [vmem:[%s6477_s0 + $0x20] sm:$0xff] }
  0x2f   :  { %382 = vmatpush1.msra.mxu0 %v163_v23  ;;  %459 = vmatpush1.msra.mxu1 %v165_v24  ;;  %v49_v12 = vld [vmem:[%s6477_s0 + $0x38] sm:$0xff]  ;;  %v48_v14 = vld [vmem:[%s6477_s0 + $0x30] sm:$0xff]  ;;  %v202_v16 = vld [vmem:[%s6477_s0 + $0x500] sm:$0xff] }
  0x30   :  { %383 = vmatprep.subr.mxu0 %v155_v25  ;;  %460 = vmatprep.subr.mxu1 %v157_v26  ;;  %v200_v15 = vld [vmem:[%s6477_s0 + $0x4f0] sm:$0xff]  ;;  %v199_v18 = vld [vmem:[%s6477_s0 + $0x4e8] sm:$0xff]  ;;  %v201_v19 = vld [vmem:[%s6477_s0 + $0x4f8] sm:$0xff] }
  0x31   :  { %384 = vmatpush1.msra.mxu0 %v154_v27  ;;  %461 = vmatpush1.msra.mxu1 %v156_v28  ;;  %v191_v21 = vld [vmem:[%s6477_s0 + $0x4a8] sm:$0xff]  ;;  %v193_v22 = vld [vmem:[%s6477_s0 + $0x4b8] sm:$0xff]  ;;  %v190_v23 = vld [vmem:[%s6477_s0 + $0x4a0] sm:$0xff]  ;;  %v6489_v27 = vmov 0.0  }
  0x32   :  { %385 = vmatprep.subr.mxu0 %v146_v29  ;;  %462 = vmatprep.subr.mxu1 %v148_v30  ;;  %v192_v24 = vld [vmem:[%s6477_s0 + $0x4b0] sm:$0xff]  ;;  %v185_v25 = vld [vmem:[%s6477_s0 + $0x478] sm:$0xff]  ;;  %v205_v26 = vld [vmem:[%s6479_s4 + $0x8] sm:$0xff] }
  0x33   :  { %386 = vmatpush1.msra.mxu0 %v145_v31  ;;  %463 = vmatpush1.msra.mxu1 %v147_v32  ;;  %v176_v28 = vld [vmem:[%s6477_s0 + $0x430] sm:$0xff]  ;;  %v167_v29 = vld [vmem:[%s6477_s0 + $0x3e8] sm:$0xff]  ;;  %v204_v30 = vld [vmem:[%s6479_s4] sm:$0xff] }
  0x34   :  { %387 = vmatprep.subr.mxu0 %v137_v33  ;;  %464 = vmatprep.subr.mxu1 %v139_v34  ;;  %v158_v31 = vld [vmem:[%s6477_s0 + $0x3a0] sm:$0xff]  ;;  %v149_v32 = vld [vmem:[%s6477_s0 + $0x358] sm:$0xff]  ;;  %v140_v33 = vld [vmem:[%s6477_s0 + $0x310] sm:$0xff] }
  0x35   :  { %388 = vmatpush1.msra.mxu0 %v136_v35  ;;  %465 = vmatpush1.msra.mxu1 %v138_v36  ;;  %v122_v34 = vld [vmem:[%s6477_s0 + $0x280] sm:$0xff]  ;;  %v113_v35 = vld [vmem:[%s6477_s0 + $0x238] sm:$0xff]  ;;  %v104_v36 = vld [vmem:[%s6477_s0 + $0x1f0] sm:$0xff] }
  0x36   :  { %389 = vmatprep.subr.mxu0 %v128_v37  ;;  %466 = vmatprep.subr.mxu1 %v130_v38  ;;  %v95_v37 = vld [vmem:[%s6477_s0 + $0x1a8] sm:$0xff]  ;;  %v86_v38 = vld [vmem:[%s6477_s0 + $0x160] sm:$0xff] }
  0x37   :  { %390 = vmatpush1.msra.mxu0 %v127_v39  ;;  %467 = vmatpush1.msra.mxu1 %v129_v40  ;;  %v77_v39 = vld [vmem:[%s6477_s0 + $0x118] sm:$0xff]  ;;  %v68_v40 = vld [vmem:[%s6477_s0 + $0xd0] sm:$0xff] }
  0x38   :  { %391 = vmatprep.subr.mxu0 %v119_v41  ;;  %468 = vmatprep.subr.mxu1 %v121_v42  ;;  %v59_v41 = vld [vmem:[%s6477_s0 + $0x88] sm:$0xff]  ;;  %v50_v42 = vld [vmem:[%s6477_s0 + $0x40] sm:$0xff] }
  0x39   :  { %392 = vmatpush1.msra.mxu0 %v118_v43  ;;  %469 = vmatpush1.msra.mxu1 %v120_v44  ;;  %v203_v43 = vld [vmem:[%s6477_s0 + $0x508] sm:$0xff]  ;;  %v194_v44 = vld [vmem:[%s6477_s0 + $0x4c0] sm:$0xff] }
  0x3a   :  { %393 = vmatprep.subr.mxu0 %v110_v45  ;;  %470 = vmatprep.subr.mxu1 %v112_v46  ;;  %v6491_v45 = vlaneseq }
  0x3b   :  { %394 = vmatpush1.msra.mxu0 %v109_v47  ;;  %471 = vmatpush1.msra.mxu1 %v111_v48  ;;  %v4039_v48 = vld [vmem:[%s6480_s1] sm:$0xff] }
  0x3c   :  { %395 = vmatprep.subr.mxu0 %v101_v49  ;;  %472 = vmatprep.subr.mxu1 %v103_v50  ;;  %v4033_v46 = vshrl.u32 %v6491_v45, 7 }
  0x3d   :  { %396 = vmatpush1.msra.mxu0 %v100_v51  ;;  %473 = vmatpush1.msra.mxu1 %v102_v52 }
  0x3e   :  { %397 = vmatprep.subr.mxu0 %v92_v53  ;;  %474 = vmatprep.subr.mxu1 %v94_v54  ;;  %v1132_v47 = vsub.s32 4, %v4033_v46 }
  0x3f   :  { %398 = vmatpush1.msra.mxu0 %v91_v55  ;;  %475 = vmatpush1.msra.mxu1 %v93_v56 }
  0x40   :  { %399 = vmatprep.subr.mxu0 %v83_v57  ;;  %476 = vmatprep.subr.mxu1 %v85_v58  ;;  %v4042_v49 = vrot.slane %v4039_v48, %v1132_v47 }
  0x41   :  { %400 = vmatpush1.msra.mxu0 %v82_v59  ;;  %477 = vmatpush1.msra.mxu1 %v84_v60 }
  0x42   :  { %401 = vmatprep.subr.mxu0 %v74_v61  ;;  %478 = vmatprep.subr.mxu1 %v76_v62 }
  0x43   :  { %402 = vmatpush1.msra.mxu0 %v73_v63  ;;  %479 = vmatpush1.msra.mxu1 %v75_v0 }
  0x44   :  { %403 = vmatprep.subr.mxu0 %v65_v1  ;;  %480 = vmatprep.subr.mxu1 %v67_v2 }
  0x45   :  { %404 = vmatpush1.msra.mxu0 %v64_v3  ;;  %481 = vmatpush1.msra.mxu1 %v66_v4 }
  0x46   :  { %405 = vmatprep.subr.mxu0 %v56_v5  ;;  %482 = vmatprep.subr.mxu1 %v58_v6 }
  0x47   :  { %406 = vmatpush1.msra.mxu0 %v55_v7  ;;  %483 = vmatpush1.msra.mxu1 %v57_v9 }
  0x48   :  { %407 = vmatprep.subr.mxu0 %v47_v11  ;;  %484 = vmatprep.subr.mxu1 %v49_v12 }
  0x49   :  { %408 = vmatpush1.msra.mxu0 %v46_v13  ;;  %485 = vmatpush1.msra.mxu1 %v48_v14 }
  0x4a   :  { %437 = vmatprep.subr.mxu0 %v200_v15  ;;  %514 = vmatprep.subr.mxu1 %v202_v16 }
  0x4b   :  { %438 = vmatpush2.msra.mxu0 %v199_v18  ;;  %515 = vmatpush2.msra.mxu1 %v201_v19 }
  0x4c   :  { %439 = vmatprep.subr.mxu0 %v191_v21  ;;  %516 = vmatprep.subr.mxu1 %v193_v22 }
  0x4d   :  { %440 = vmatpush2.msra.mxu0 %v190_v23  ;;  %3081 = vmatprep.mubr.msk.f32.mxu0 %vm216_vm0, %v3688_v8 }
  0x4e   :  { %517 = vmatpush2.msra.mxu1 %v192_v24  ;;  %3083 = vmatprep.mubr.msk.f32.mxu1 %vm216_vm0, %v3688_v8 }
  0x4f   :  { %442 = vmatmul.mubr.f32.vlgmr.msra.gmra.mxu0 %v3696_v10  ;;  %519 = vmatmul.mubr.f32.vlgmr.msra.gmra.mxu1 %v3696_v10 }
  0x50   :  { %531 = vmatprep.subr.mxu0 %v6489_v27  ;;  %3082 = vmatprep.mubr.msk.f32.mxu0 %vm216_vm0, %v3725_v17 }
  0x51   :  { %532 = vmatpush1.msra.mxu0 %v185_v25  ;;  %3084 = vmatprep.mubr.msk.f32.mxu1 %vm216_vm0, %v3725_v17 }
  0x52   :  { %533 = vmatprep.subr.mxu0 %v6489_v27  ;;  %213 = vperm.xlu0 %3323, %v205_v26  }
  0x53   :  { %534 = vmatpush1.msra.mxu0 %v176_v28  ;;  %525 = vmatmul.mubr.f32.gmra.mxu1 %v3736_v20 }
  0x54   :  { %448 = vmatmul.mubr.f32.gmra.mxu0 %v3736_v20  ;;  %535 = vmatprep.subr.mxu0 %v6489_v27 }
  0x55   :  { %536 = vmatpush1.msra.mxu0 %v167_v29  ;;  %3085 = vmatprep.mubr.msk.f32.mxu0 %vm216_vm0, %v3688_v8  ;;  %v131_v8 = vld [vmem:[%s6477_s0 + $0x2c8] sm:$0xff]  ;;  %s3404_s0 = smov 104  }
  0x56   :  { %537 = vmatprep.subr.mxu0 %v6489_v27  ;;  %208 = vperm.xlu0 %3323, %v204_v30  }
  0x57   :  { %538 = vmatpush1.msra.mxu0 %v158_v31 }
  0x58   :  { %539 = vmatprep.subr.mxu0 %v6489_v27 }
  0x59   :  { %540 = vmatpush1.msra.mxu0 %v149_v32 }
  0x5a   :  { %541 = vmatprep.subr.mxu0 %v6489_v27 }
  0x5b   :  { %542 = vmatpush1.msra.mxu0 %v140_v33 }
  0x5c   :  { %543 = vmatprep.subr.mxu0 %v6489_v27 }
  0x5d   :  { %544 = vmatpush1.msra.mxu0 %v131_v8 }
  0x5e   :  { %545 = vmatprep.subr.mxu0 %v6489_v27 }
  0x5f   :  { %546 = vmatpush1.msra.mxu0 %v122_v34 }
  0x60   :  { %547 = vmatprep.subr.mxu0 %v6489_v27 }
  0x61   :  { %548 = vmatpush1.msra.mxu0 %v113_v35 }
  0x62   :  { %549 = vmatprep.subr.mxu0 %v6489_v27 }
  0x63   :  { %550 = vmatpush1.msra.mxu0 %v104_v36 }
  0x64   :  { %551 = vmatprep.subr.mxu0 %v6489_v27 }
  0x65   :  { %552 = vmatpush1.msra.mxu0 %v95_v37 }
  0x66   :  { %553 = vmatprep.subr.mxu0 %v6489_v27 }
  0x67   :  { %554 = vmatpush1.msra.mxu0 %v86_v38 }
  0x68   :  { %555 = vmatprep.subr.mxu0 %v6489_v27 }
  0x69   :  { %556 = vmatpush1.msra.mxu0 %v77_v39 }
  0x6a   :  { %557 = vmatprep.subr.mxu0 %v6489_v27 }
  0x6b   :  { %558 = vmatpush1.msra.mxu0 %v68_v40 }
  0x6c   :  { %559 = vmatprep.subr.mxu0 %v6489_v27 }
  0x6d   :  { %560 = vmatpush1.msra.mxu0 %v59_v41 }
  0x6e   :  { %561 = vmatprep.subr.mxu0 %v6489_v27 }
  0x6f   :  { %562 = vmatpush1.msra.mxu0 %v50_v42 }
  0x70   :  { %591 = vmatprep.subr.mxu0 %v6489_v27 }
  0x71   :  { %592 = vmatpush2.msra.mxu0 %v203_v43 }
  0x72   :  { %593 = vmatprep.subr.mxu0 %v6489_v27 }
  0x73   :  { %594 = vmatpush2.msra.mxu0 %v194_v44 }
  0x74   :  { %596 = vmatmul.mubr.f32.vlgmr.msra.gmra.mxu0 %v3696_v10 }
  0x75   :  { %3086 = vmatprep.mubr.msk.f32.mxu0 %vm216_vm0, %v3725_v17 }
  0x78   :  { %601 = vmatmul.mubr.f32.gmra.mxu0 %v3736_v20 }
  0xcd   :  { %v4044_v10 = vpop.permute.xlu0 %213 }
  0xd1   :  { %v4046_v50 = vpop.permute.xlu0 %208 }
  0xe7   :  { %v289_v17 = vpop.f32.mrf.mxu0  ;;  %v366_v20 = vpop.f32.mrf.mxu1 }
  0xe8   :  { %v290_v51 = vadd.f32 %v289_v17, %v4046_v50  ;;  %v367_v52 = vadd.f32 %v366_v20, %v4046_v50 }
  0xe9   :  { %v291_v53 = vpop.f32.mrf.mxu0  ;;  %v368_v57 = vpop.f32.mrf.mxu1 }
  0xea   :  { %v4050_v54 = vmul.f32 0.5, %v290_v51  ;;  %v4052_v55 = vmul.f32 0.5, %v367_v52  ;;  %v292_v56 = vadd.f32 %v291_v53, %v4046_v50  ;;  %v369_v63 = vadd.f32 %v368_v57, %v4046_v50 }
  0xec   :  { %v4056_v58 = vmul.f32 0.70710677, %v4050_v54  ;;  %v4059_v59 = vmul.f32 0.70710677, %v4052_v55  ;;  %v4061_v60 = vmul.f32 0.5, %v292_v56  ;;  %v4072_v6 = vmul.f32 0.5, %v369_v63 }
  0xed   :  { %v295_v12 = vpop.f32.mrf.mxu0  ;;  %v372_v21 = vpop.f32.mrf.mxu1 }
  0xee   :  { %v678_v61 = vand.u32 2147483647, %v4056_v58  ;;  %v680_v62 = vand.u32 2147483647, %v4059_v59  ;;  %v4067_v0 = vmul.f32 0.70710677, %v4061_v60  ;;  %v296_v16 = vadd.f32 %v295_v12, %v4044_v10 }
  0xef   :  { %v4076_v11 = vmul.f32 0.70710677, %v4072_v6  ;;  %v373_v26 = vadd.f32 %v372_v21, %v4044_v10  ;;  %v297_v56 = vpop.f32.mrf.mxu0  ;;  %vm642_vm1 = vcmp.lt.f32.partialorder %v4056_v58, 0.0  ;;  %vm644_vm2 = vcmp.lt.f32.partialorder %v4059_v59, 0.0 }
  0xf0   :  { %v696_v1 = vmul.f32 0.3275911, %v678_v61  ;;  %v698_v2 = vmul.f32 0.3275911, %v680_v62  ;;  %v4070_v3 = vand.u32 2147483647, %v4067_v0 }
  0xf1   :  { %v930_v13 = vsub.f32 0.0, %v678_v61  ;;  %v4079_v14 = vand.u32 2147483647, %v4076_v11  ;;  %v932_v15 = vsub.f32 0.0, %v680_v62  ;;  %v4083_v23 = vmul.f32 0.5, %v296_v16 }
  0xf2   :  { %v714_v4 = vadd.f32 1.0, %v696_v1  ;;  %v716_v5 = vadd.f32 1.0, %v698_v2  ;;  %v697_v7 = vmul.f32 0.3275911, %v4070_v3  ;;  %v4091_v36 = vmul.f32 0.5, %v373_v26 }
  0xf3   :  { %v948_v18 = vmul.f32 %v930_v13, %v678_v61  ;;  %v699_v19 = vmul.f32 0.3275911, %v4079_v14  ;;  %v950_v22 = vmul.f32 %v932_v15, %v680_v62  ;;  %v4087_v33 = vmul.f32 0.70710677, %v4083_v23 }
  0xf4   :  { %3325 = vrcp.f32 %v714_v4  ;;  %v715_v9 = vadd.f32 1.0, %v697_v7  ;;  %v4098_v43 = vmul.f32 0.70710677, %v4091_v36  ;;  %v931_v2 = vsub.f32 0.0, %v4070_v3 }
  0xf5   :  { %3327 = vrcp.f32 %v716_v5  ;;  %v966_v25 = vmul.f32 1.442695, %v948_v18  ;;  %v717_v30 = vadd.f32 1.0, %v699_v19  ;;  %v970_v32 = vmul.f32 1.442695, %v950_v22 }
  0xf6   :  { %3329 = vrcp.f32 %v715_v9  ;;  %v4095_v40 = vand.u32 2147483647, %v4087_v33  ;;  %v4102_v53 = vand.u32 2147483647, %v4098_v43  ;;  %v298_v4 = vadd.f32 %v297_v56, %v4044_v10 }
  0xf7   :  { %3331 = vpow2.f32 %v966_v25  ;;  %v949_v21 = vmul.f32 %v931_v2, %v4070_v3  ;;  %v4115_v25 = vsub.s32 0, %v4033_v46  ;;  %v4122_v3 = vsub.s32 2, %v4033_v46 }
  0xf8   :  { %3333 = vrcp.f32 %v717_v30  ;;  %v705_v20 = vmul.f32 0.3275911, %v4095_v40  ;;  %v707_v7 = vmul.f32 0.3275911, %v4102_v53  ;;  %v4112_v22 = vmul.f32 0.5, %v298_v4  ;;  %v374_v4 = vpop.f32.mrf.mxu1 }
  0xf9   :  { %3335 = vpow2.f32 %v970_v32  ;;  %6561 = vst [vmem:[#allocation2_spill] sm:$0xff] %v4115_v25  ;;  %vm643_vm3 = vcmp.lt.f32.partialorder %v4067_v0, 0.0  ;;  %vm645_vm4 = vcmp.lt.f32.partialorder %v4076_v11, 0.0  ;;  %vm651_vm5 = vcmp.lt.f32.partialorder %v4087_v33, 0.0 }
  0xfa   :  { %v723_v63 = vadd.f32 1.0, %v705_v20  ;;  %v4126_v59 = vmul.f32 0.70710677, %v4112_v22  ;;  %vm653_vm6 = vcmp.lt.f32.partialorder %v4098_v43, 0.0 }
  0xfc   :  { %3337 = vrcp.f32 %v723_v63  ;;  %v4139_v56 = vand.u32 2147483647, %v4126_v59  ;;  %vm652_vm9 = vcmp.lt.f32.partialorder %v4126_v59, 0.0 }
  0xfe   :  { %v706_v2 = vmul.f32 0.3275911, %v4139_v56 }
 0x101   :  { %v3326_v24 = vpop.eup %3325 }
 0x102   :  { %v3328_v28 = vpop.eup %3327  ;;  %v768_v29 = vmul.f32 1.0614054, %v3326_v24 }
 0x103   :  { %v770_v31 = vmul.f32 1.0614054, %v3328_v28  ;;  %v4089_v34 = vpop.eup %3329 }
 0x104   :  { %v786_v8 = vadd.f32 -1.4531521, %v768_v29  ;;  %v769_v38 = vmul.f32 1.0614054, %v4089_v34  ;;  %v3332_v9 = vpop.eup %3331 }
 0x105   :  { %v788_v35 = vadd.f32 -1.4531521, %v770_v31  ;;  %v4108_v15 = vpop.eup %3333  ;;  %v6494_v31 = vmov 1.0  }
 0x106   :  { %v804_v37 = vmul.f32 %v3326_v24, %v786_v8  ;;  %v787_v47 = vadd.f32 -1.4531521, %v769_v38  ;;  %v3336_v18 = vpop.eup %3335  ;;  %v660_v58 = vsel %vm642_vm1, -1.0, %v6494_v31  ;;  %v4130_v38 = vrot.slane %v4039_v48, %v4115_v25 }
 0x107   :  { %v806_v39 = vmul.f32 %v3328_v28, %v788_v35  ;;  %v662_v35 = vsel %vm644_vm2, -1.0, %v6494_v31  ;;  %v669_v33 = vsel %vm651_vm5, -1.0, %v6494_v31 }
 0x108   :  { %v822_v41 = vadd.f32 1.4214138, %v804_v37  ;;  %v805_v61 = vmul.f32 %v4089_v34, %v787_v47  ;;  %v968_v37 = vmul.f32 1.442695, %v949_v21 }
 0x109   :  { %v824_v42 = vadd.f32 1.4214138, %v806_v39  ;;  %v4149_v63 = vpop.eup %3337 }
 0x10a   :  { %v840_v44 = vmul.f32 %v3326_v24, %v822_v41  ;;  %v823_v13 = vadd.f32 1.4214138, %v805_v61  ;;  %v1056_v41 = vmul.f32 0.5, %v4050_v54 }
 0x10b   :  { %v842_v17 = vmul.f32 %v3328_v28, %v824_v42 }
 0x10c   :  { %v858_v51 = vadd.f32 -0.28449672, %v840_v44  ;;  %v841_v30 = vmul.f32 %v4089_v34, %v823_v13  ;;  %v375_v13 = vadd.f32 %v374_v4, %v4044_v10 }
 0x10d   :  { %v860_v52 = vadd.f32 -0.28449672, %v842_v17  ;;  %v1058_v17 = vmul.f32 0.5, %v4052_v55 }
 0x10e   :  { %v876_v57 = vmul.f32 %v3326_v24, %v858_v51  ;;  %v859_v44 = vadd.f32 -0.28449672, %v841_v30  ;;  %v4136_v51 = vrot.slane %v4039_v48, %v4122_v3  ;;  %v4170_v30 = vmul.f32 0.5, %v375_v13 }
 0x10f   :  { %v878_v62 = vmul.f32 %v3328_v28, %v860_v52 }
 0x110   :  { %v894_v1 = vadd.f32 0.2548296, %v876_v57  ;;  %v877_v54 = vmul.f32 %v4089_v34, %v859_v44 }
 0x111   :  { %v896_v5 = vadd.f32 0.2548296, %v878_v62 }
 0x112   :  { %v912_v12 = vmul.f32 %v3326_v24, %v894_v1  ;;  %v725_v24 = vadd.f32 1.0, %v707_v7  ;;  %v933_v1 = vsub.f32 0.0, %v4079_v14 }
 0x113   :  { %v914_v16 = vmul.f32 %v3328_v28, %v896_v5  ;;  %v771_v28 = vmul.f32 1.0614054, %v4108_v15  ;;  %v895_v5 = vadd.f32 0.2548296, %v877_v54 }
 0x114   :  { %v1002_v19 = vmul.f32 %v3332_v9, %v912_v12  ;;  %3339 = vrcp.f32 %v725_v24  ;;  %v4157_v9 = vpop.f32.mrf.mxu0  ;;  %v777_v12 = vmul.f32 1.0614054, %v4149_v63 }
 0x115   :  { %v1004_v26 = vmul.f32 %v3336_v18, %v914_v16  ;;  %v789_v47 = vadd.f32 -1.4531521, %v771_v28  ;;  %3341 = vpow2.f32 %v968_v37  ;;  %v951_v16 = vmul.f32 %v933_v1, %v4079_v14 }
 0x116   :  { %v1020_v29 = vsub.f32 1.0, %v1002_v19  ;;  %v724_v18 = vadd.f32 1.0, %v706_v2  ;;  %v913_v21 = vmul.f32 %v4089_v34, %v895_v5  ;;  %v445_v24 = vpop.f32.mrf.mxu0  ;;  %v4180_v37 = vmul.f32 0.70710677, %v4170_v30 }
 0x117   :  { %v1022_v32 = vsub.f32 1.0, %v1004_v26  ;;  %v807_v62 = vmul.f32 %v4108_v15, %v789_v47  ;;  %v972_v28 = vmul.f32 1.442695, %v951_v16  ;;  %v941_v16 = vsub.f32 0.0, %v4102_v53 }
 0x118   :  { %v1038_v8 = vmul.f32 %v1020_v29, %v660_v58  ;;  %v795_v29 = vadd.f32 -1.4531521, %v777_v12  ;;  %3343 = vrcp.f32 %v724_v18  ;;  %vm654_vm11 = vcmp.lt.f32.partialorder %v4180_v37, 0.0 }
 0x119   :  { %v1040_v39 = vmul.f32 %v1022_v32, %v662_v35  ;;  %v825_v7 = vadd.f32 1.4214138, %v807_v62  ;;  %v446_v32 = vadd.f32 %v445_v24, %v4046_v50  ;;  %3345 = vpow2.f32 %v972_v28 }
 0x11a   :  { %v1074_v42 = vadd.f32 1.0, %v1038_v8  ;;  %v813_v35 = vmul.f32 %v4149_v63, %v795_v29  ;;  %v661_v62 = vsel %vm643_vm3, -1.0, %v6494_v31  ;;  %v4221_v29 = vsub.s32 1, %v4033_v46 }
 0x11b   :  { %v1076_v20 = vadd.f32 1.0, %v1040_v39  ;;  %v843_v26 = vmul.f32 %v4108_v15, %v825_v7  ;;  %v4182_v39 = vmul.f32 0.5, %v446_v32 }
 0x11c   :  { %v1092_v52 = vmul.f32 %v1074_v42, %v1056_v41  ;;  %v939_v41 = vsub.f32 0.0, %v4095_v40  ;;  %6562 = vst [vmem:[#allocation3_spill] sm:$0xff] %v4221_v29 }
 0x11d   :  { %v1094_v57 = vmul.f32 %v1076_v20, %v1058_v17  ;;  %v861_v8 = vadd.f32 -0.28449672, %v843_v26  ;;  %v4188_v44 = vmul.f32 0.70710677, %v4182_v39  ;;  %v449_v20 = vpop.f32.mrf.mxu0 }
 0x11e   :  { %v4142_v61 = vmul.f32 %v4130_v38, %v1092_v52  ;;  %v831_v52 = vadd.f32 1.4214138, %v813_v35  ;;  %v957_v1 = vmul.f32 %v939_v41, %v4095_v40  ;;  %v450_v7 = vadd.f32 %v449_v20, %v4044_v10 }
 0x11f   :  { %v4147_v55 = vmul.f32 %v4136_v51, %v1094_v57  ;;  %v879_v17 = vmul.f32 %v4108_v15, %v861_v8  ;;  %v4195_v57 = vand.u32 2147483647, %v4180_v37  ;;  %v4198_v54 = vand.u32 2147483647, %v4188_v44  ;;  %v451_v12 = vpop.f32.mrf.mxu0 }
 0x120   :  { %1851 = vrot.lane.b32.xlu1 %v4142_v61, %s3404_s0  ;;  %v849_v13 = vmul.f32 %v4149_v63, %v831_v52  ;;  %v4212_v40 = vmul.f32 0.5, %v450_v7  ;;  %v984_v28 = vmul.f32 1.442695, %v957_v1  ;;  %v959_v41 = vmul.f32 %v941_v16, %v4102_v53 }
 0x121   :  { %1859 = vrot.lane.b32.xlu0 %v4147_v55, %s3404_s0  ;;  %v4166_v19 = vpop.eup %3339  ;;  %v701_v2 = vmul.f32 0.3275911, %v4198_v54  ;;  %v897_v5 = vadd.f32 0.2548296, %v879_v17  ;;  %v708_v18 = vmul.f32 0.3275911, %v4195_v57 }
 0x122   :  { %v3342_v14 = vpop.eup %3341  ;;  %v779_v58 = vmul.f32 1.0614054, %v4166_v19  ;;  %v867_v35 = vadd.f32 -0.28449672, %v849_v13  ;;  %v988_v16 = vmul.f32 1.442695, %v959_v41 }
 0x123   :  { %v1003_v34 = vmul.f32 %v3342_v14, %v913_v21  ;;  %v719_v21 = vadd.f32 1.0, %v701_v2  ;;  %v915_v32 = vmul.f32 %v4108_v15, %v897_v5  ;;  %v520_v2 = vpop.f32.mrf.mxu1  ;;  %vm647_vm7 = vcmp.lt.f32.partialorder %v4188_v44, 0.0 }
 0x124   :  { %1742 = vrot.lane.b32.xlu1 %v4142_v61, %s3405_s21  ;;  %v797_v42 = vadd.f32 -1.4531521, %v779_v58  ;;  %v885_v13 = vmul.f32 %v4149_v63, %v867_v35 }
 0x125   :  { %1750 = vrot.lane.b32.xlu0 %v4147_v55, %s3405_s21  ;;  %v1021_v47 = vsub.f32 1.0, %v1003_v34  ;;  %v4218_v24 = vpop.eup %3343  ;;  %3347 = vrcp.f32 %v719_v21  ;;  %v4227_v34 = vmul.f32 0.70710677, %v4212_v40 }
 0x126   :  { %v815_v0 = vmul.f32 %v4166_v19, %v797_v42  ;;  %v726_v42 = vadd.f32 1.0, %v708_v18  ;;  %v778_v17 = vmul.f32 1.0614054, %v4218_v24  ;;  %v3346_v15 = vpop.eup %3345  ;;  %3349 = vpow2.f32 %v984_v28 }
 0x127   :  { %v1039_v4 = vmul.f32 %v1021_v47, %v661_v62  ;;  %v1057_v47 = vmul.f32 0.5, %v4061_v60  ;;  %v4233_v20 = vand.u32 2147483647, %v4227_v34  ;;  %v4241_v62 = vrot.slane %v4039_v48, %v4221_v29 }
 0x128   :  { %1633 = vrot.lane.b32.xlu1 %v4142_v61, %s3406_s22  ;;  %v833_v14 = vadd.f32 1.4214138, %v815_v0  ;;  %v444_v60 = vadd.f32 %v4157_v9, %v4046_v50  ;;  %v1005_v0 = vmul.f32 %v3346_v15, %v915_v32  ;;  %3351 = vrcp.f32 %v726_v42 }
 0x129   :  { %1641 = vrot.lane.b32.xlu0 %v4147_v55, %s3406_s22  ;;  %v1075_v58 = vadd.f32 1.0, %v1039_v4  ;;  %v935_v4 = vsub.f32 0.0, %v4198_v54  ;;  %v709_v5 = vmul.f32 0.3275911, %v4233_v20  ;;  %v452_v18 = vadd.f32 %v451_v12, %v4044_v10 }
 0x12a   :  { %v851_v53 = vmul.f32 %v4166_v19, %v833_v14  ;;  %v796_v9 = vadd.f32 -1.4531521, %v778_v17  ;;  %v4255_v14 = vmul.f32 0.5, %v444_v60  ;;  %v1023_v12 = vsub.f32 1.0, %v1005_v0 }
 0x12b   :  { %v1093_v1 = vmul.f32 %v1075_v58, %v1057_v47  ;;  %v727_v21 = vadd.f32 1.0, %v709_v5  ;;  %v521_v58 = vadd.f32 %v520_v2, %v4046_v50  ;;  %v4258_v32 = vmul.f32 0.5, %v452_v18 }
 0x12c   :  { %1524 = vrot.lane.b32.xlu1 %v4142_v61, %s3407_s23  ;;  %v869_v28 = vadd.f32 -0.28449672, %v851_v53  ;;  %v953_v35 = vmul.f32 %v935_v4, %v4198_v54  ;;  %v903_v41 = vadd.f32 0.2548296, %v885_v13  ;;  %v814_v47 = vmul.f32 %v4218_v24, %v796_v9 }
 0x12d   :  { %1968 = vrot.lane.b32.xlu0 %v4147_v55, %s3408_s24  ;;  %3353 = vrcp.f32 %v727_v21  ;;  %v4267_v42 = vmul.f32 0.70710677, %v4258_v32  ;;  %v663_v17 = vsel %vm645_vm4, -1.0, %v6494_v31  ;;  %v4286_v0 = vmul.f32 0.5, %v521_v58 }
 0x12e   :  { %3355 = vpow2.f32 %v988_v16  ;;  %v887_v15 = vmul.f32 %v4166_v19, %v869_v28  ;;  %v1041_v60 = vmul.f32 %v1023_v12, %v663_v17  ;;  %v976_v2 = vmul.f32 1.442695, %v953_v35 }
 0x12f   :  { %v4277_v53 = vand.u32 2147483647, %v4267_v42  ;;  %v921_v11 = vmul.f32 %v4149_v63, %v903_v41  ;;  %v940_v4 = vsub.f32 0.0, %v4139_v56  ;;  %v832_v13 = vadd.f32 1.4214138, %v814_v47 }
 0x130   :  { %1415 = vrot.lane.b32.xlu1 %v4142_v61, %s3409_s25  ;;  %v943_v16 = vsub.f32 0.0, %v4233_v20  ;;  %v4296_v18 = vsub.s32 3, %v4033_v46  ;;  %v905_v9 = vadd.f32 0.2548296, %v887_v15  ;;  %v1077_v58 = vadd.f32 1.0, %v1041_v60 }
 0x131   :  { %1532 = vrot.lane.b32.xlu0 %v4147_v55, %s3407_s23  ;;  %v4304_v35 = vmul.f32 0.70710677, %v4286_v0  ;;  %3357 = vpow2.f32 %v976_v2  ;;  %v958_v47 = vmul.f32 %v940_v4, %v4139_v56  ;;  %v944_v45 = vsub.f32 0.0, %v4277_v53 }
 0x132   :  { %v4281_v54 = vpop.eup %3347  ;;  %v961_v60 = vmul.f32 %v943_v16, %v4233_v20  ;;  %v4317_v2 = vrot.slane %v4039_v48, %v4296_v18  ;;  %v923_v56 = vmul.f32 %v4166_v19, %v905_v9  ;;  %vm655_vm8 = vcmp.lt.f32.partialorder %v4227_v34, 0.0 }
 0x133   :  { %v773_v5 = vmul.f32 1.0614054, %v4281_v54  ;;  %v3350_v63 = vpop.eup %3349  ;;  %v4325_v20 = vand.u32 2147483647, %v4304_v35  ;;  %vm656_vm10 = vcmp.lt.f32.partialorder %v4267_v42, 0.0  ;;  %vm648_vm13 = vcmp.lt.f32.partialorder %v4304_v35, 0.0 }
 0x134   :  { %v4214_v26 = vpop.f32.mrf.mxu0  ;;  %1306 = vrot.lane.b32.xlu1 %v4142_v61, %s3410_s26  ;;  %v1011_v41 = vmul.f32 %v3350_v63, %v921_v11 }
 0x135   :  { %1423 = vrot.lane.b32.xlu0 %v4147_v55, %s3409_s25  ;;  %v791_v21 = vadd.f32 -1.4531521, %v773_v5  ;;  %v4308_v15 = vpop.eup %3351  ;;  %v1059_v5 = vmul.f32 0.5, %v4072_v6 }
 0x136   :  { %v599_v8 = vpop.f32.mrf.mxu0  ;;  %v1029_v16 = vsub.f32 1.0, %v1011_v41 }
 0x137   :  { %v4263_v8 = vmul.f32 %v4241_v62, %v1093_v1  ;;  %v4284_v1 = vmul.f32 0.70710677, %v4255_v14  ;;  %v809_v17 = vmul.f32 %v4281_v54, %v791_v21  ;;  %v1095_v4 = vmul.f32 %v1077_v58, %v1059_v5 }
 0x138   :  { %v4235_v52 = vpop.f32.mrf.mxu0  ;;  %1195 = vrot.lane.b32.xlu1 %v4142_v61, %s3411_s27  ;;  %v986_v21 = vmul.f32 1.442695, %v958_v47  ;;  %v992_v58 = vmul.f32 1.442695, %v961_v60  ;;  %v1047_v60 = vmul.f32 %v1029_v16, %v669_v33 }
 0x139   :  { %1314 = vrot.lane.b32.xlu0 %v4147_v55, %s3410_s26  ;;  %v4301_v12 = vand.u32 2147483647, %v4284_v1  ;;  %v827_v11 = vadd.f32 1.4214138, %v809_v17  ;;  %v4339_v41 = vmul.f32 %v4317_v2, %v1095_v4  ;;  %vm646_vm12 = vcmp.lt.f32.partialorder %v4284_v1, 0.0 }
 0x13a   :  { %v604_v7 = vpop.f32.mrf.mxu0 }
 0x13b   :  { %v710_v7 = vmul.f32 0.3275911, %v4277_v53  ;;  %v700_v6 = vmul.f32 0.3275911, %v4301_v12  ;;  %v845_v19 = vmul.f32 %v4281_v54, %v827_v11 }
 0x13c   :  { %1960 = vrot.lane.b32.xlu1 %v4142_v61, %s3408_s24 }
 0x13d   :  { %1203 = vrot.lane.b32.xlu0 %v4147_v55, %s3411_s27  ;;  %v728_v28 = vadd.f32 1.0, %v710_v7  ;;  %v850_v7 = vmul.f32 %v4218_v24, %v832_v13  ;;  %v4327_v13 = vpop.eup %3353  ;;  %v863_v27 = vadd.f32 -0.28449672, %v845_v19  ;;  %v718_v47 = vadd.f32 1.0, %v700_v6 }
 0x13e   :  { %v3356_v9 = vpop.eup %3355  ;;  %v781_v17 = vmul.f32 1.0614054, %v4327_v13  ;;  %v962_v6 = vmul.f32 %v944_v45, %v4277_v53 }
 0x13f   :  { %3359 = vrcp.f32 %v728_v28  ;;  %v780_v28 = vmul.f32 1.0614054, %v4308_v15  ;;  %v868_v63 = vadd.f32 -0.28449672, %v850_v7  ;;  %v1013_v5 = vmul.f32 %v3356_v9, %v923_v56  ;;  %v3358_v9 = vpop.eup %3357 }
 0x140   :  { %1855 = vrot.lane.b32.xlu1 %v4263_v8, %s3404_s0  ;;  %v702_v7 = vmul.f32 0.3275911, %v4325_v20  ;;  %v799_v11 = vadd.f32 -1.4531521, %v781_v17  ;;  %3361 = vpow2.f32 %v986_v21  ;;  %v881_v25 = vmul.f32 %v4281_v54, %v863_v27 }
 0x141   :  { %1528 = vrot.lane.b32.xlu0 %v4263_v8, %s3407_s23  ;;  %v886_v31 = vmul.f32 %v4218_v24, %v868_v63  ;;  %v798_v56 = vadd.f32 -1.4531521, %v780_v28  ;;  %3363 = vpow2.f32 %v992_v58  ;;  %v1031_v16 = vsub.f32 1.0, %v1013_v5 }
 0x142   :  { %v817_v19 = vmul.f32 %v4327_v13, %v799_v11  ;;  %v899_v4 = vadd.f32 0.2548296, %v881_v25  ;;  %3365 = vrcp.f32 %v718_v47  ;;  %v720_v27 = vadd.f32 1.0, %v702_v7 }
 0x143   :  { %v1065_v28 = vmul.f32 0.5, %v4083_v23  ;;  %v1083_v63 = vadd.f32 1.0, %v1047_v60  ;;  %v4354_v58 = vsub.s32 5, %v4033_v46  ;;  %v6563_v25 = vmov 1.0  }
 0x144   :  { %1746 = vrot.lane.b32.xlu1 %v4263_v8, %s3405_s21  ;;  %v835_v21 = vadd.f32 1.4214138, %v817_v19  ;;  %v917_v17 = vmul.f32 %v4281_v54, %v899_v4  ;;  %v671_v45 = vsel %vm653_vm6, -1.0, %v6563_v25  ;;  %v904_v53 = vadd.f32 0.2548296, %v886_v31 }
 0x145   :  { %1419 = vrot.lane.b32.xlu0 %v4263_v8, %s3409_s25  ;;  %v816_v33 = vmul.f32 %v4308_v15, %v798_v56  ;;  %v994_v47 = vmul.f32 1.442695, %v962_v6  ;;  %v1049_v7 = vmul.f32 %v1031_v16, %v671_v45  ;;  %v942_v11 = vsub.f32 0.0, %v4195_v57 }
 0x146   :  { %v853_v5 = vmul.f32 %v4327_v13, %v835_v21  ;;  %v1007_v23 = vmul.f32 %v3358_v9, %v917_v17  ;;  %3367 = vrcp.f32 %v720_v27  ;;  %v1101_v60 = vmul.f32 %v1083_v63, %v1065_v28 }
 0x147   :  { %v834_v4 = vadd.f32 1.4214138, %v816_v33  ;;  %v665_v21 = vsel %vm647_vm7, -1.0, %v6563_v25  ;;  %v922_v6 = vmul.f32 %v4218_v24, %v904_v53  ;;  %3369 = vpow2.f32 %v994_v47  ;;  %v4385_v33 = vpop.f32.mrf.mxu1 }
 0x148   :  { %1637 = vrot.lane.b32.xlu1 %v4263_v8, %s3406_s22  ;;  %v871_v31 = vadd.f32 -0.28449672, %v853_v5  ;;  %v1025_v56 = vsub.f32 1.0, %v1007_v23  ;;  %v1085_v27 = vadd.f32 1.0, %v1049_v7  ;;  %v960_v28 = vmul.f32 %v942_v11, %v4195_v57 }
 0x149   :  { %1310 = vrot.lane.b32.xlu0 %v4263_v8, %s3410_s26  ;;  %v4379_v63 = vrot.slane %v4039_v48, %v4354_v58  ;;  %v4382_v45 = vmul.f32 %v4130_v38, %v1101_v60  ;;  %v1061_v24 = vmul.f32 0.5, %v4182_v39  ;;  %v852_v7 = vmul.f32 %v4308_v15, %v834_v4 }
 0x14a   :  { %v889_v44 = vmul.f32 %v4327_v13, %v871_v31  ;;  %v1043_v9 = vmul.f32 %v1025_v56, %v665_v21  ;;  %v526_v56 = vpop.f32.mrf.mxu1  ;;  %v674_v42 = vsel %vm656_vm10, -1.0, %v6563_v25  ;;  %v664_v1 = vsel %vm646_vm12, -1.0, %v6563_v25 }
 0x14b   :  { %v527_v59 = vadd.f32 %v526_v56, %v4044_v10 }
 0x14c   :  { %1964 = vrot.lane.b32.xlu1 %v4263_v8, %s3408_s24  ;;  %v4356_v43 = vpop.eup %3359  ;;  %v907_v17 = vadd.f32 0.2548296, %v889_v44  ;;  %v1079_v53 = vadd.f32 1.0, %v1043_v9  ;;  %v870_v44 = vadd.f32 -0.28449672, %v852_v7 }
 0x14d   :  { %1199 = vrot.lane.b32.xlu0 %v4263_v8, %s3411_s27  ;;  %v782_v54 = vmul.f32 1.0614054, %v4356_v43  ;;  %v3362_v23 = vpop.eup %3361 }
 0x14e   :  { %v925_v47 = vmul.f32 %v4327_v13, %v907_v17  ;;  %v3364_v48 = vpop.eup %3363  ;;  %v1012_v57 = vmul.f32 %v3362_v23, %v922_v6  ;;  %v1097_v38 = vmul.f32 %v1079_v53, %v1061_v24  ;;  %v990_v13 = vmul.f32 1.442695, %v960_v28 }
 0x14f   :  { %v800_v19 = vadd.f32 -1.4531521, %v782_v54  ;;  %v1067_v54 = vmul.f32 0.5, %v4091_v36  ;;  %v4396_v36 = vpop.eup %3365  ;;  %v673_v6 = vsel %vm655_vm8, -1.0, %v6563_v25  ;;  %v670_v24 = vsel %vm652_vm9, -1.0, %v6563_v25 }
 0x150   :  { %1754 = vrot.lane.b32.xlu1 %v4339_v41, %s3405_s21  ;;  %v1015_v31 = vmul.f32 %v3364_v48, %v925_v47  ;;  %v4399_v60 = vmul.f32 %v4379_v63, %v1097_v38  ;;  %v1030_v21 = vsub.f32 1.0, %v1012_v57  ;;  %3371 = vpow2.f32 %v990_v13 }
 0x151   :  { %1863 = vrot.lane.b32.xlu0 %v4339_v41, %s3404_s0  ;;  %v818_v16 = vmul.f32 %v4356_v43, %v800_v19  ;;  %v1103_v39 = vmul.f32 %v1085_v27, %v1067_v54  ;;  %v1069_v53 = vmul.f32 0.5, %v4212_v40  ;;  %v4424_v38 = vmul.f32 0.5, %v527_v59 }
 0x152   :  { %6564 = vst [vmem:[#allocation4_spill] sm:$0xff] %v4399_v60  ;;  %v1033_v4 = vsub.f32 1.0, %v1015_v31  ;;  %v1048_v23 = vmul.f32 %v1030_v21, %v670_v24  ;;  %v1066_v21 = vmul.f32 0.5, %v4112_v22 }
 0x153   :  { %v836_v5 = vadd.f32 1.4214138, %v818_v16  ;;  %v4409_v9 = vmul.f32 %v4136_v51, %v1103_v39  ;;  %v772_v16 = vmul.f32 1.0614054, %v4396_v36  ;;  %v4413_v28 = vpop.eup %3367  ;;  %v888_v51 = vmul.f32 %v4308_v15, %v870_v44 }
 0x154   :  { %1536 = vrot.lane.b32.xlu1 %v4339_v41, %s3407_s23  ;;  %v1051_v27 = vmul.f32 %v1033_v4, %v673_v6  ;;  %v3370_v47 = vpop.eup %3369  ;;  %v774_v57 = vmul.f32 1.0614054, %v4413_v28  ;;  %v934_v44 = vsub.f32 0.0, %v4301_v12 }
 0x155   :  { %1645 = vrot.lane.b32.xlu0 %v4339_v41, %s3406_s22  ;;  %v854_v11 = vmul.f32 %v4356_v43, %v836_v5  ;;  %v790_v48 = vadd.f32 -1.4531521, %v772_v16  ;;  %v906_v39 = vadd.f32 0.2548296, %v888_v51 }
 0x156   :  { %v1087_v5 = vadd.f32 1.0, %v1051_v27  ;;  %v792_v56 = vadd.f32 -1.4531521, %v774_v57 }
 0x157   :  { %v872_v19 = vadd.f32 -0.28449672, %v854_v11  ;;  %v808_v13 = vmul.f32 %v4396_v36, %v790_v48  ;;  %v924_v6 = vmul.f32 %v4308_v15, %v906_v39 }
 0x158   :  { %1427 = vrot.lane.b32.xlu1 %v4339_v41, %s3409_s25  ;;  %v1105_v7 = vmul.f32 %v1087_v5, %v1069_v53  ;;  %v952_v5 = vmul.f32 %v934_v44, %v4301_v12  ;;  %v1068_v44 = vmul.f32 0.5, %v4170_v30 }
 0x159   :  { %1972 = vrot.lane.b32.xlu0 %v4339_v41, %s3408_s24  ;;  %v890_v34 = vmul.f32 %v4356_v43, %v872_v19  ;;  %v4436_v19 = vmul.f32 0.70710677, %v4424_v38  ;;  %v826_v59 = vadd.f32 1.4214138, %v808_v13  ;;  %v528_v13 = vpop.f32.mrf.mxu1 }
 0x15a   :  { %v4428_v11 = vmul.f32 %v4042_v49, %v1105_v7  ;;  %v974_v48 = vmul.f32 1.442695, %v952_v5 }
 0x15b   :  { %v908_v17 = vadd.f32 0.2548296, %v890_v34  ;;  %v1070_v34 = vmul.f32 0.5, %v4258_v32  ;;  %v4449_v24 = vand.u32 2147483647, %v4436_v19  ;;  %vm657_vm14 = vcmp.lt.f32.partialorder %v4436_v19, 0.0 }
 0x15c   :  { %1318 = vrot.lane.b32.xlu1 %v4339_v41, %s3410_s26  ;;  %6565 = vst [vmem:[#allocation5_spill] sm:$0xff] %v4428_v11  ;;  %3373 = vpow2.f32 %v974_v48 }
 0x15d   :  { %1853 = vrot.lane.b32.xlu0 %v4382_v45, %s3404_s0  ;;  %v926_v54 = vmul.f32 %v4356_v43, %v908_v17  ;;  %v1084_v43 = vadd.f32 1.0, %v1048_v23  ;;  %v810_v17 = vmul.f32 %v4413_v28, %v792_v56  ;;  %v3372_v53 = vpop.eup %3371  ;;  %v936_v23 = vsub.f32 0.0, %v4325_v20 }
 0x15e   :  { %v1014_v32 = vmul.f32 %v3372_v53, %v924_v6  ;;  %v711_v12 = vmul.f32 0.3275911, %v4449_v24 }
 0x15f   :  { %v1016_v40 = vmul.f32 %v3370_v47, %v926_v54  ;;  %v1102_v27 = vmul.f32 %v1084_v43, %v1066_v21  ;;  %v844_v54 = vmul.f32 %v4396_v36, %v826_v59  ;;  %v828_v47 = vadd.f32 1.4214138, %v810_v17 }
 0x160   :  { %1207 = vrot.lane.b32.xlu1 %v4339_v41, %s3411_s27  ;;  %v954_v57 = vmul.f32 %v936_v23, %v4325_v20  ;;  %v672_v20 = vsel %vm654_vm11, -1.0, %v6563_v25  ;;  %v529_v21 = vadd.f32 %v528_v13, %v4044_v10  ;;  %v603_v59 = vadd.f32 %v4235_v52, %v4044_v10 }
 0x161   :  { %1744 = vrot.lane.b32.xlu0 %v4382_v45, %s3405_s21  ;;  %v1034_v31 = vsub.f32 1.0, %v1016_v40  ;;  %v4461_v51 = vmul.f32 %v4241_v62, %v1102_v27  ;;  %v862_v7 = vadd.f32 -0.28449672, %v844_v54  ;;  %v846_v62 = vmul.f32 %v4413_v28, %v828_v47 }
 0x162   :  { %v729_v40 = vadd.f32 1.0, %v711_v12  ;;  %v978_v43 = vmul.f32 1.442695, %v954_v57  ;;  %v4490_v27 = vmul.f32 0.5, %v529_v21  ;;  %v4509_v52 = vmul.f32 0.5, %v603_v59 }
 0x163   :  { %v1052_v4 = vmul.f32 %v1034_v31, %v674_v42  ;;  %v880_v37 = vmul.f32 %v4396_v36, %v862_v7  ;;  %v864_v31 = vadd.f32 -0.28449672, %v846_v62  ;;  %v4557_v21 = vsub.s32 6, %v4033_v46 }
 0x164   :  { %1861 = vrot.lane.b32.xlu1 %v4409_v9, %s3404_s0  ;;  %3375 = vrcp.f32 %v729_v40  ;;  %v4507_v10 = vmul.f32 0.70710677, %v4490_v27  ;;  %v4523_v47 = vmul.f32 0.70710677, %v4509_v52  ;;  %v666_v40 = vsel %vm648_vm13, -1.0, %v6563_v25 }
 0x165   :  { %1635 = vrot.lane.b32.xlu0 %v4382_v45, %s3406_s22  ;;  %v1088_v16 = vadd.f32 1.0, %v1052_v4  ;;  %3377 = vpow2.f32 %v978_v43  ;;  %v898_v42 = vadd.f32 0.2548296, %v880_v37  ;;  %v882_v4 = vmul.f32 %v4413_v28, %v864_v31 }
 0x166   :  { %v4520_v54 = vand.u32 2147483647, %v4507_v10  ;;  %v4536_v62 = vand.u32 2147483647, %v4523_v47  ;;  %vm658_vm15 = vcmp.lt.f32.partialorder %v4507_v10, 0.0  ;;  %vm659_vm1 = vcmp.lt.f32.partialorder %v4523_v47, 0.0 }
 0x167   :  { %v1106_v22 = vmul.f32 %v1088_v16, %v1070_v34  ;;  %v916_v34 = vmul.f32 %v4396_v36, %v898_v42  ;;  %v900_v16 = vadd.f32 0.2548296, %v882_v4  ;;  %v598_v36 = vadd.f32 %v4214_v26, %v4046_v50 }
 0x168   :  { %1752 = vrot.lane.b32.xlu1 %v4409_v9, %s3405_s21  ;;  %v712_v7 = vmul.f32 0.3275911, %v4520_v54  ;;  %v713_v13 = vmul.f32 0.3275911, %v4536_v62  ;;  %v1060_v42 = vmul.f32 0.5, %v4255_v14  ;;  %v945_v4 = vsub.f32 0.0, %v4449_v24 }
 0x169   :  { %1526 = vrot.lane.b32.xlu0 %v4382_v45, %s3407_s23  ;;  %v4456_v15 = vmul.f32 %v4379_v63, %v1106_v22  ;;  %v1032_v63 = vsub.f32 1.0, %v1014_v32  ;;  %v3374_v17 = vpop.eup %3373  ;;  %v918_v53 = vmul.f32 %v4413_v28, %v900_v16  ;;  %v4517_v32 = vmul.f32 0.5, %v598_v36 }
 0x16a   :  { %v1006_v22 = vmul.f32 %v3374_v17, %v916_v34  ;;  %v730_v31 = vadd.f32 1.0, %v712_v7  ;;  %v523_v14 = vadd.f32 %v4385_v33, %v4046_v50  ;;  %v731_v17 = vadd.f32 1.0, %v713_v13 }
 0x16b   :  { %6566 = vst [vmem:[#allocation6_spill] sm:$0xff] %v4456_v15  ;;  %v1050_v39 = vmul.f32 %v1032_v63, %v672_v20  ;;  %v4532_v63 = vmul.f32 0.70710677, %v4517_v32  ;;  %v963_v36 = vmul.f32 %v945_v4, %v4449_v24 }
 0x16c   :  { %1643 = vrot.lane.b32.xlu1 %v4409_v9, %s3406_s22  ;;  %3379 = vrcp.f32 %v730_v31 }
 0x16d   :  { %1417 = vrot.lane.b32.xlu0 %v4382_v45, %s3409_s25  ;;  %v1086_v56 = vadd.f32 1.0, %v1050_v39  ;;  %v4545_v39 = vand.u32 2147483647, %v4532_v63  ;;  %3381 = vrcp.f32 %v731_v17  ;;  %vm650_vm2 = vcmp.lt.f32.partialorder %v4532_v63, 0.0 }
 0x16e   :  { %v668_v63 = vsel %vm650_vm2, -1.0, %v6563_v25 }
 0x16f   :  { %v1104_v6 = vmul.f32 %v1086_v56, %v1068_v44  ;;  %v704_v16 = vmul.f32 0.3275911, %v4545_v39 }
 0x170   :  { %1970 = vrot.lane.b32.xlu1 %v4409_v9, %s3408_s24 }
 0x171   :  { %1308 = vrot.lane.b32.xlu0 %v4382_v45, %s3410_s26  ;;  %v4499_v30 = vmul.f32 %v4317_v2, %v1104_v6  ;;  %v4504_v5 = vpop.eup %3375  ;;  %v1024_v2 = vsub.f32 1.0, %v1006_v22  ;;  %v722_v24 = vadd.f32 1.0, %v704_v16 }
 0x172   :  { %v3378_v23 = vpop.eup %3377  ;;  %v783_v26 = vmul.f32 1.0614054, %v4504_v5 }
 0x173   :  { %v1008_v28 = vmul.f32 %v3378_v23, %v918_v53  ;;  %v1042_v12 = vmul.f32 %v1024_v2, %v664_v1  ;;  %v1062_v53 = vmul.f32 0.5, %v4286_v0  ;;  %v4575_v23 = vld [vmem:[%s6480_s1] sm:$0xff]  ;;  %3383 = vrcp.f32 %v722_v24 }
 0x174   :  { %1857 = vrot.lane.b32.xlu1 %v4461_v51, %s3404_s0  ;;  %v801_v57 = vadd.f32 -1.4531521, %v783_v26  ;;  %v4579_v2 = vrot.slane %v4575_v23, %v4557_v21  ;;  %v4589_v26 = vmul.f32 0.5, %v523_v14 }
 0x175   :  { %1197 = vrot.lane.b32.xlu0 %v4382_v45, %s3411_s27  ;;  %v1026_v48 = vsub.f32 1.0, %v1008_v28  ;;  %v1078_v35 = vadd.f32 1.0, %v1042_v12  ;;  %v996_v12 = vmul.f32 1.442695, %v963_v36 }
 0x176   :  { %v819_v20 = vmul.f32 %v4504_v5, %v801_v57  ;;  %v4603_v7 = vmul.f32 0.70710677, %v4589_v26 }
 0x177   :  { %v1044_v43 = vmul.f32 %v1026_v48, %v666_v40  ;;  %v1096_v44 = vmul.f32 %v1078_v35, %v1060_v42  ;;  %3385 = vpow2.f32 %v996_v12 }
 0x178   :  { %1530 = vrot.lane.b32.xlu1 %v4461_v51, %s3407_s23  ;;  %v837_v34 = vadd.f32 1.4214138, %v819_v20  ;;  %v4615_v20 = vand.u32 2147483647, %v4603_v7  ;;  %vm649_vm4 = vcmp.lt.f32.partialorder %v4603_v7, 0.0 }
 0x179   :  { %1962 = vrot.lane.b32.xlu0 %v4382_v45, %s3408_s24  ;;  %v1080_v6 = vadd.f32 1.0, %v1044_v43  ;;  %v4584_v50 = vmul.f32 %v4042_v49, %v1096_v44  ;;  %v4619_v13 = vpop.eup %3379 }
 0x17a   :  { %v855_v33 = vmul.f32 %v4504_v5, %v837_v34  ;;  %v703_v44 = vmul.f32 0.3275911, %v4615_v20  ;;  %v4631_v16 = vpop.eup %3381 }
 0x17b   :  { %6569 = vst [vmem:[#allocation9_spill] sm:$0xff] %v4584_v50  ;;  %v1098_v0 = vmul.f32 %v1080_v6, %v1062_v53  ;;  %v784_v6 = vmul.f32 1.0614054, %v4619_v13 }
 0x17c   :  { %1421 = vrot.lane.b32.xlu1 %v4461_v51, %s3409_s25  ;;  %v873_v48 = vadd.f32 -0.28449672, %v855_v33  ;;  %v721_v36 = vadd.f32 1.0, %v703_v44  ;;  %v785_v33 = vmul.f32 1.0614054, %v4631_v16 }
 0x17d   :  { %1534 = vrot.lane.b32.xlu0 %v4409_v9, %s3407_s23  ;;  %v4598_v49 = vmul.f32 %v4579_v2, %v1098_v0  ;;  %v802_v0 = vadd.f32 -1.4531521, %v784_v6 }
 0x17e   :  { %v891_v35 = vmul.f32 %v4504_v5, %v873_v48  ;;  %3387 = vrcp.f32 %v721_v36  ;;  %v803_v44 = vadd.f32 -1.4531521, %v785_v33 }
 0x17f   :  { %6571 = vst [vmem:[#allocation11_spill] sm:$0xff] %v4598_v49 }
 0x180   :  { %1312 = vrot.lane.b32.xlu1 %v4461_v51, %s3410_s26  ;;  %v909_v42 = vadd.f32 0.2548296, %v891_v35  ;;  %v4640_v53 = vpop.eup %3383 }
 0x181   :  { %1425 = vrot.lane.b32.xlu0 %v4409_v9, %s3409_s25 }
 0x182   :  { %v927_v14 = vmul.f32 %v4504_v5, %v909_v42  ;;  %v776_v5 = vmul.f32 1.0614054, %v4640_v53  ;;  %v820_v42 = vmul.f32 %v4619_v13, %v802_v0  ;;  %v821_v0 = vmul.f32 %v4631_v16, %v803_v44 }
 0x184   :  { %1201 = vrot.lane.b32.xlu1 %v4461_v51, %s3411_s27  ;;  %v3386_v12 = vpop.eup %3385  ;;  %v838_v36 = vadd.f32 1.4214138, %v820_v42  ;;  %v839_v44 = vadd.f32 1.4214138, %v821_v0 }
 0x185   :  { %1316 = vrot.lane.b32.xlu0 %v4409_v9, %s3410_s26  ;;  %v1017_v48 = vmul.f32 %v3386_v12, %v927_v14  ;;  %v794_v12 = vadd.f32 -1.4531521, %v776_v5 }
 0x186   :  { %v856_v42 = vmul.f32 %v4619_v13, %v838_v36  ;;  %v857_v36 = vmul.f32 %v4631_v16, %v839_v44 }
 0x187   :  { %v1035_v14 = vsub.f32 1.0, %v1017_v48  ;;  %v812_v48 = vmul.f32 %v4640_v53, %v794_v12 }
 0x188   :  { %1865 = vrot.lane.b32.xlu1 %v4499_v30, %s3404_s0 }
 0x189   :  { %1205 = vrot.lane.b32.xlu0 %v4409_v9, %s3411_s27 }
 0x18b   :  { %v4690_v29 = vpop.eup %3387 }
 0x18c   :  { %1538 = vrot.lane.b32.xlu1 %v4499_v30, %s3407_s23 }
 0x18d   :  { %1748 = vrot.lane.b32.xlu0 %v4461_v51, %s3405_s21 }
 0x190   :  { %1429 = vrot.lane.b32.xlu1 %v4499_v30, %s3409_s25 }
 0x191   :  { %1639 = vrot.lane.b32.xlu0 %v4461_v51, %s3406_s22 }
 0x192   :  { %v4547_v37 = vpop.permute.xlu1 %1851 }
 0x193   :  { %6567 = vst [vmem:[#allocation7_spill] sm:$0xff] %v4547_v37  ;;  %v4550_v56 = vpop.permute.xlu0 %1859 }
 0x194   :  { %1320 = vrot.lane.b32.xlu1 %v4499_v30, %s3410_s26 }
 0x195   :  { %1966 = vrot.lane.b32.xlu0 %v4461_v51, %s3408_s24 }
 0x196   :  { %v4562_v59 = vpop.permute.xlu1 %1742 }
 0x197   :  { %6568 = vst [vmem:[#allocation8_spill] sm:$0xff] %v4562_v59  ;;  %v4566_v22 = vpop.permute.xlu0 %1750 }
 0x198   :  { %1209 = vrot.lane.b32.xlu1 %v4499_v30, %s3411_s27 }
 0x199   :  { %1756 = vrot.lane.b32.xlu0 %v4499_v30, %s3405_s21 }
 0x19a   :  { %v4587_v28 = vpop.permute.xlu1 %1633 }
 0x19b   :  { %6570 = vst [vmem:[#allocation10_spill] sm:$0xff] %v4587_v28  ;;  %v4591_v1 = vpop.permute.xlu0 %1641 }
 0x19c   :  { %1867 = vrot.lane.b32.xlu1 %v4584_v50, %s3404_s0 }
 0x19d   :  { %1647 = vrot.lane.b32.xlu0 %v4499_v30, %s3406_s22 }
 0x19e   :  { %v4600_v57 = vpop.permute.xlu1 %1524 }
 0x19f   :  { %6572 = vst [vmem:[#allocation12_spill] sm:$0xff] %v4600_v57  ;;  %v4605_v40 = vpop.permute.xlu0 %1968  ;;  %v947_v57 = vsub.f32 0.0, %v4536_v62 }
 0x1a0   :  { %6573 = vst [vmem:[#allocation13_spill] sm:$0xff] %v4605_v40  ;;  %1875 = vrot.lane.b32.xlu1 %v4598_v49, %s3404_s0 }
 0x1a1   :  { %1974 = vrot.lane.b32.xlu0 %v4499_v30, %s3408_s24 }
 0x1a2   :  { %v4612_v43 = vpop.permute.xlu1 %1415 }
 0x1a3   :  { %6574 = vst [vmem:[#allocation14_spill] sm:$0xff] %v4612_v43  ;;  %v4617_v31 = vpop.permute.xlu0 %1532 }
 0x1a4   :  { %1649 = vrot.lane.b32.xlu1 %v4584_v50, %s3406_s22 }
 0x1a5   :  { %1758 = vrot.lane.b32.xlu0 %v4584_v50, %s3405_s21 }
 0x1a6   :  { %v4625_v4 = vpop.permute.xlu1 %1306 }
 0x1a7   :  { %6575 = vst [vmem:[#allocation15_spill] sm:$0xff] %v4625_v4  ;;  %v4629_v34 = vpop.permute.xlu0 %1423 }
 0x1a8   :  { %6576 = vst [vmem:[#allocation16_spill] sm:$0xff] %v4629_v34  ;;  %1766 = vrot.lane.b32.xlu1 %v4598_v49, %s3405_s21 }
 0x1a9   :  { %1540 = vrot.lane.b32.xlu0 %v4584_v50, %s3407_s23 }
 0x1aa   :  { %v4638_v17 = vpop.permute.xlu1 %1195 }
 0x1ab   :  { %6577 = vst [vmem:[#allocation17_spill] sm:$0xff] %v4638_v17  ;;  %v4643_v24 = vpop.permute.xlu0 %1314  ;;  %v946_v17 = vsub.f32 0.0, %v4520_v54 }
 0x1ac   :  { %6578 = vst [vmem:[#allocation18_spill] sm:$0xff] %v4643_v24  ;;  %1657 = vrot.lane.b32.xlu1 %v4598_v49, %s3406_s22  ;;  %v874_v24 = vadd.f32 -0.28449672, %v856_v42  ;;  %v775_v42 = vmul.f32 1.0614054, %v4690_v29 }
 0x1ad   :  { %1431 = vrot.lane.b32.xlu0 %v4584_v50, %s3409_s25  ;;  %v964_v43 = vmul.f32 %v946_v17, %v4520_v54  ;;  %v965_v17 = vmul.f32 %v947_v57, %v4536_v62 }
 0x1ae   :  { %v4650_v35 = vpop.permute.xlu1 %1960  ;;  %v892_v44 = vmul.f32 %v4619_v13, %v874_v24 }
 0x1af   :  { %6579 = vst [vmem:[#allocation19_spill] sm:$0xff] %v4650_v35  ;;  %v4653_v6 = vpop.permute.xlu0 %1203  ;;  %v675_v35 = vsel %vm657_vm14, -1.0, %v6563_v25  ;;  %v998_v54 = vmul.f32 1.442695, %v964_v43  ;;  %v1000_v62 = vmul.f32 1.442695, %v965_v17 }
 0x1b0   :  { %6580 = vst [vmem:[#allocation20_spill] sm:$0xff] %v4653_v6  ;;  %1976 = vrot.lane.b32.xlu1 %v4584_v50, %s3408_s24  ;;  %v1053_v19 = vmul.f32 %v1035_v14, %v675_v35  ;;  %v938_v6 = vsub.f32 0.0, %v4545_v39  ;;  %v830_v14 = vadd.f32 1.4214138, %v812_v48  ;;  %v793_v17 = vadd.f32 -1.4531521, %v775_v42 }
 0x1b1   :  { %1322 = vrot.lane.b32.xlu0 %v4584_v50, %s3410_s26  ;;  %3389 = vpow2.f32 %v998_v54  ;;  %v937_v42 = vsub.f32 0.0, %v4615_v20 }
 0x1b2   :  { %v4661_v4 = vpop.permute.xlu1 %1855  ;;  %v1089_v35 = vadd.f32 1.0, %v1053_v19  ;;  %v956_v43 = vmul.f32 %v938_v6, %v4545_v39  ;;  %v848_v19 = vmul.f32 %v4640_v53, %v830_v14  ;;  %3391 = vpow2.f32 %v1000_v62 }
 0x1b3   :  { %v4664_v33 = vpop.permute.xlu0 %1528 }
 0x1b4   :  { %1544 = vrot.lane.b32.xlu1 %v4399_v60, %s3407_s23  ;;  %v982_v39 = vmul.f32 1.442695, %v956_v43  ;;  %v866_v6 = vadd.f32 -0.28449672, %v848_v19  ;;  %v811_v43 = vmul.f32 %v4690_v29, %v793_v17 }
 0x1b5   :  { %1871 = vrot.lane.b32.xlu0 %v4399_v60, %s3404_s0 }
 0x1b6   :  { %v4674_v5 = vpop.permute.xlu1 %1746  ;;  %3393 = vpow2.f32 %v982_v39 }
 0x1b7   :  { %v4677_v40 = vpop.permute.xlu0 %1419 }
 0x1b8   :  { %6581 = vst [vmem:[#allocation21_spill] sm:$0xff] %v4677_v40  ;;  %1435 = vrot.lane.b32.xlu1 %v4399_v60, %s3409_s25  ;;  %v1071_v40 = vmul.f32 0.5, %v4424_v38  ;;  %v875_v38 = vadd.f32 -0.28449672, %v857_v36  ;;  %v884_v36 = vmul.f32 %v4640_v53, %v866_v6  ;;  %v829_v6 = vadd.f32 1.4214138, %v811_v43 }
 0x1b9   :  { %1762 = vrot.lane.b32.xlu0 %v4399_v60, %s3405_s21 }
 0x1ba   :  { %v4685_v12 = vpop.permute.xlu1 %1637  ;;  %v1107_v57 = vmul.f32 %v1089_v35, %v1071_v40  ;;  %v910_v35 = vadd.f32 0.2548296, %v892_v44  ;;  %v893_v24 = vmul.f32 %v4631_v16, %v875_v38  ;;  %v902_v38 = vadd.f32 0.2548296, %v884_v36 }
 0x1bb   :  { %v4688_v0 = vpop.permute.xlu0 %1310  ;;  %v847_v43 = vmul.f32 %v4690_v29, %v829_v6 }
 0x1bc   :  { %6582 = vst [vmem:[#allocation22_spill] sm:$0xff] %v4688_v0  ;;  %1326 = vrot.lane.b32.xlu1 %v4399_v60, %s3410_s26  ;;  %v4710_v40 = vmul.f32 %v4579_v2, %v1107_v57  ;;  %v928_v62 = vmul.f32 %v4619_v13, %v910_v35  ;;  %v911_v57 = vadd.f32 0.2548296, %v893_v24  ;;  %v955_v35 = vmul.f32 %v937_v42, %v4615_v20 }
 0x1bd   :  { %1653 = vrot.lane.b32.xlu0 %v4399_v60, %s3406_s22  ;;  %v865_v6 = vadd.f32 -0.28449672, %v847_v43 }
 0x1be   :  { %v4699_v48 = vpop.permute.xlu1 %1964  ;;  %6585 = vst [vmem:[#allocation25_spill] sm:$0xff] %v4710_v40  ;;  %v3390_v44 = vpop.eup %3389  ;;  %v929_v17 = vmul.f32 %v4631_v16, %v911_v57  ;;  %v980_v42 = vmul.f32 1.442695, %v955_v35 }
 0x1bf   :  { %6583 = vst [vmem:[#allocation23_spill] sm:$0xff] %v4699_v48  ;;  %v4703_v0 = vpop.permute.xlu0 %1199  ;;  %v1018_v48 = vmul.f32 %v3390_v44, %v928_v62  ;;  %v3392_v24 = vpop.eup %3391 }
 0x1c0   :  { %6584 = vst [vmem:[#allocation24_spill] sm:$0xff] %v4703_v0  ;;  %1760 = vrot.lane.b32.xlu1 %v4428_v11, %s3405_s21  ;;  %v920_v0 = vmul.f32 %v4640_v53, %v902_v38  ;;  %v1019_v62 = vmul.f32 %v3392_v24, %v929_v17  ;;  %v676_v53 = vsel %vm658_vm15, -1.0, %v6563_v25  ;;  %3395 = vpow2.f32 %v980_v42 }
 0x1c1   :  { %1869 = vrot.lane.b32.xlu0 %v4428_v11, %s3404_s0  ;;  %v1036_v16 = vsub.f32 1.0, %v1018_v48  ;;  %v883_v24 = vmul.f32 %v4690_v29, %v865_v6 }
 0x1c2   :  { %v4712_v54 = vpop.permute.xlu1 %1754  ;;  %v1037_v10 = vsub.f32 1.0, %v1019_v62  ;;  %v4774_v62 = vsub.s32 7, %v4033_v46  ;;  %v4787_v46 = vld [vmem:[%s6481_s5 + $0x8] sm:$0xff] }
 0x1c3   :  { %v4715_v14 = vpop.permute.xlu0 %1863  ;;  %v3394_v20 = vpop.eup %3393  ;;  %6593 = vst [vmem:[#allocation33_spill] sm:$0xff] %v4787_v46  ;;  %3099 = vmatprep.mubr.msk.f32.mxu0 %vm216_vm0, %v4787_v46  ;;  %3097 = vmatprep.mubr.msk.f32.mxu1 %vm216_vm0, %v4787_v46 }
 0x1c4   :  { %1877 = vrot.lane.b32.xlu1 %v4710_v40, %s3404_s0  ;;  %v1010_v44 = vmul.f32 %v3394_v20, %v920_v0  ;;  %v677_v0 = vsel %vm659_vm1, -1.0, %v6563_v25  ;;  %6592 = vst [vmem:[#allocation32_spill] sm:$0xff] %v4774_v62  ;;  %v1072_v20 = vmul.f32 0.5, %v4490_v27  ;;  %v4795_v27 = vrot.slane %v4575_v23, %v4774_v62 }
 0x1c5   :  { %1542 = vrot.lane.b32.xlu0 %v4428_v11, %s3407_s23  ;;  %v1055_v43 = vmul.f32 %v1037_v10, %v677_v0  ;;  %v6596_v23 = vlaneseq }
 0x1c6   :  { %v4722_v2 = vpop.permute.xlu1 %1536  ;;  %v1028_v17 = vsub.f32 1.0, %v1010_v44 }
 0x1c7   :  { %v4726_v19 = vpop.permute.xlu0 %1645  ;;  %v1091_v6 = vadd.f32 1.0, %v1055_v43 }
 0x1c8   :  { %1651 = vrot.lane.b32.xlu1 %v4428_v11, %s3406_s22  ;;  %v1046_v42 = vmul.f32 %v1028_v17, %v668_v63  ;;  %v1073_v17 = vmul.f32 0.5, %v4509_v52  ;;  %v1064_v52 = vmul.f32 0.5, %v4517_v32  ;;  %v4828_v32 = vld [vmem:[%s6482_s2] sm:$0xff] }
 0x1c9   :  { %1433 = vrot.lane.b32.xlu0 %v4428_v11, %s3409_s25 }
 0x1ca   :  { %v4733_v39 = vpop.permute.xlu1 %1427  ;;  %v1082_v0 = vadd.f32 1.0, %v1046_v42 }
 0x1cb   :  { %v4736_v13 = vpop.permute.xlu0 %1972 }
 0x1cc   :  { %6586 = vst [vmem:[#allocation26_spill] sm:$0xff] %v4736_v13  ;;  %1768 = vrot.lane.b32.xlu1 %v4710_v40, %s3405_s21  ;;  %v1054_v13 = vmul.f32 %v1036_v16, %v676_v53  ;;  %v1100_v46 = vmul.f32 %v1082_v0, %v1064_v52  ;;  %v4835_v0 = vld [vmem:[%s6482_s2 + $0x8] sm:$0xff] }
 0x1cd   :  { %1324 = vrot.lane.b32.xlu0 %v4428_v11, %s3410_s26  ;;  %v3396_v42 = vpop.eup %3395  ;;  %v1913_v52 = vrot.slane %v4835_v0, %v4774_v62 }
 0x1ce   :  { %v4744_v36 = vpop.permute.xlu1 %1318  ;;  %v1090_v47 = vadd.f32 1.0, %v1054_v13  ;;  %v901_v13 = vadd.f32 0.2548296, %v883_v24 }
 0x1cf   :  { %6587 = vst [vmem:[#allocation27_spill] sm:$0xff] %v4744_v36  ;;  %v4748_v57 = vpop.permute.xlu0 %1853 }
 0x1d0   :  { %6588 = vst [vmem:[#allocation28_spill] sm:$0xff] %v4748_v57  ;;  %1659 = vrot.lane.b32.xlu1 %v4710_v40, %s3406_s22  ;;  %v1108_v44 = vmul.f32 %v1090_v47, %v1072_v20  ;;  %v919_v47 = vmul.f32 %v4690_v29, %v901_v13  ;;  %v1109_v20 = vmul.f32 %v1091_v6, %v1073_v17  ;;  %v3087_v29 = vld [vmem:[%s6480_s1 + $0x8] ss:$0 sm:$0xff] }
 0x1d1   :  { %1213 = vrot.lane.b32.xlu0 %v4428_v11, %s3411_s27 }
 0x1d2   :  { %v4755_v38 = vpop.permute.xlu1 %1207  ;;  %v4806_v43 = vmul.f32 %v4795_v27, %v1108_v44  ;;  %v1009_v44 = vmul.f32 %v3396_v42, %v919_v47  ;;  %v4823_v6 = vmul.f32 %v3087_v29, %v1109_v20  ;;  %v4843_v47 = vmul.f32 %v3087_v29, %v1100_v46 }
 0x1d3   :  { %6589 = vst [vmem:[#allocation29_spill] sm:$0xff] %v4755_v38  ;;  %v4758_v48 = vpop.permute.xlu0 %1744  ;;  %v1909_v20 = vrot.slane %v4828_v32, %v4774_v62 }
 0x1d4   :  { %6590 = vst [vmem:[#allocation30_spill] sm:$0xff] %v4758_v48  ;;  %1978 = vrot.lane.b32.xlu1 %v4428_v11, %s3408_s24  ;;  %6594 = vst [vmem:[#allocation34_spill] sm:$0xff] %v4806_v43  ;;  %v4811_v11 = vand.u32 127, %v6596_v23  ;;  %v1027_v42 = vsub.f32 1.0, %v1009_v44 }
 0x1d5   :  { %1873 = vrot.lane.b32.xlu0 %v4456_v15, %s3404_s0  ;;  %6598 = vst [vmem:[#allocation37_spill] sm:$0xff] %v4823_v6  ;;  %6600 = vst [vmem:[#allocation39_spill] sm:$0xff] %v4843_v47 }
 0x1d6   :  { %v4766_v35 = vpop.permute.xlu1 %1861  ;;  %vm1887_vm3 = vcmp.lt.s32.totalorder %v4811_v11, 104  ;;  %vm1778_vm5 = vcmp.lt.s32.totalorder %v4811_v11, 105  ;;  %vm1669_vm6 = vcmp.lt.s32.totalorder %v4811_v11, 127  ;;  %vm1342_vm7 = vcmp.lt.s32.totalorder %v4811_v11, 24 }
 0x1d7   :  { %v4769_v16 = vpop.permute.xlu0 %1635  ;;  %v1902_v29 = vsel %vm1887_vm3, %v4547_v37, %v4661_v4  ;;  %vm1560_vm8 = vcmp.lt.s32.totalorder %v4811_v11, 1  ;;  %vm1233_vm9 = vcmp.lt.s32.totalorder %v4811_v11, 25  ;;  %vm1451_vm10 = vcmp.lt.s32.totalorder %v4811_v11, 23 }
 0x1d8   :  { %6591 = vst [vmem:[#allocation31_spill] sm:$0xff] %v4769_v16  ;;  %1546 = vrot.lane.b32.xlu1 %v4456_v15, %s3407_s23  ;;  %vm1996_vm11 = vcmp.lt.s32.totalorder %v4811_v11, 103  ;;  %v2555_v11 = vld [vmem:[%s6486_s7 + $0x1f8] sm:$0xff] }
 0x1d9   :  { %1764 = vrot.lane.b32.xlu0 %v4456_v15, %s3405_s21 }
 0x1da   :  { %v4780_v53 = vpop.permute.xlu1 %1752 }
 0x1db   :  { %v4782_v10 = vpop.permute.xlu0 %1526 }
 0x1dc   :  { %1437 = vrot.lane.b32.xlu1 %v4456_v15, %s3409_s25 }
 0x1dd   :  { %1655 = vrot.lane.b32.xlu0 %v4456_v15, %s3406_s22 }
 0x1de   :  { %v4802_v24 = vpop.permute.xlu1 %1643 }
 0x1df   :  { %v4808_v63 = vpop.permute.xlu0 %1417 }
 0x1e0   :  { %6595 = vst [vmem:[#allocation35_spill] sm:$0xff] %v4808_v63  ;;  %1328 = vrot.lane.b32.xlu1 %v4456_v15, %s3410_s26 }
 0x1e1   :  { %1881 = vrot.lane.b32.xlu0 %v4806_v43, %s3404_s0 }
 0x1e2   :  { %v4821_v13 = vpop.permute.xlu1 %1970 }
 0x1e3   :  { %6597 = vst [vmem:[#allocation36_spill] sm:$0xff] %v4821_v13  ;;  %v4830_v17 = vpop.permute.xlu0 %1308 }
 0x1e4   :  { %6599 = vst [vmem:[#allocation38_spill] sm:$0xff] %v4830_v17  ;;  %1217 = vrot.lane.b32.xlu1 %v4456_v15, %s3411_s27  ;;  %v1900_v17 = vsel %vm1887_vm3, %v4661_v4, %v4550_v56 }
 0x1e5   :  { %1558 = vrot.lane.b32.xlu0 %v4823_v6, %s3407_s23  ;;  %v1943_v36 = vmul.f32 %v1913_v52, %v1900_v17 }
 0x1e6   :  { %v1858_v23 = vpop.permute.xlu1 %1857 }
 0x1e7   :  { %v4853_v63 = vpop.permute.xlu0 %1197  ;;  %v1901_v7 = vsel %vm1887_vm3, %v1858_v23, %v4766_v35  ;;  %v1903_v46 = vsel %vm1887_vm3, %v4748_v57, %v1858_v23  ;;  %v1942_v57 = vmul.f32 %v1909_v20, %v1902_v29  ;;  %v1804_v29 = vrot.slane %v4835_v0, %v4557_v21 }
 0x1e8   :  { %6601 = vst [vmem:[#allocation40_spill] sm:$0xff] %v4853_v63  ;;  %v1951_v44 = vmul.f32 %v1909_v20, %v1903_v46  ;;  %1556 = vrot.lane.b32.xlu1 %v4843_v47, %s3407_s23  ;;  %v1952_v13 = vmul.f32 %v1913_v52, %v1901_v7  ;;  %v667_v63 = vsel %vm649_vm4, -1.0, %v6563_v25  ;;  %v1800_v46 = vrot.slane %v4828_v32, %v4557_v21 }
 0x1e9   :  { %1449 = vrot.lane.b32.xlu0 %v4823_v6, %s3409_s25  ;;  %v1045_v23 = vmul.f32 %v1027_v42, %v667_v63  ;;  %v1063_v63 = vmul.f32 0.5, %v4589_v26 }
 0x1ea   :  { %2091 = vmatprep.subr.mxu1 %v1952_v13  ;;  %v4870_v38 = vpop.permute.xlu1 %1530 }
 0x1eb   :  { %v4872_v34 = vpop.permute.xlu0 %1962  ;;  %2092 = vmatpush1.msra.mxu1 %v1951_v44  ;;  %v1081_v25 = vadd.f32 1.0, %v1045_v23  ;;  %v1791_v23 = vsel %vm1778_vm5, %v4674_v5, %v4566_v22 }
 0x1ec   :  { %6602 = vst [vmem:[#allocation41_spill] sm:$0xff] %v4872_v34  ;;  %1447 = vrot.lane.b32.xlu1 %v4843_v47, %s3409_s25  ;;  %2093 = vmatprep.subr.mxu1 %v1943_v36  ;;  %v1695_v34 = vrot.slane %v4835_v0, %v4354_v58 }
 0x1ed   :  { %1340 = vrot.lane.b32.xlu0 %v4823_v6, %s3410_s26  ;;  %2094 = vmatpush1.msra.mxu1 %v1942_v57  ;;  %v1099_v36 = vmul.f32 %v1081_v25, %v1063_v63  ;;  %v1793_v25 = vsel %vm1778_vm5, %v4562_v59, %v4674_v5  ;;  %v1691_v59 = vrot.slane %v4828_v32, %v4354_v58 }
 0x1ee   :  { %v4878_v4 = vpop.permute.xlu1 %1421  ;;  %v1833_v5 = vmul.f32 %v1800_v46, %v1793_v25 }
 0x1ef   :  { %v4880_v13 = vpop.permute.xlu0 %1534  ;;  %v4898_v52 = vmul.f32 %v4795_v27, %v1099_v36 }
 0x1f0   :  { %1338 = vrot.lane.b32.xlu1 %v4843_v47, %s3410_s26 }
 0x1f1   :  { %1229 = vrot.lane.b32.xlu0 %v4823_v6, %s3411_s27  ;;  %6603 = vst [vmem:[#allocation42_spill] sm:$0xff] %v4898_v52 }
 0x1f2   :  { %v4887_v17 = vpop.permute.xlu1 %1312 }
 0x1f3   :  { %v4889_v20 = vpop.permute.xlu0 %1425 }
 0x1f4   :  { %1227 = vrot.lane.b32.xlu1 %v4843_v47, %s3411_s27 }
 0x1f5   :  { %1211 = vrot.lane.b32.xlu0 %v4584_v50, %s3411_s27 }
 0x1f6   :  { %v4895_v57 = vpop.permute.xlu1 %1201 }
 0x1f7   :  { %v4900_v26 = vpop.permute.xlu0 %1316 }
 0x1f8   :  { %1215 = vrot.lane.b32.xlu1 %v4399_v60, %s3411_s27 }
 0x1f9   :  { %1879 = vrot.lane.b32.xlu0 %v4898_v52, %s3404_s0 }
 0x1fa   :  { %v4906_v42 = vpop.permute.xlu1 %1865 }
 0x1fb   :  { %v4908_v7 = vpop.permute.xlu0 %1205 }
 0x1fc   :  { %1883 = vrot.lane.b32.xlu1 %v4843_v47, %s3404_s0 }
 0x1fd   :  { %1982 = vrot.lane.b32.xlu0 %v4456_v15, %s3408_s24 }
 0x1fe   :  { %v4915_v27 = vpop.permute.xlu1 %1538 }
 0x1ff   :  { %v1749_v44 = vpop.permute.xlu0 %1748 }
 0x200   :  { %v1792_v63 = vsel %vm1778_vm5, %v1749_v44, %v4780_v53  ;;  %v1794_v36 = vsel %vm1778_vm5, %v4758_v48, %v1749_v44  ;;  %1986 = vrot.lane.b32.xlu1 %v4710_v40, %s3408_s24  ;;  %v1834_v48 = vmul.f32 %v1804_v29, %v1791_v23 }
 0x201   :  { %v1842_v37 = vmul.f32 %v1800_v46, %v1794_v36  ;;  %v1843_v50 = vmul.f32 %v1804_v29, %v1792_v63  ;;  %1772 = vrot.lane.b32.xlu0 %v4806_v43, %s3405_s21  ;;  %v1682_v63 = vsel %vm1669_vm6, %v4685_v12, %v4591_v1 }
 0x202   :  { %v4940_v15 = vpop.permute.xlu1 %1429 }
 0x203   :  { %v1640_v44 = vpop.permute.xlu0 %1639  ;;  %2095 = vmatprep.subr.mxu1 %v1843_v50  ;;  %v1684_v50 = vsel %vm1669_vm6, %v4587_v28, %v4685_v12  ;;  %v1725_v12 = vmul.f32 %v1695_v34, %v1682_v63  ;;  %v4998_v63 = vrot.slane %v4835_v0, %v4296_v18 }
 0x204   :  { %v1683_v36 = vsel %vm1669_vm6, %v1640_v44, %v4802_v24  ;;  %v1685_v46 = vsel %vm1669_vm6, %v4769_v16, %v1640_v44  ;;  %2096 = vmatpush1.msra.mxu1 %v1842_v37  ;;  %1984 = vrot.lane.b32.xlu1 %v4598_v49, %s3408_s24 }
 0x205   :  { %v1733_v29 = vmul.f32 %v1691_v59, %v1685_v46  ;;  %v1734_v23 = vmul.f32 %v1695_v34, %v1683_v36  ;;  %1980 = vrot.lane.b32.xlu0 %v4399_v60, %s3408_s24  ;;  %2097 = vmatprep.subr.mxu1 %v1834_v48  ;;  %v1724_v36 = vmul.f32 %v1691_v59, %v1684_v50 }
 0x206   :  { %2098 = vmatpush1.msra.mxu1 %v1833_v5  ;;  %v4965_v25 = vpop.permute.xlu1 %1320  ;;  %v1576_v48 = vsel %vm1560_vm8, %v4782_v10, %v4870_v38 }
 0x207   :  { %v4967_v37 = vpop.permute.xlu0 %1966  ;;  %2099 = vmatprep.subr.mxu1 %v1734_v23  ;;  %v4973_v44 = vsel %vm1342_vm7, %v4900_v26, %v4965_v25 }
 0x208   :  { %2100 = vmatpush1.msra.mxu1 %v1733_v29  ;;  %1774 = vrot.lane.b32.xlu1 %v4843_v47, %s3405_s21 }
 0x209   :  { %1770 = vrot.lane.b32.xlu0 %v4898_v52, %s3405_s21  ;;  %2101 = vmatprep.subr.mxu1 %v1725_v12 }
 0x20a   :  { %2102 = vmatpush1.msra.mxu1 %v1724_v36  ;;  %v4985_v34 = vpop.permute.xlu1 %1209 }
 0x20b   :  { %v4987_v59 = vpop.permute.xlu0 %1756  ;;  %2103 = vmatprep.subr.mxu1 %v4461_v51  ;;  %v4994_v5 = vsel %vm1233_vm9, %v4908_v7, %v4985_v34  ;;  %v1625_v51 = vmul.f32 %v4998_v63, %v1576_v48 }
 0x20c   :  { %2104 = vmatpush1.msra.mxu1 %v4382_v45  ;;  %1665 = vrot.lane.b32.xlu1 %v4843_v47, %s3406_s22 }
 0x20d   :  { %1663 = vrot.lane.b32.xlu0 %v4806_v43, %s3406_s22  ;;  %2105 = vmatprep.subr.mxu1 %v4263_v8 }
 0x20e   :  { %2106 = vmatpush1.msra.mxu1 %v4142_v61  ;;  %v1868_v46 = vpop.permute.xlu1 %1867 }
 0x20f   :  { %v5008_v50 = vpop.permute.xlu0 %1647  ;;  %2107 = vmatprep.subr.mxu1 %v1625_v51 }
 0x210   :  { %1554 = vrot.lane.b32.xlu1 %v4806_v43, %s3407_s23 }
 0x211   :  { %1661 = vrot.lane.b32.xlu0 %v4898_v52, %s3406_s22 }
 0x212   :  { %v5014_v45 = vpop.permute.xlu1 %1875 }
 0x213   :  { %6604 = vst [vmem:[#allocation43_spill] sm:$0xff] %v5014_v45  ;;  %v5016_v29 = vpop.permute.xlu0 %1974 }
 0x214   :  { %1552 = vrot.lane.b32.xlu1 %v4898_v52, %s3407_s23 }
 0x215   :  { %1550 = vrot.lane.b32.xlu0 %v4710_v40, %s3407_s23 }
 0x216   :  { %v5022_v61 = vpop.permute.xlu1 %1649 }
 0x217   :  { %v1759_v8 = vpop.permute.xlu0 %1758 }
 0x218   :  { %1445 = vrot.lane.b32.xlu1 %v4806_v43, %s3409_s25 }
 0x219   :  { %1548 = vrot.lane.b32.xlu0 %v4598_v49, %s3407_s23 }
 0x21a   :  { %v5028_v23 = vpop.permute.xlu1 %1766 }
 0x21b   :  { %6605 = vst [vmem:[#allocation44_spill] sm:$0xff] %v5028_v23  ;;  %v5030_v12 = vpop.permute.xlu0 %1540 }
 0x21c   :  { %6606 = vst [vmem:[#allocation45_spill] sm:$0xff] %v5030_v12  ;;  %1885 = vrot.lane.b32.xlu1 %v4823_v6, %s3404_s0 }
 0x21d   :  { %1441 = vrot.lane.b32.xlu0 %v4710_v40, %s3409_s25 }
 0x21e   :  { %v5036_v36 = vpop.permute.xlu1 %1657 }
 0x21f   :  { %6607 = vst [vmem:[#allocation46_spill] sm:$0xff] %v5036_v36  ;;  %v5038_v48 = vpop.permute.xlu0 %1431 }
 0x220   :  { %6608 = vst [vmem:[#allocation47_spill] sm:$0xff] %v5038_v48  ;;  %1776 = vrot.lane.b32.xlu1 %v4823_v6, %s3405_s21 }
 0x221   :  { %1439 = vrot.lane.b32.xlu0 %v4598_v49, %s3409_s25 }
 0x222   :  { %v5044_v51 = vpop.permute.xlu1 %1976 }
 0x223   :  { %v5046_v28 = vpop.permute.xlu0 %1322 }
 0x224   :  { %6609 = vst [vmem:[#allocation48_spill] sm:$0xff] %v5046_v28  ;;  %1667 = vrot.lane.b32.xlu1 %v4823_v6, %s3406_s22 }
 0x225   :  { %1332 = vrot.lane.b32.xlu0 %v4710_v40, %s3410_s26 }
 0x226   :  { %v5052_v16 = vpop.permute.xlu1 %1544 }
 0x227   :  { %6610 = vst [vmem:[#allocation49_spill] sm:$0xff] %v5052_v16  ;;  %v5054_v60 = vpop.permute.xlu0 %1871 }
 0x228   :  { %6611 = vst [vmem:[#allocation50_spill] sm:$0xff] %v5054_v60  ;;  %v5059_v48 = vsel %vm1887_vm3, %v1868_v46, %v5054_v60  ;;  %1443 = vrot.lane.b32.xlu1 %v4898_v52, %s3409_s25 }
 0x229   :  { %6612 = vst [vmem:[#allocation51_spill] sm:$0xff] %v5059_v48  ;;  %1330 = vrot.lane.b32.xlu0 %v4598_v49, %s3410_s26  ;;  %v1896_v48 = vsel %vm1887_vm3, %v4715_v14, %v1868_v46 }
 0x22a   :  { %v5065_v28 = vpop.permute.xlu1 %1435 }
 0x22b   :  { %6613 = vst [vmem:[#allocation52_spill] sm:$0xff] %v5065_v28  ;;  %v5067_v12 = vpop.permute.xlu0 %1762 }
 0x22c   :  { %6614 = vst [vmem:[#allocation53_spill] sm:$0xff] %v5067_v12  ;;  %v5072_v16 = vsel %vm1778_vm5, %v1759_v8, %v5067_v12  ;;  %1336 = vrot.lane.b32.xlu1 %v4806_v43, %s3410_s26 }
 0x22d   :  { %6615 = vst [vmem:[#allocation54_spill] sm:$0xff] %v5072_v16  ;;  %1221 = vrot.lane.b32.xlu0 %v4710_v40, %s3411_s27  ;;  %v5095_v40 = vld [vmem:[%s6482_s2 + $0x18] sm:$0xff]  ;;  %v5102_v16 = vld [vmem:[%s6482_s2 + $0x10] sm:$0xff] }
 0x22e   :  { %v5078_v36 = vpop.permute.xlu1 %1326  ;;  %v1917_v12 = vrot.slane %v5102_v16, %v4774_v62  ;;  %v1808_v46 = vrot.slane %v5102_v16, %v4557_v21 }
 0x22f   :  { %6616 = vst [vmem:[#allocation55_spill] sm:$0xff] %v5078_v36  ;;  %v5080_v23 = vpop.permute.xlu0 %1653 }
 0x230   :  { %6617 = vst [vmem:[#allocation56_spill] sm:$0xff] %v5080_v23  ;;  %v5086_v28 = vsel %vm1669_vm6, %v5022_v61, %v5080_v23  ;;  %1334 = vrot.lane.b32.xlu1 %v4898_v52, %s3410_s26 }
 0x231   :  { %6618 = vst [vmem:[#allocation57_spill] sm:$0xff] %v5086_v28  ;;  %1219 = vrot.lane.b32.xlu0 %v4598_v49, %s3411_s27  ;;  %v1899_v28 = vsel %vm1887_vm3, %v4766_v35, %v4906_v42  ;;  %v1921_v49 = vrot.slane %v5095_v40, %v4774_v62  ;;  %v1898_v35 = vsel %vm1887_vm3, %v4550_v56, %v4715_v14 }
 0x232   :  { %v5097_v36 = vpop.permute.xlu1 %1760  ;;  %v1953_v62 = vmul.f32 %v1917_v12, %v1899_v28  ;;  %v1789_v56 = vsel %vm1778_vm5, %v4566_v22, %v4712_v54  ;;  %v1812_v28 = vrot.slane %v5095_v40, %v4557_v21 }
 0x233   :  { %6619 = vst [vmem:[#allocation58_spill] sm:$0xff] %v5097_v36  ;;  %v5110_v23 = vpop.permute.xlu0 %1869  ;;  %v1945_v14 = vmul.f32 %v1921_v49, %v1896_v48 }
 0x234   :  { %6620 = vst [vmem:[#allocation59_spill] sm:$0xff] %v5110_v23  ;;  %v1897_v60 = vsel %vm1887_vm3, %v4906_v42, %v5110_v23  ;;  %1225 = vrot.lane.b32.xlu1 %v4806_v43, %s3411_s27  ;;  %v1788_v42 = vsel %vm1778_vm5, %v4987_v59, %v5097_v36  ;;  %v1944_v36 = vmul.f32 %v1917_v12, %v1898_v35 }
 0x235   :  { %v1954_v45 = vmul.f32 %v1921_v49, %v1897_v60  ;;  %1990 = vrot.lane.b32.xlu0 %v4806_v43, %s3408_s24  ;;  %v1790_v60 = vsel %vm1778_vm5, %v4780_v53, %v4987_v59  ;;  %v1845_v49 = vmul.f32 %v1812_v28, %v1788_v42  ;;  %v1703_v59 = vrot.slane %v5095_v40, %v4354_v58 }
 0x236   :  { %v5135_v23 = vpop.permute.xlu1 %1877  ;;  %v1844_v53 = vmul.f32 %v1808_v46, %v1790_v60  ;;  %v1681_v12 = vsel %vm1669_vm6, %v4802_v24, %v5008_v50  ;;  %v1678_v42 = vsel %vm1669_vm6, %v4726_v19, %v5022_v61 }
 0x237   :  { %6621 = vst [vmem:[#allocation60_spill] sm:$0xff] %v5135_v23  ;;  %v5147_v43 = vpop.permute.xlu0 %1542  ;;  %2168 = vmatprep.subr.mxu0 %v1954_v45  ;;  %v1787_v23 = vsel %vm1778_vm5, %v4712_v54, %v1759_v8  ;;  %v1699_v54 = vrot.slane %v5102_v16, %v4354_v58  ;;  %v1835_v8 = vmul.f32 %v1808_v46, %v1789_v56  ;;  %v3043_v56 = vld [vmem:[%s6484_s9] sm:$0xff] }
 0x238   :  { %v5156_v22 = vsel %vm1560_vm8, %v4915_v27, %v5147_v43  ;;  %2169 = vmatpush1.msra.mxu0 %v1953_v62  ;;  %1223 = vrot.lane.b32.xlu1 %v4898_v52, %s3411_s27  ;;  %v2073_v62 = vld [vmem:[%s6483_s6] sm:$0xff]  ;;  %v1836_v48 = vmul.f32 %v1812_v28, %v1787_v23  ;;  %v1727_v60 = vmul.f32 %v1703_v59, %v1678_v42 }
 0x239   :  { %1988 = vrot.lane.b32.xlu0 %v4898_v52, %s3408_s24  ;;  %2170 = vmatprep.subr.mxu0 %v1945_v14  ;;  %v1735_v23 = vmul.f32 %v1699_v54, %v1681_v12  ;;  %v3044_v12 = vld [vmem:[%s6484_s9 + $0x8] sm:$0xff] }
 0x23a   :  { %2171 = vmatpush1.msra.mxu0 %v1944_v36  ;;  %v5167_v45 = vpop.permute.xlu1 %1651 }
 0x23b   :  { %v5176_v35 = vpop.permute.xlu0 %1433  ;;  %2172 = vmatprep.subr.mxu0 %v1845_v49  ;;  %v1679_v36 = vsel %vm1669_vm6, %v5008_v50, %v5167_v45  ;;  %v1680_v50 = vsel %vm1669_vm6, %v4591_v1, %v4726_v19  ;;  %v2074_v19 = vld [vmem:[%s6483_s6 + $0x8] sm:$0xff]  ;;  %v1572_v49 = vsel %vm1560_vm8, %v4880_v13, %v4915_v27  ;;  %v1590_v27 = vrot.slane %v5102_v16, %v4296_v18 }
 0x23c   :  { %v5190_v46 = vsel %vm1451_vm10, %v4940_v15, %v5176_v35  ;;  %v1736_v24 = vmul.f32 %v1703_v59, %v1679_v36  ;;  %2173 = vmatpush1.msra.mxu0 %v1844_v53  ;;  %1994 = vrot.lane.b32.xlu1 %v4823_v6, %s3408_s24  ;;  %v1726_v28 = vmul.f32 %v1699_v54, %v1680_v50 }
 0x23d   :  { %2077 = vperm.xlu0 %3323, %v2073_v62   ;;  %2174 = vmatprep.subr.mxu0 %v1836_v48  ;;  %v1574_v53 = vsel %vm1560_vm8, %v4870_v38, %v4880_v13  ;;  %v1594_v59 = vrot.slane %v5095_v40, %v4296_v18 }
 0x23e   :  { %2175 = vmatpush1.msra.mxu0 %v1835_v8  ;;  %v5198_v61 = vpop.permute.xlu1 %1768  ;;  %v1571_v8 = vsel %vm1560_vm8, %v4617_v31, %v4722_v2  ;;  %v1626_v48 = vmul.f32 %v1590_v27, %v1574_v53 }
 0x23f   :  { %v5203_v14 = vpop.permute.xlu0 %1324  ;;  %2176 = vmatprep.subr.mxu0 %v1736_v24  ;;  %v1627_v13 = vmul.f32 %v1594_v59, %v1572_v49  ;;  %v1618_v42 = vmul.f32 %v1594_v59, %v1571_v8  ;;  %v1356_v49 = vsel %vm1342_vm7, %v4887_v17, %v4900_v26  ;;  %v6627_v26 = vld [vmem:[#allocation22_spill] sm:$0xff] }
 0x240   :  { %v5209_v1 = vsel %vm1342_vm7, %v4965_v25, %v5203_v14  ;;  %2177 = vmatpush1.msra.mxu0 %v1735_v23  ;;  %1992 = vrot.lane.b32.xlu1 %v4843_v47, %s3408_s24  ;;  %v3057_v25 = vld [vmem:[%s6485_s10] sm:$0xff] }
 0x241   :  { %3047 = vperm.xlu0 %3323, %v3043_v56   ;;  %2178 = vmatprep.subr.mxu0 %v1727_v60  ;;  %v3058_v60 = vld [vmem:[%s6485_s10 + $0x8] sm:$0xff] }
 0x242   :  { %2179 = vmatpush1.msra.mxu0 %v1726_v28  ;;  %v5220_v54 = vpop.permute.xlu1 %1659 }
 0x243   :  { %v5231_v62 = vpop.permute.xlu0 %1213  ;;  %2180 = vmatprep.subr.mxu0 %v4499_v30  ;;  %v1573_v30 = vsel %vm1560_vm8, %v4664_v33, %v4617_v31  ;;  %v1465_v31 = vsel %vm1451_vm10, %v4878_v4, %v4889_v20 }
 0x244   :  { %v5244_v38 = vsel %vm1233_vm9, %v4985_v34, %v5231_v62  ;;  %2181 = vmatpush1.msra.mxu0 %v4409_v9  ;;  %2082 = vperm.xlu1 %3324, %v2074_v19   ;;  %v1463_v9 = vsel %vm1451_vm10, %v4889_v20, %v4940_v15  ;;  %v1617_v24 = vmul.f32 %v1590_v27, %v1573_v30  ;;  %v6623_v20 = vld [vmem:[#allocation21_spill] sm:$0xff] }
 0x245   :  { %3061 = vperm.xlu0 %3323, %v3057_v25   ;;  %2182 = vmatprep.subr.mxu0 %v4339_v41  ;;  %v1485_v41 = vrot.slane %v5095_v40, %v4122_v3  ;;  %v1481_v15 = vrot.slane %v5102_v16, %v4122_v3  ;;  %v6624_v25 = vld [vmem:[#allocation3_spill] sm:$0xff] }
 0x246   :  { %2183 = vmatpush1.msra.mxu0 %v4147_v55  ;;  %v5260_v34 = vpop.permute.xlu1 %1978  ;;  %v6622_v55 = vld [vmem:[#allocation16_spill] sm:$0xff]  ;;  %v1376_v53 = vrot.slane %v5095_v40, %v6624_v25  ;;  %v1372_v30 = vrot.slane %v5102_v16, %v6624_v25 }
 0x247   :  { %v5268_v36 = vpop.permute.xlu0 %1873  ;;  %2184 = vmatprep.subr.mxu0 %v1627_v13  ;;  %v1462_v50 = vsel %vm1451_vm10, %v6622_v55, %v4733_v39  ;;  %v1464_v23 = vsel %vm1451_vm10, %v6623_v20, %v6622_v55  ;;  %v1518_v56 = vmul.f32 %v1485_v41, %v1463_v9  ;;  %v1517_v28 = vmul.f32 %v1481_v15, %v1465_v31  ;;  %v6625_v13 = vld [vmem:[#allocation27_spill] sm:$0xff] }
 0x248   :  { %2185 = vmatpush1.msra.mxu0 %v1626_v48  ;;  %3052 = vperm.xlu1 %3324, %v3044_v12   ;;  %v1509_v27 = vmul.f32 %v1485_v41, %v1462_v50  ;;  %v1508_v8 = vmul.f32 %v1481_v15, %v1464_v23  ;;  %v6626_v12 = vld [vmem:[#allocation18_spill] sm:$0xff]  ;;  %v1409_v31 = vmul.f32 %v1376_v53, %v4973_v44 }
 0x249   :  { %2186 = vmatprep.subr.mxu0 %v1618_v42  ;;  %v1353_v48 = vsel %vm1342_vm7, %v6626_v12, %v6625_v13  ;;  %v1355_v9 = vsel %vm1342_vm7, %v6627_v26, %v6626_v12  ;;  %v1408_v41 = vmul.f32 %v1372_v30, %v1356_v49  ;;  %v6628_v15 = vld [vmem:[#allocation2_spill] sm:$0xff] }
 0x24a   :  { %2187 = vmatpush1.msra.mxu0 %v1617_v24  ;;  %v5283_v19 = vpop.permute.xlu1 %1546  ;;  %v1247_v24 = vsel %vm1233_vm9, %v4895_v57, %v4908_v7  ;;  %v1267_v55 = vrot.slane %v5095_v40, %v6628_v15  ;;  %v1400_v23 = vmul.f32 %v1376_v53, %v1353_v48  ;;  %v1263_v44 = vrot.slane %v5102_v16, %v6628_v15 }
 0x24b   :  { %v5291_v59 = vpop.permute.xlu0 %1764  ;;  %2188 = vmatprep.subr.mxu0 %v1518_v56  ;;  %v1399_v56 = vmul.f32 %v1372_v30, %v1355_v9  ;;  %v2006_v16 = vsel %vm1996_vm11, %v5016_v29, %v5260_v34  ;;  %v6632_v30 = vld [vmem:[#allocation36_spill] sm:$0xff] }
 0x24c   :  { %2189 = vmatpush1.msra.mxu0 %v1517_v28  ;;  %3066 = vperm.xlu1 %3324, %v3058_v60   ;;  %v6629_v60 = vld [vmem:[#allocation29_spill] sm:$0xff]  ;;  %v6630_v28 = vld [vmem:[#allocation20_spill] sm:$0xff]  ;;  %v1300_v40 = vmul.f32 %v1267_v55, %v4994_v5  ;;  %v1299_v53 = vmul.f32 %v1263_v44, %v1247_v24  ;;  %v2008_v12 = vsel %vm1996_vm11, %v6632_v30, %v5016_v29 }
 0x24d   :  { %2190 = vmatprep.subr.mxu0 %v1509_v27  ;;  %v1244_v49 = vsel %vm1233_vm9, %v6630_v28, %v6629_v60  ;;  %v6631_v27 = vld [vmem:[#allocation24_spill] sm:$0xff] }
 0x24e   :  { %2191 = vmatpush1.msra.mxu0 %v1508_v8  ;;  %v5304_v42 = vpop.permute.xlu1 %1437  ;;  %v1246_v7 = vsel %vm1233_vm9, %v6631_v27, %v6630_v28  ;;  %v1291_v9 = vmul.f32 %v1267_v55, %v1244_v49  ;;  %v3090_v55 = vld [vmem:[%s6482_s2 + $0x58] ss:$0 sm:$0xff] }
 0x24f   :  { %v5312_v50 = vpop.permute.xlu0 %1655  ;;  %2192 = vmatprep.subr.mxu0 %v1409_v31  ;;  %v1290_v5 = vmul.f32 %v1263_v44, %v1246_v7  ;;  %v3091_v31 = vld [vmem:[%s6482_s2 + $0x60] ss:$0 sm:$0xff]  ;;  %v1582_v44 = vrot.slane %v4828_v32, %v4296_v18  ;;  %v2062_v28 = vmul.f32 %v3090_v55, %v2008_v12  ;;  %v6635_v7 = vld [vmem:[#allocation12_spill] sm:$0xff] }
 0x250   :  { %2193 = vmatpush1.msra.mxu0 %v1408_v41  ;;  %v6633_v41 = vld [vmem:[#allocation26_spill] sm:$0xff] }
 0x251   :  { %2194 = vmatprep.subr.mxu0 %v1400_v23  ;;  %v2005_v24 = vsel %vm1996_vm11, %v6633_v41, %v5044_v51  ;;  %v6634_v23 = vld [vmem:[#allocation13_spill] sm:$0xff]  ;;  %v5369_v12 = vld [vmem:[%s6481_s5] sm:$0xff] }
 0x252   :  { %2195 = vmatpush1.msra.mxu0 %v1399_v56  ;;  %v5330_v8 = vpop.permute.xlu1 %1328  ;;  %v2007_v29 = vsel %vm1996_vm11, %v6634_v23, %v6633_v41  ;;  %v2063_v56 = vmul.f32 %v3091_v31, %v2006_v16 }
 0x253   :  { %v5336_v48 = vpop.permute.xlu0 %1881  ;;  %2196 = vmatprep.subr.mxu0 %v1300_v40  ;;  %v1575_v40 = vsel %vm1560_vm8, %v6635_v7, %v4664_v33  ;;  %v2053_v47 = vmul.f32 %v3090_v55, %v2007_v29  ;;  %v6636_v33 = vld [vmem:[#allocation35_spill] sm:$0xff] }
 0x254   :  { %2197 = vmatpush1.msra.mxu0 %v1299_v53  ;;  %v2054_v53 = vmul.f32 %v3091_v31, %v2005_v24  ;;  %v1473_v31 = vrot.slane %v4828_v32, %v4122_v3 }
 0x255   :  { %2198 = vmatprep.subr.mxu0 %v1291_v9 }
 0x256   :  { %2199 = vmatpush1.msra.mxu0 %v1290_v5  ;;  %v5354_v49 = vpop.permute.xlu1 %1217  ;;  %v1467_v5 = vsel %vm1451_vm10, %v6636_v33, %v4878_v4  ;;  %v5392_v4 = vld [vmem:[%s6481_s5 + $0x18] sm:$0xff] }
 0x257   :  { %v5360_v41 = vpop.permute.xlu0 %1558  ;;  %2228 = vmatprep.subr.mxu0 %v2063_v56 }
 0x258   :  { %v1578_v16 = vsel %vm1560_vm8, %v5360_v41, %v4782_v10  ;;  %2229 = vmatpush2.msra.mxu0 %v2062_v28  ;;  %v1616_v10 = vmul.f32 %v4998_v63, %v1575_v40  ;;  %v6639_v63 = vld [vmem:[#allocation14_spill] sm:$0xff] }
 0x259   :  { %v1624_v9 = vmul.f32 %v1582_v44, %v1578_v16  ;;  %2230 = vmatprep.subr.mxu0 %v2054_v53  ;;  %v1466_v56 = vsel %vm1451_vm10, %v6639_v63, %v6623_v20  ;;  %v6640_v53 = vld [vmem:[#allocation38_spill] sm:$0xff]  ;;  %v1364_v20 = vrot.slane %v4828_v32, %v6624_v25 }
 0x25a   :  { %2231 = vmatpush2.msra.mxu0 %v2053_v47  ;;  %v5377_v24 = vpop.permute.xlu1 %1556  ;;  %v1477_v47 = vrot.slane %v4835_v0, %v4122_v3  ;;  %v1358_v16 = vsel %vm1342_vm7, %v6640_v53, %v4887_v17 }
 0x25b   :  { %6637 = vst [vmem:[#allocation16_spill] sm:$0xff] %v5377_v24  ;;  %v5380_v29 = vpop.permute.xlu0 %1449  ;;  %2108 = vmatpush1.msra.mxu1 %v1624_v9  ;;  %2233 = vmatmul.mubr.f32.vlgmr.msra.gmra.mxu0 %v5369_v12  ;;  %v1577_v55 = vsel %vm1560_vm8, %v5377_v24, %v6635_v7 }
 0x25c   :  { %6638 = vst [vmem:[#allocation21_spill] sm:$0xff] %v5380_v29  ;;  %v1469_v28 = vsel %vm1451_vm10, %v5380_v29, %v6636_v33  ;;  %v1615_v40 = vmul.f32 %v1582_v44, %v1577_v55  ;;  %2109 = vmatprep.subr.mxu1 %v1616_v10  ;;  %3100 = vmatprep.mubr.msk.f32.mxu0 %vm216_vm0, %v5392_v4  ;;  %v5415_v44 = vld [vmem:[%s6481_s5 + $0x10] sm:$0xff]  ;;  %v6643_v55 = vld [vmem:[#allocation15_spill] sm:$0xff] }
 0x25d   :  { %v1516_v7 = vmul.f32 %v1477_v47, %v1467_v5  ;;  %v1515_v9 = vmul.f32 %v1473_v31, %v1469_v28  ;;  %v1507_v17 = vmul.f32 %v1477_v47, %v1466_v56  ;;  %v1368_v10 = vrot.slane %v4835_v0, %v6624_v25  ;;  %v6645_v56 = vld [vmem:[#allocation40_spill] sm:$0xff] }
 0x25e   :  { %2110 = vmatpush1.msra.mxu1 %v1615_v40  ;;  %v5410_v24 = vpop.permute.xlu1 %1447  ;;  %v1357_v28 = vsel %vm1342_vm7, %v6643_v55, %v6627_v26  ;;  %v1255_v26 = vrot.slane %v4828_v32, %v6628_v15 }
 0x25f   :  { %6641 = vst [vmem:[#allocation3_spill] sm:$0xff] %v5410_v24  ;;  %v5417_v33 = vpop.permute.xlu0 %1340  ;;  %v1468_v5 = vsel %vm1451_vm10, %v5410_v24, %v6639_v63  ;;  %2111 = vmatprep.subr.mxu1 %v1516_v7  ;;  %2239 = vmatmul.mubr.f32.gmra.mxu0 %v5415_v44  ;;  %v6644_v63 = vld [vmem:[#allocation33_spill] sm:$0xff]  ;;  %v1407_v47 = vmul.f32 %v1368_v10, %v1358_v16 }
 0x260   :  { %6642 = vst [vmem:[#allocation27_spill] sm:$0xff] %v5417_v33  ;;  %v1360_v40 = vsel %vm1342_vm7, %v5417_v33, %v6640_v53  ;;  %v1506_v29 = vmul.f32 %v1473_v31, %v1468_v5  ;;  %2112 = vmatpush1.msra.mxu1 %v1515_v9  ;;  %3103 = vmatprep.mubr.msk.f32.mxu0 %vm216_vm0, %v6644_v63 }
 0x261   :  { %2113 = vmatprep.subr.mxu1 %v1507_v17  ;;  %v1249_v7 = vsel %vm1233_vm9, %v6645_v56, %v4895_v57  ;;  %v1406_v24 = vmul.f32 %v1364_v20, %v1360_v40  ;;  %v1398_v16 = vmul.f32 %v1368_v10, %v1357_v28  ;;  %v1259_v9 = vrot.slane %v4835_v0, %v6628_v15  ;;  %v6648_v57 = vld [vmem:[#allocation17_spill] sm:$0xff] }
 0x262   :  { %2114 = vmatpush1.msra.mxu1 %v1506_v29  ;;  %v5442_v6 = vpop.permute.xlu1 %1338  ;;  %v1248_v32 = vsel %vm1233_vm9, %v6648_v57, %v6631_v27  ;;  %v2010_v10 = vsel %vm1996_vm11, %v4967_v37, %v6632_v30  ;;  %v6650_v27 = vld [vmem:[#allocation41_spill] sm:$0xff]  ;;  %v6651_v30 = vld [vmem:[#allocation23_spill] sm:$0xff] }
 0x263   :  { %6646 = vst [vmem:[#allocation18_spill] sm:$0xff] %v5442_v6  ;;  %v5444_v53 = vpop.permute.xlu0 %1229  ;;  %v1359_v31 = vsel %vm1342_vm7, %v5442_v6, %v6643_v55  ;;  %2115 = vmatprep.subr.mxu1 %v1407_v47  ;;  %v1298_v17 = vmul.f32 %v1259_v9, %v1249_v7  ;;  %v2012_v28 = vsel %vm1996_vm11, %v6650_v27, %v4967_v37  ;;  %v5486_v37 = vld [vmem:[%s6482_s2 + $0x28] sm:$0xff]  ;;  %v6657_v27 = vld [vmem:[#allocation50_spill] sm:$0xff] }
 0x264   :  { %6647 = vst [vmem:[#allocation22_spill] sm:$0xff] %v5444_v53  ;;  %v1251_v29 = vsel %vm1233_vm9, %v5444_v53, %v6645_v56  ;;  %v1397_v5 = vmul.f32 %v1364_v20, %v1359_v31  ;;  %2116 = vmatpush1.msra.mxu1 %v1406_v24  ;;  %v1289_v20 = vmul.f32 %v1259_v9, %v1248_v32  ;;  %v3089_v56 = vld [vmem:[%s6482_s2 + $0x50] ss:$0 sm:$0xff]  ;;  %v6652_v31 = vld [vmem:[#allocation19_spill] sm:$0xff] }
 0x265   :  { %2117 = vmatprep.subr.mxu1 %v1398_v16  ;;  %v1297_v0 = vmul.f32 %v1255_v26, %v1251_v29  ;;  %v2009_v47 = vsel %vm1996_vm11, %v6651_v30, %v6634_v23  ;;  %v2011_v16 = vsel %vm1996_vm11, %v6652_v31, %v6651_v30  ;;  %v3088_v23 = vld [vmem:[%s6482_s2 + $0x48] ss:$0 sm:$0xff]  ;;  %v2061_v9 = vmul.f32 %v3089_v56, %v2010_v10  ;;  %v6653_v32 = vld [vmem:[#allocation60_spill] sm:$0xff] }
 0x266   :  { %2118 = vmatpush1.msra.mxu1 %v1397_v5  ;;  %v5464_v55 = vpop.permute.xlu1 %1227  ;;  %v1893_v29 = vsel %vm1887_vm3, %v5268_v36, %v6653_v32  ;;  %v5504_v5 = vld [vmem:[%s6482_s2 + $0x20] sm:$0xff]  ;;  %v6655_v10 = vld [vmem:[#allocation59_spill] sm:$0xff]  ;;  %v2051_v30 = vmul.f32 %v3088_v23, %v2011_v16  ;;  %v1820_v16 = vrot.slane %v5486_v37, %v4557_v21  ;;  %v1493_v52 = vrot.slane %v5486_v37, %v4122_v3 }
 0x267   :  { %6649 = vst [vmem:[#allocation2_spill] sm:$0xff] %v5464_v55  ;;  %v5470_v40 = vpop.permute.xlu0 %1211  ;;  %v1250_v24 = vsel %vm1233_vm9, %v5464_v55, %v6648_v57  ;;  %2119 = vmatprep.subr.mxu1 %v1298_v17  ;;  %v2060_v57 = vmul.f32 %v3088_v23, %v2012_v28  ;;  %v6654_v17 = vld [vmem:[#allocation32_spill] sm:$0xff]  ;;  %v1895_v28 = vsel %vm1887_vm3, %v6655_v10, %v5268_v36  ;;  %v6656_v31 = vld [vmem:[#allocation43_spill] sm:$0xff]  ;;  %v6658_v23 = vld [vmem:[#allocation58_spill] sm:$0xff] }
 0x268   :  { %v1288_v7 = vmul.f32 %v1255_v26, %v1250_v24  ;;  %2120 = vmatpush1.msra.mxu1 %v1297_v0  ;;  %v1929_v0 = vrot.slane %v5486_v37, %v6654_v17  ;;  %v1892_v55 = vsel %vm1887_vm3, %v6657_v27, %v6656_v31  ;;  %v1784_v36 = vsel %vm1778_vm5, %v5291_v59, %v5198_v61 }
 0x269   :  { %2121 = vmatprep.subr.mxu1 %v1289_v20  ;;  %v2052_v20 = vmul.f32 %v3089_v56, %v2009_v47  ;;  %v1786_v27 = vsel %vm1778_vm5, %v6658_v23, %v5291_v59  ;;  %v1816_v10 = vrot.slane %v5504_v5, %v4557_v21  ;;  %v1847_v59 = vmul.f32 %v1820_v16, %v1784_v36 }
 0x26a   :  { %2122 = vmatpush1.msra.mxu1 %v1288_v7  ;;  %v5499_v26 = vpop.permute.xlu1 %1215  ;;  %v1925_v7 = vrot.slane %v5504_v5, %v6654_v17  ;;  %v1956_v53 = vmul.f32 %v1929_v0, %v1893_v29  ;;  %v1947_v56 = vmul.f32 %v1929_v0, %v1892_v55  ;;  %v6661_v55 = vld [vmem:[#allocation53_spill] sm:$0xff]  ;;  %v1711_v23 = vrot.slane %v5486_v37, %v4354_v58 }
 0x26b   :  { %v5512_v24 = vpop.permute.xlu0 %1879  ;;  %2151 = vmatprep.subr.mxu1 %v2061_v9 }
 0x26c   :  { %2152 = vmatpush2.msra.mxu1 %v2060_v57  ;;  %v1955_v6 = vmul.f32 %v1925_v7, %v1895_v28  ;;  %v6659_v57 = vld [vmem:[#allocation51_spill] sm:$0xff]  ;;  %v6660_v28 = vld [vmem:[#allocation44_spill] sm:$0xff] }
 0x26d   :  { %2153 = vmatprep.subr.mxu1 %v2052_v20  ;;  %v1946_v29 = vmul.f32 %v1925_v7, %v6659_v57  ;;  %v1783_v0 = vsel %vm1778_vm5, %v6661_v55, %v6660_v28  ;;  %v1846_v20 = vmul.f32 %v1816_v10, %v1786_v27  ;;  %v1707_v57 = vrot.slane %v5504_v5, %v4354_v58 }
 0x26e   :  { %2154 = vmatpush2.msra.mxu1 %v2051_v30  ;;  %v5524_v47 = vpop.permute.xlu1 %1883  ;;  %v1838_v7 = vmul.f32 %v1820_v16, %v1783_v0  ;;  %v6664_v16 = vld [vmem:[#allocation56_spill] sm:$0xff] }
 0x26f   :  { %v5532_v9 = vpop.permute.xlu0 %1982  ;;  %2156 = vmatmul.mubr.f32.vlgmr.msra.gmra.mxu1 %v5369_v12  ;;  %2245 = vmatprep.subr.mxu1 %v1956_v53  ;;  %v1675_v53 = vsel %vm1669_vm6, %v5312_v50, %v5220_v54 }
 0x270   :  { %2246 = vmatpush1.msra.mxu1 %v1955_v6  ;;  %3098 = vmatprep.mubr.msk.f32.mxu1 %vm216_vm0, %v5392_v4  ;;  %v1677_v6 = vsel %vm1669_vm6, %v5167_v45, %v5312_v50  ;;  %v1738_v45 = vmul.f32 %v1711_v23, %v1675_v53  ;;  %v1602_v53 = vrot.slane %v5486_v37, %v4296_v18 }
 0x271   :  { %2247 = vmatprep.subr.mxu1 %v1947_v56  ;;  %v6662_v56 = vld [vmem:[#allocation54_spill] sm:$0xff]  ;;  %v1737_v50 = vmul.f32 %v1707_v57, %v1677_v6  ;;  %v1598_v6 = vrot.slane %v5504_v5, %v4296_v18 }
 0x272   :  { %2248 = vmatpush1.msra.mxu1 %v1946_v29  ;;  %v5548_v30 = vpop.permute.xlu1 %1986  ;;  %v1837_v27 = vmul.f32 %v1816_v10, %v6662_v56  ;;  %v6663_v29 = vld [vmem:[#allocation46_spill] sm:$0xff]  ;;  %v6665_v56 = vld [vmem:[#allocation57_spill] sm:$0xff] }
 0x273   :  { %v5556_v36 = vpop.permute.xlu0 %1772  ;;  %2249 = vmatprep.subr.mxu1 %v1847_v59  ;;  %2162 = vmatmul.mubr.f32.gmra.mxu1 %v5415_v44  ;;  %v1674_v55 = vsel %vm1669_vm6, %v6664_v16, %v6663_v29  ;;  %v1728_v33 = vmul.f32 %v1707_v57, %v6665_v56  ;;  %v6668_v57 = vld [vmem:[#allocation45_spill] sm:$0xff] }
 0x274   :  { %2250 = vmatpush1.msra.mxu1 %v1846_v20  ;;  %3101 = vmatprep.mubr.msk.f32.mxu1 %vm216_vm0, %v6644_v63  ;;  %v1729_v59 = vmul.f32 %v1711_v23, %v1674_v55  ;;  %v1568_v20 = vsel %vm1560_vm8, %v5147_v43, %v5283_v19  ;;  %v6666_v23 = vld [vmem:[#allocation6_spill] sm:$0xff]  ;;  %v6669_v55 = vld [vmem:[#allocation5_spill] sm:$0xff]  ;;  %v1569_v43 = vsel %vm1560_vm8, %v4722_v2, %v6668_v57 }
 0x275   :  { %2251 = vmatprep.subr.mxu1 %v1838_v7  ;;  %v6671_v56 = vld [vmem:[#allocation9_spill] sm:$0xff]  ;;  %v1619_v2 = vmul.f32 %v1598_v6, %v1569_v43 }
 0x276   :  { %2252 = vmatpush1.msra.mxu1 %v1837_v27  ;;  %v5568_v0 = vpop.permute.xlu1 %1984  ;;  %v6667_v27 = vld [vmem:[#allocation49_spill] sm:$0xff] }
 0x277   :  { %v5570_v10 = vpop.permute.xlu0 %1980  ;;  %2253 = vmatprep.subr.mxu1 %v1738_v45  ;;  %v1567_v16 = vsel %vm1560_vm8, %v6668_v57, %v6667_v27  ;;  %v6670_v45 = vld [vmem:[#allocation4_spill] sm:$0xff]  ;;  %v6673_v57 = vld [vmem:[#allocation47_spill] sm:$0xff] }
 0x278   :  { %2254 = vmatpush1.msra.mxu1 %v1737_v50  ;;  %v1628_v50 = vmul.f32 %v1598_v6, %v5156_v22  ;;  %v1489_v22 = vrot.slane %v5504_v5, %v4122_v3  ;;  %v1350_v6 = vsel %vm1342_vm7, %v5203_v14, %v5330_v8 }
 0x279   :  { %2255 = vmatprep.subr.mxu1 %v1729_v59  ;;  %v1459_v59 = vsel %vm1451_vm10, %v5176_v35, %v5304_v42 }
 0x27a   :  { %2256 = vmatpush1.msra.mxu1 %v1728_v33  ;;  %v5577_v63 = vpop.permute.xlu1 %1774  ;;  %v1629_v33 = vmul.f32 %v1602_v53, %v1568_v20  ;;  %v6672_v20 = vld [vmem:[#allocation52_spill] sm:$0xff] }
 0x27b   :  { %v5581_v7 = vpop.permute.xlu0 %1770  ;;  %2257 = vmatprep.subr.mxu1 %v6666_v23  ;;  %v1458_v35 = vsel %vm1451_vm10, %v6673_v57, %v6672_v20 }
 0x27c   :  { %2258 = vmatpush1.msra.mxu1 %v6669_v55  ;;  %v1620_v55 = vmul.f32 %v1602_v53, %v1567_v16  ;;  %v1460_v53 = vsel %vm1451_vm10, %v4733_v39, %v6673_v57  ;;  %v1520_v16 = vmul.f32 %v1493_v52, %v1459_v59  ;;  %v1380_v59 = vrot.slane %v5504_v5, %v6624_v25 }
 0x27d   :  { %2259 = vmatprep.subr.mxu1 %v6670_v45  ;;  %v1519_v45 = vmul.f32 %v1489_v22, %v5190_v46  ;;  %v1510_v39 = vmul.f32 %v1489_v22, %v1460_v53  ;;  %v6674_v46 = vld [vmem:[#allocation55_spill] sm:$0xff]  ;;  %v1241_v53 = vsel %vm1233_vm9, %v5231_v62, %v5354_v49  ;;  %v1242_v62 = vsel %vm1233_vm9, %v6629_v60, %v5470_v40 }
 0x27e   :  { %2260 = vmatpush1.msra.mxu1 %v6671_v56  ;;  %v5602_v23 = vpop.permute.xlu1 %1665  ;;  %v1410_v22 = vmul.f32 %v1380_v59, %v5209_v1  ;;  %v1240_v1 = vsel %vm1233_vm9, %v5470_v40, %v5499_v26  ;;  %v2004_v40 = vsel %vm1996_vm11, %v5260_v34, %v5532_v9  ;;  %v5698_v34 = vld [vmem:[%s6482_s2 + $0x40] sm:$0xff] }
 0x27f   :  { %v5606_v27 = vpop.permute.xlu0 %1663  ;;  %2261 = vmatprep.subr.mxu1 %v1629_v33  ;;  %v1511_v33 = vmul.f32 %v1493_v52, %v1458_v35  ;;  %v1271_v35 = vrot.slane %v5504_v5, %v6628_v15 }
 0x280   :  { %2262 = vmatpush1.msra.mxu1 %v1628_v50  ;;  %v1384_v50 = vrot.slane %v5486_v37, %v6624_v25 }
 0x281   :  { %2263 = vmatprep.subr.mxu1 %v1620_v55  ;;  %v6675_v55 = vld [vmem:[#allocation48_spill] sm:$0xff]  ;;  %v1301_v5 = vmul.f32 %v1271_v35, %v5244_v38  ;;  %v3092_v38 = vld [vmem:[%s6482_s2 + $0x68] ss:$0 sm:$0xff] }
 0x282   :  { %2264 = vmatpush1.msra.mxu1 %v1619_v2  ;;  %v5623_v43 = vpop.permute.xlu1 %1554  ;;  %v1349_v57 = vsel %vm1342_vm7, %v6675_v55, %v6674_v46  ;;  %v1351_v52 = vsel %vm1342_vm7, %v6625_v13, %v6675_v55  ;;  %v1411_v14 = vmul.f32 %v1384_v50, %v1350_v6  ;;  %v1275_v2 = vrot.slane %v5486_v37, %v6628_v15  ;;  %v5685_v55 = vld [vmem:[%s6482_s2 + $0x38] sm:$0xff] }
 0x283   :  { %v5627_v56 = vpop.permute.xlu0 %1661  ;;  %2265 = vmatprep.subr.mxu1 %v1520_v16  ;;  %v1401_v6 = vmul.f32 %v1380_v59, %v1351_v52  ;;  %v1292_v52 = vmul.f32 %v1271_v35, %v1242_v62  ;;  %v1891_v35 = vsel %vm1887_vm3, %v6653_v32, %v5336_v48  ;;  %v1941_v62 = vrot.slane %v5698_v34, %v6654_v17 }
 0x284   :  { %2266 = vmatpush1.msra.mxu1 %v1519_v45  ;;  %v1402_v45 = vmul.f32 %v1384_v50, %v1349_v57  ;;  %v1302_v37 = vmul.f32 %v1275_v2, %v1241_v53  ;;  %v3093_v50 = vld [vmem:[%s6482_s2 + $0x70] ss:$0 sm:$0xff]  ;;  %v1293_v60 = vmul.f32 %v1275_v2, %v1240_v1  ;;  %v1890_v53 = vsel %vm1887_vm3, %v6656_v31, %v5512_v24 }
 0x285   :  { %2267 = vmatprep.subr.mxu1 %v1511_v33  ;;  %v5664_v33 = vld [vmem:[%s6482_s2 + $0x30] sm:$0xff] }
 0x286   :  { %2268 = vmatpush1.msra.mxu1 %v1510_v39  ;;  %v5648_v16 = vpop.permute.xlu1 %1552  ;;  %v2002_v39 = vsel %vm1996_vm11, %v5532_v9, %v5548_v30  ;;  %v1933_v2 = vrot.slane %v5664_v33, %v6654_v17 }
 0x287   :  { %v5650_v13 = vpop.permute.xlu0 %1550  ;;  %2269 = vmatprep.subr.mxu1 %v1411_v14  ;;  %v2001_v14 = vsel %vm1996_vm11, %v5570_v10, %v5568_v0  ;;  %v2065_v9 = vmul.f32 %v3093_v50, %v2002_v39  ;;  %v6676_v39 = vld [vmem:[#allocation28_spill] sm:$0xff] }
 0x288   :  { %2270 = vmatpush1.msra.mxu1 %v1410_v22  ;;  %v2003_v22 = vsel %vm1996_vm11, %v5044_v51, %v5570_v10  ;;  %v1888_v51 = vsel %vm1887_vm3, %v5512_v24, %v5524_v47  ;;  %v1824_v10 = vrot.slane %v5664_v33, %v4557_v21  ;;  %v2056_v32 = vmul.f32 %v3093_v50, %v2001_v14 }
 0x289   :  { %2271 = vmatprep.subr.mxu1 %v1402_v45  ;;  %v2064_v45 = vmul.f32 %v3092_v38, %v2004_v40  ;;  %v1957_v40 = vmul.f32 %v1933_v2, %v1891_v35  ;;  %v1828_v50 = vrot.slane %v5685_v55, %v4557_v21  ;;  %v1832_v14 = vrot.slane %v5698_v34, %v4557_v21 }
 0x28a   :  { %2272 = vmatpush1.msra.mxu1 %v1401_v6  ;;  %v5673_v59 = vpop.permute.xlu1 %1445  ;;  %v1937_v6 = vrot.slane %v5685_v55, %v6654_v17  ;;  %v1781_v21 = vsel %vm1778_vm5, %v6660_v28, %v5581_v7  ;;  %v6678_v28 = vmov 0.0  }
 0x28b   :  { %v5687_v57 = vpop.permute.xlu0 %1548  ;;  %2273 = vmatprep.subr.mxu1 %v1302_v37 }
 0x28c   :  { %2274 = vmatpush1.msra.mxu1 %v1301_v5  ;;  %v2055_v5 = vmul.f32 %v3092_v38, %v2003_v22  ;;  %v1949_v38 = vmul.f32 %v1937_v6, %v1888_v51 }
 0x28d   :  { %2275 = vmatprep.subr.mxu1 %v1293_v60 }
 0x28e   :  { %2276 = vmatpush1.msra.mxu1 %v1292_v52  ;;  %v1886_v1 = vpop.permute.xlu1 %1885  ;;  %v1948_v52 = vmul.f32 %v1933_v2, %v1890_v53  ;;  %v1715_v53 = vrot.slane %v5664_v33, %v4354_v58 }
 0x28f   :  { %v5720_v37 = vpop.permute.xlu0 %1441  ;;  %v1889_v31 = vsel %vm1887_vm3, %v5336_v48, %v1886_v1  ;;  %2305 = vmatprep.subr.mxu1 %v2065_v9  ;;  %v1905_v60 = vsel %vm1887_vm3, %v1886_v1, %v6676_v39  ;;  %v6677_v48 = vld [vmem:[#allocation7_spill] sm:$0xff]  ;;  %v1782_v9 = vsel %vm1778_vm5, %v5198_v61, %v5556_v36  ;;  %v1779_v61 = vsel %vm1778_vm5, %v5581_v7, %v5577_v63  ;;  %v6680_v7 = vld [vmem:[#allocation8_spill] sm:$0xff] }
 0x290   :  { %v1958_v24 = vmul.f32 %v1937_v6, %v1889_v31  ;;  %2306 = vmatpush2.msra.mxu1 %v2064_v45  ;;  %v1904_v17 = vsel %vm1887_vm3, %v5524_v47, %v6677_v48  ;;  %v1959_v22 = vmul.f32 %v1941_v62, %v1905_v60  ;;  %v1719_v1 = vrot.slane %v5685_v55, %v4354_v58  ;;  %v6681_v48 = vld [vmem:[#allocation31_spill] sm:$0xff] }
 0x291   :  { %2307 = vmatprep.subr.mxu1 %v2056_v32  ;;  %v1950_v6 = vmul.f32 %v1941_v62, %v1904_v17  ;;  %v1848_v32 = vmul.f32 %v1824_v10, %v1782_v9  ;;  %v1839_v31 = vmul.f32 %v1824_v10, %v1781_v21  ;;  %v1840_v39 = vmul.f32 %v1828_v50, %v1779_v61 }
 0x292   :  { %2308 = vmatpush2.msra.mxu1 %v2055_v5  ;;  %2322 = vmatprep.subr.mxu0 %v1958_v24  ;;  %v1777_v2 = vpop.permute.xlu1 %1776  ;;  %v1795_v5 = vsel %vm1778_vm5, %v5577_v63, %v6680_v7  ;;  %v1673_v60 = vsel %vm1669_vm6, %v5220_v54, %v5606_v27  ;;  %v1670_v10 = vsel %vm1669_vm6, %v5627_v56, %v5602_v23 }
 0x293   :  { %v5746_v35 = vpop.permute.xlu0 %1439  ;;  %v1780_v47 = vsel %vm1778_vm5, %v5556_v36, %v1777_v2  ;;  %2310 = vmatmul.mubr.f32.vlgmr.msra.gmra.mxu1 %v5369_v12  ;;  %2323 = vmatpush1.msra.mxu0 %v1957_v40  ;;  %v6679_v36 = vld [vmem:[#allocation30_spill] sm:$0xff]  ;;  %v1723_v54 = vrot.slane %v5698_v34, %v4354_v58  ;;  %v1841_v17 = vmul.f32 %v1832_v14, %v1795_v5 }
 0x294   :  { %v1849_v45 = vmul.f32 %v1828_v50, %v1780_v47  ;;  %2399 = vmatprep.subr.mxu1 %v6678_v28  ;;  %2324 = vmatprep.subr.mxu0 %v1949_v38  ;;  %v1796_v51 = vsel %vm1778_vm5, %v1777_v2, %v6679_v36  ;;  %v1672_v50 = vsel %vm1669_vm6, %v6663_v29, %v5627_v56  ;;  %v6682_v2 = vld [vmem:[#allocation10_spill] sm:$0xff] }
 0x295   :  { %2400 = vmatpush1.msra.mxu1 %v1959_v22  ;;  %2325 = vmatpush1.msra.mxu0 %v1948_v52  ;;  %v1850_v40 = vmul.f32 %v1832_v14, %v1796_v51  ;;  %v1739_v38 = vmul.f32 %v1715_v53, %v1673_v60  ;;  %v5797_v9 = vrot.slane %v5698_v34, %v4296_v18  ;;  %v6685_v60 = vld [vmem:[#allocation49_spill] sm:$0xff] }
 0x296   :  { %2401 = vmatprep.subr.mxu1 %v6678_v28  ;;  %3102 = vmatprep.mubr.msk.f32.mxu1 %vm216_vm0, %v5392_v4  ;;  %v1668_v62 = vpop.permute.xlu1 %1667  ;;  %v1686_v29 = vsel %vm1669_vm6, %v5602_v23, %v6682_v2  ;;  %v1731_v56 = vmul.f32 %v1719_v1, %v1670_v10  ;;  %v1606_v21 = vrot.slane %v5664_v33, %v4296_v18 }
 0x297   :  { %v5775_v24 = vpop.permute.xlu0 %1332  ;;  %2326 = vmatprep.subr.mxu0 %v1849_v45  ;;  %2402 = vmatpush1.msra.mxu1 %v1950_v6  ;;  %v1671_v63 = vsel %vm1669_vm6, %v5606_v27, %v1668_v62  ;;  %v1687_v27 = vsel %vm1669_vm6, %v1668_v62, %v6681_v48  ;;  %v1730_v22 = vmul.f32 %v1715_v53, %v1672_v50 }
 0x298   :  { %v1740_v52 = vmul.f32 %v1719_v1, %v1671_v63  ;;  %2316 = vmatmul.mubr.f32.gmra.mxu1 %v5415_v44  ;;  %2327 = vmatpush1.msra.mxu0 %v1848_v32  ;;  %v1610_v47 = vrot.slane %v5685_v55, %v4296_v18  ;;  %v1741_v61 = vmul.f32 %v1723_v54, %v1687_v27 }
 0x299   :  { %2403 = vmatprep.subr.mxu1 %v6678_v28  ;;  %2328 = vmatprep.subr.mxu0 %v1840_v39  ;;  %v5814_v45 = vrot.slane %v5698_v34, %v4122_v3  ;;  %v1497_v23 = vrot.slane %v5664_v33, %v4122_v3  ;;  %v1501_v6 = vrot.slane %v5685_v55, %v4122_v3 }
 0x29a   :  { %2404 = vmatpush1.msra.mxu1 %v1850_v40  ;;  %2329 = vmatpush1.msra.mxu0 %v1839_v31  ;;  %v5799_v58 = vpop.permute.xlu1 %1443  ;;  %v1732_v53 = vmul.f32 %v1723_v54, %v1686_v29  ;;  %v1564_v18 = vsel %vm1560_vm8, %v5650_v13, %v5623_v43  ;;  %v5827_v1 = vrot.slane %v5664_v33, %v6624_v25  ;;  %v6683_v31 = vld [vmem:[#allocation34_spill] sm:$0xff]  ;;  %v6687_v40 = vld [vmem:[#allocation37_spill] sm:$0xff] }
 0x29b   :  { %2405 = vmatprep.subr.mxu1 %v6678_v28  ;;  %v5808_v14 = vpop.permute.xlu0 %1330  ;;  %2330 = vmatprep.subr.mxu0 %v1740_v52  ;;  %v1566_v3 = vsel %vm1560_vm8, %v5283_v19, %v5650_v13  ;;  %v5836_v51 = vrot.slane %v5664_v33, %v6628_v15  ;;  %v5843_v7 = vrot.slane %v5685_v55, %v6624_v25  ;;  %v6684_v13 = vld [vmem:[#allocation25_spill] sm:$0xff]  ;;  %v6688_v52 = vld [vmem:[#allocation11_spill] sm:$0xff] }
 0x29c   :  { %2406 = vmatpush1.msra.mxu1 %v1841_v17  ;;  %2331 = vmatpush1.msra.mxu0 %v1739_v38  ;;  %v1563_v5 = vsel %vm1560_vm8, %v5687_v57, %v5648_v16  ;;  %v5851_v19 = vrot.slane %v5698_v34, %v6624_v25  ;;  %v5856_v33 = vrot.slane %v5685_v55, %v6628_v15  ;;  %v6686_v25 = vld [vmem:[#allocation42_spill] sm:$0xff] }
 0x29d   :  { %2407 = vmatprep.subr.mxu1 %v6678_v28  ;;  %2332 = vmatprep.subr.mxu0 %v1731_v56  ;;  %v1562_v62 = vsel %vm1560_vm8, %v5623_v43, %v5360_v41  ;;  %v1631_v39 = vmul.f32 %v1610_v47, %v1564_v18  ;;  %v1565_v63 = vsel %vm1560_vm8, %v6685_v60, %v5687_v57  ;;  %v6689_v57 = vld [vmem:[#allocation16_spill] sm:$0xff] }
 0x29e   :  { %2408 = vmatpush1.msra.mxu1 %v1741_v61  ;;  %2333 = vmatpush1.msra.mxu0 %v1730_v22  ;;  %v1337_v36 = vpop.permute.xlu1 %1336  ;;  %v1630_v10 = vmul.f32 %v1606_v21, %v1566_v3  ;;  %v1455_v55 = vsel %vm1451_vm10, %v5720_v37, %v5673_v59  ;;  %v5876_v43 = vrot.slane %v5698_v34, %v6628_v15  ;;  %v6690_v34 = vld [vmem:[#allocation39_spill] sm:$0xff] }
 0x29f   :  { %2409 = vmatprep.subr.mxu1 %v6678_v28  ;;  %v5838_v32 = vpop.permute.xlu0 %1221  ;;  %2334 = vmatprep.subr.mxu0 %v6683_v31  ;;  %v1561_v54 = vsel %vm1560_vm8, %v5648_v16, %v6689_v57  ;;  %v1622_v50 = vmul.f32 %v1610_v47, %v1563_v5  ;;  %v1457_v48 = vsel %vm1451_vm10, %v5304_v42, %v5720_v37  ;;  %v6691_v16 = vld [vmem:[#allocation21_spill] sm:$0xff]  ;;  %v6692_v47 = vld [vmem:[#allocation3_spill] sm:$0xff] }
 0x2a0   :  { %2410 = vmatpush1.msra.mxu1 %v1732_v53  ;;  %2335 = vmatpush1.msra.mxu0 %v6684_v13  ;;  %v1632_v17 = vmul.f32 %v5797_v9, %v1562_v62  ;;  %v1621_v38 = vmul.f32 %v1606_v21, %v1565_v63  ;;  %v1454_v15 = vsel %vm1451_vm10, %v5746_v35, %v5799_v58 }
 0x2a1   :  { %2411 = vmatprep.subr.mxu1 %v6678_v28  ;;  %2336 = vmatprep.subr.mxu0 %v6686_v25  ;;  %v1453_v42 = vsel %vm1451_vm10, %v5673_v59, %v6691_v16  ;;  %v1522_v37 = vmul.f32 %v1501_v6, %v1455_v55  ;;  %v1456_v2 = vsel %vm1451_vm10, %v6672_v20, %v5746_v35  ;;  %v3094_v55 = vld [vmem:[%s6482_s2 + $0x78] ss:$0 sm:$0xff]  ;;  %v6698_v16 = vld [vmem:[#allocation19_spill] sm:$0xff] }
 0x2a2   :  { %2412 = vmatpush1.msra.mxu1 %v6687_v40  ;;  %2337 = vmatpush1.msra.mxu0 %v6688_v52  ;;  %v1335_v41 = vpop.permute.xlu1 %1334  ;;  %v1623_v29 = vmul.f32 %v5797_v9, %v1561_v54  ;;  %v1521_v56 = vmul.f32 %v1497_v23, %v1457_v48  ;;  %v1346_v21 = vsel %vm1342_vm7, %v5775_v24, %v1337_v36  ;;  %v6696_v52 = vld [vmem:[#allocation2_spill] sm:$0xff]  ;;  %v3096_v48 = vld [vmem:[%s6482_s2 + $0x88] ss:$0 sm:$0xff] }
 0x2a3   :  { %2413 = vmatprep.subr.mxu1 %v6678_v28  ;;  %v1220_v27 = vpop.permute.xlu0 %1219  ;;  %2338 = vmatprep.subr.mxu0 %v1631_v39  ;;  %v1348_v59 = vsel %vm1342_vm7, %v5330_v8, %v5775_v24  ;;  %v1452_v20 = vsel %vm1451_vm10, %v5799_v58, %v6692_v47  ;;  %v1513_v35 = vmul.f32 %v1501_v6, %v1454_v15  ;;  %v6693_v24 = vld [vmem:[#allocation27_spill] sm:$0xff]  ;;  %v2506_v47 = vld [vmem:[%s6486_s7 + $0x70] sm:$0xff] }
 0x2a4   :  { %2414 = vmatpush1.msra.mxu1 %v6690_v34  ;;  %2339 = vmatpush1.msra.mxu0 %v1630_v10  ;;  %v1523_v9 = vmul.f32 %v5814_v45, %v1453_v42  ;;  %v1512_v61 = vmul.f32 %v1497_v23, %v1456_v2  ;;  %v1345_v53 = vsel %vm1342_vm7, %v5808_v14, %v1335_v41 }
 0x2a5   :  { %2415 = vmatprep.subr.mxu1 %v6678_v28  ;;  %2340 = vmatprep.subr.mxu0 %v1622_v50  ;;  %v1347_v8 = vsel %vm1342_vm7, %v6674_v46, %v5808_v14  ;;  %v1344_v58 = vsel %vm1342_vm7, %v1337_v36, %v6693_v24  ;;  %v1413_v6 = vmul.f32 %v5843_v7, %v1346_v21  ;;  %v6694_v36 = vld [vmem:[#allocation18_spill] sm:$0xff]  ;;  %v2523_v21 = vld [vmem:[%s6486_s7 + $0xf8] sm:$0xff] }
 0x2a6   :  { %2416 = vmatpush1.msra.mxu1 %v1632_v17  ;;  %2341 = vmatpush1.msra.mxu0 %v1621_v38  ;;  %v1226_v22 = vpop.permute.xlu1 %1225  ;;  %v1412_v23 = vmul.f32 %v5827_v1, %v1348_v59  ;;  %v1514_v3 = vmul.f32 %v5814_v45, %v1452_v20  ;;  %v1239_v14 = vsel %vm1233_vm9, %v5354_v49, %v5838_v32  ;;  %v2522_v59 = vld [vmem:[%s6486_s7 + $0xf0] sm:$0xff]  ;;  %v2537_v20 = vld [vmem:[%s6486_s7 + $0x168] sm:$0xff]  ;;  %v2504_v24 = vld [vmem:[%s6486_s7 + $0x60] sm:$0xff] }
 0x2a7   :  { %2417 = vmatprep.subr.mxu1 %v6678_v28  ;;  %2342 = vmatprep.subr.mxu0 %v1522_v37  ;;  %v1991_v18 = vpop.permute.xlu0 %1990  ;;  %v1237_v31 = vsel %vm1233_vm9, %v5838_v32, %v1226_v22  ;;  %v1343_v5 = vsel %vm1342_vm7, %v1335_v41, %v6694_v36  ;;  %v1404_v13 = vmul.f32 %v5843_v7, %v1345_v53  ;;  %v6695_v32 = vld [vmem:[#allocation22_spill] sm:$0xff]  ;;  %v2533_v36 = vld [vmem:[%s6486_s7 + $0x148] sm:$0xff] }
 0x2a8   :  { %2418 = vmatpush1.msra.mxu1 %v1623_v29  ;;  %2343 = vmatpush1.msra.mxu0 %v1521_v56  ;;  %v1403_v45 = vmul.f32 %v5827_v1, %v1347_v8  ;;  %v1414_v62 = vmul.f32 %v5851_v19, %v1344_v58  ;;  %v1238_v49 = vsel %vm1233_vm9, %v5499_v26, %v1220_v27  ;;  %v3095_v1 = vld [vmem:[%s6482_s2 + $0x80] ss:$0 sm:$0xff]  ;;  %v2539_v56 = vld [vmem:[%s6486_s7 + $0x178] sm:$0xff] }
 0x2a9   :  { %2419 = vmatprep.subr.mxu1 %v6678_v28  ;;  %2344 = vmatprep.subr.mxu0 %v1513_v35  ;;  %v1235_v7 = vsel %vm1233_vm9, %v1226_v22, %v6695_v32  ;;  %v1304_v60 = vmul.f32 %v5856_v33, %v1237_v31  ;;  %v1303_v63 = vmul.f32 %v5836_v51, %v1239_v14  ;;  %v2507_v22 = vld [vmem:[%s6486_s7 + $0x78] sm:$0xff]  ;;  %v2521_v35 = vld [vmem:[%s6486_s7 + $0xe8] sm:$0xff]  ;;  %v2520_v53 = vld [vmem:[%s6486_s7 + $0xe0] sm:$0xff] }
 0x2aa   :  { %2420 = vmatpush1.msra.mxu1 %v1523_v9  ;;  %2345 = vmatpush1.msra.mxu0 %v1512_v61  ;;  %v1224_v46 = vpop.permute.xlu1 %1223  ;;  %v1405_v25 = vmul.f32 %v5851_v19, %v1343_v5  ;;  %v2000_v26 = vsel %vm1996_vm11, %v5548_v30, %v1991_v18  ;;  %v1294_v19 = vmul.f32 %v5836_v51, %v1238_v49  ;;  %v2552_v9 = vld [vmem:[%s6486_s7 + $0x1e0] sm:$0xff]  ;;  %v2505_v61 = vld [vmem:[%s6486_s7 + $0x68] sm:$0xff]  ;;  %v2551_v8 = vld [vmem:[%s6486_s7 + $0x1d8] sm:$0xff] }
 0x2ab   :  { %2421 = vmatprep.subr.mxu1 %v6678_v28  ;;  %2346 = vmatprep.subr.mxu0 %v1413_v6  ;;  %v1236_v39 = vsel %vm1233_vm9, %v1220_v27, %v1224_v46  ;;  %v1989_v40 = vpop.permute.xlu0 %1988  ;;  %v1234_v41 = vsel %vm1233_vm9, %v1224_v46, %v6696_v52  ;;  %v1305_v54 = vmul.f32 %v5876_v43, %v1235_v7  ;;  %v6697_v27 = vld [vmem:[#allocation41_spill] sm:$0xff]  ;;  %v2518_v31 = vld [vmem:[%s6486_s7 + $0xd0] sm:$0xff]  ;;  %v2549_v46 = vld [vmem:[%s6486_s7 + $0x1c8] sm:$0xff] }
 0x2ac   :  { %2422 = vmatpush1.msra.mxu1 %v1514_v3  ;;  %2347 = vmatpush1.msra.mxu0 %v1412_v23  ;;  %v1295_v57 = vmul.f32 %v5856_v33, %v1236_v39  ;;  %v2066_v17 = vmul.f32 %v3094_v55, %v2000_v26  ;;  %v1999_v51 = vsel %vm1996_vm11, %v5568_v0, %v1989_v40  ;;  %v2535_v58 = vld [vmem:[%s6486_s7 + $0x158] sm:$0xff]  ;;  %v2534_v3 = vld [vmem:[%s6486_s7 + $0x150] sm:$0xff]  ;;  %v2517_v5 = vld [vmem:[%s6486_s7 + $0xc8] sm:$0xff] }
 0x2ad   :  { %2423 = vmatprep.subr.mxu1 %v6678_v28  ;;  %2348 = vmatprep.subr.mxu0 %v1404_v13  ;;  %v1296_v38 = vmul.f32 %v5876_v43, %v1234_v41  ;;  %v2057_v0 = vmul.f32 %v3094_v55, %v1999_v51  ;;  %v3400_v43 = vld [vmem:[%s6481_s5 + $0x8] sm:$0xff]  ;;  %v2519_v6 = vld [vmem:[%s6486_s7 + $0xd8] sm:$0xff]  ;;  %v2502_v14 = vld [vmem:[%s6486_s7 + $0x50] sm:$0xff] }
 0x2ae   :  { %2424 = vmatpush1.msra.mxu1 %v1414_v62  ;;  %2349 = vmatpush1.msra.mxu0 %v1403_v45  ;;  %v1995_v10 = vpop.permute.xlu1 %1994  ;;  %v2503_v23 = vld [vmem:[%s6486_s7 + $0x58] sm:$0xff]  ;;  %v2548_v13 = vld [vmem:[%s6486_s7 + $0x1c0] sm:$0xff]  ;;  %v2501_v45 = vld [vmem:[%s6486_s7 + $0x48] sm:$0xff] }
 0x2af   :  { %2425 = vmatprep.subr.mxu1 %v6678_v28  ;;  %2350 = vmatprep.subr.mxu0 %v1304_v60  ;;  %v1998_v30 = vsel %vm1996_vm11, %v1991_v18, %v1995_v10  ;;  %v2014_v33 = vsel %vm1996_vm11, %v1995_v10, %v6697_v27  ;;  %v2550_v18 = vld [vmem:[%s6486_s7 + $0x1d0] sm:$0xff]  ;;  %v2532_v62 = vld [vmem:[%s6486_s7 + $0x140] sm:$0xff]  ;;  %v2547_v49 = vld [vmem:[%s6486_s7 + $0x1b8] sm:$0xff] }
 0x2b0   :  { %2426 = vmatpush1.msra.mxu1 %v1405_v25  ;;  %v2067_v50 = vmul.f32 %v3095_v1, %v1998_v30  ;;  %2351 = vmatpush1.msra.mxu0 %v1303_v63  ;;  %v2068_v37 = vmul.f32 %v3096_v48, %v2014_v33  ;;  %v2516_v39 = vld [vmem:[%s6486_s7 + $0xc0] sm:$0xff]  ;;  %v2531_v7 = vld [vmem:[%s6486_s7 + $0x138] sm:$0xff]  ;;  %v2530_v25 = vld [vmem:[%s6486_s7 + $0x130] sm:$0xff] }
 0x2b1   :  { %2427 = vmatprep.subr.mxu1 %v6678_v28  ;;  %2352 = vmatprep.subr.mxu0 %v1295_v57  ;;  %v2500_v32 = vld [vmem:[%s6486_s7 + $0x40] sm:$0xff]  ;;  %v2515_v60 = vld [vmem:[%s6486_s7 + $0xb8] sm:$0xff]  ;;  %v2514_v26 = vld [vmem:[%s6486_s7 + $0xb0] sm:$0xff] }
 0x2b2   :  { %2428 = vmatpush1.msra.mxu1 %v1305_v54  ;;  %2353 = vmatpush1.msra.mxu0 %v1294_v19  ;;  %v1993_v15 = vpop.permute.xlu1 %1992  ;;  %v2499_v63 = vld [vmem:[%s6486_s7 + $0x38] sm:$0xff]  ;;  %v2545_v10 = vld [vmem:[%s6486_s7 + $0x1a8] sm:$0xff]  ;;  %v2498_v55 = vld [vmem:[%s6486_s7 + $0x30] sm:$0xff] }
 0x2b3   :  { %2429 = vmatprep.subr.mxu1 %v6678_v28  ;;  %2382 = vmatprep.subr.mxu0 %v2067_v50  ;;  %v1997_v34 = vsel %vm1996_vm11, %v1989_v40, %v1993_v15  ;;  %v2013_v42 = vsel %vm1996_vm11, %v1993_v15, %v6698_v16  ;;  %v2529_v40 = vld [vmem:[%s6486_s7 + $0x128] sm:$0xff]  ;;  %v2544_v41 = vld [vmem:[%s6486_s7 + $0x1a0] sm:$0xff]  ;;  %v2543_v54 = vld [vmem:[%s6486_s7 + $0x198] sm:$0xff] }
 0x2b4   :  { %2430 = vmatpush1.msra.mxu1 %v1296_v38  ;;  %v2058_v2 = vmul.f32 %v3095_v1, %v1997_v34  ;;  %v2059_v29 = vmul.f32 %v3096_v48, %v2013_v42  ;;  %2383 = vmatpush2.msra.mxu0 %v2066_v17  ;;  %v2546_v1 = vld [vmem:[%s6486_s7 + $0x1b0] sm:$0xff]  ;;  %v2513_v52 = vld [vmem:[%s6486_s7 + $0xa8] sm:$0xff]  ;;  %v2528_v30 = vld [vmem:[%s6486_s7 + $0x120] sm:$0xff] }
 0x2b5   :  { %2459 = vmatprep.subr.mxu1 %v6678_v28  ;;  %3105 = vmatprep.mubr.msk.f32.mxu1 %vm216_vm0, %v3400_v43  ;;  %v2497_v57 = vld [vmem:[%s6486_s7 + $0x28] sm:$0xff]  ;;  %v2512_v19 = vld [vmem:[%s6486_s7 + $0xa0] sm:$0xff]  ;;  %v2527_v48 = vld [vmem:[%s6486_s7 + $0x118] sm:$0xff] }
 0x2b6   :  { %2460 = vmatpush2.msra.mxu1 %v2068_v37  ;;  %2384 = vmatprep.subr.mxu0 %v2058_v2  ;;  %v2496_v50 = vld [vmem:[%s6486_s7 + $0x20] sm:$0xff]  ;;  %v2511_v27 = vld [vmem:[%s6486_s7 + $0x98] sm:$0xff]  ;;  %v2542_v33 = vld [vmem:[%s6486_s7 + $0x190] sm:$0xff] }
 0x2b7   :  { %2461 = vmatprep.subr.mxu1 %v6678_v28  ;;  %2385 = vmatpush2.msra.mxu0 %v2057_v0  ;;  %v2554_v28 = vld [vmem:[%s6486_s7 + $0x1f0] sm:$0xff]  ;;  %v2495_v17 = vld [vmem:[%s6486_s7 + $0x18] sm:$0xff]  ;;  %v2541_v15 = vld [vmem:[%s6486_s7 + $0x188] sm:$0xff] }
 0x2b8   :  { %2462 = vmatpush2.msra.mxu1 %v2059_v29  ;;  %2387 = vmatmul.mubr.f32.vlgmr.msra.gmra.mxu0 %v5369_v12  ;;  %v2526_v51 = vld [vmem:[%s6486_s7 + $0x110] sm:$0xff]  ;;  %v2525_v16 = vld [vmem:[%s6486_s7 + $0x108] sm:$0xff]  ;;  %v2540_v37 = vld [vmem:[%s6486_s7 + $0x180] sm:$0xff] }
 0x2b9   :  { %2464 = vmatmul.mubr.f32.vlgmr.msra.gmra.mxu1 %v5369_v12  ;;  %3104 = vmatprep.mubr.msk.f32.mxu0 %vm216_vm0, %v5392_v4  ;;  %v2538_v12 = vld [vmem:[%s6486_s7 + $0x170] sm:$0xff]  ;;  %v2509_v42 = vld [vmem:[%s6486_s7 + $0x88] sm:$0xff]  ;;  %v2524_v29 = vld [vmem:[%s6486_s7 + $0x100] sm:$0xff] }
 0x2ba   :  { %3106 = vmatprep.mubr.msk.f32.mxu1 %vm216_vm0, %v5392_v4  ;;  %3145 = vmatprep.subr.mxu1 %v2555_v11  ;;  %v2553_v4 = vld [vmem:[%s6486_s7 + $0x1e8] sm:$0xff]  ;;  %v2510_v38 = vld [vmem:[%s6486_s7 + $0x90] sm:$0xff]  ;;  %v2508_v0 = vld [vmem:[%s6486_s7 + $0x80] sm:$0xff]  ;;  %vm3013_vm0 = vcmask 392192  }
 0x2bb   :  { %3146 = vmatpush3.msra.mxu1 %v2539_v56  ;;  %3107 = vmatprep.subr.mxu0 %v2523_v21  ;;  %v2494_v34 = vld [vmem:[%s6486_s7 + $0x10] sm:$0xff]  ;;  %v2493_v2 = vld [vmem:[%s6486_s7 + $0x8] sm:$0xff]  ;;  %v2492_v43 = vld [vmem:[%s6486_s7] sm:$0xff] }
 0x2bc   :  { %2393 = vmatmul.mubr.f32.gmra.mxu0 %v5415_v44  ;;  %3147 = vmatprep.subr.mxu1 %v2554_v28  ;;  %v2587_v11 = vld [vmem:[%s6486_s7 + $0x2f8] sm:$0xff]  ;;  %v6203_v28 = vpop.permute.xlu0 %2077 }
 0x2bd   :  { %2469 = vmatmul.mubr.f32.gmra.mxu1 %v5415_v44  ;;  %3108 = vmatpush3.msra.mxu0 %v2507_v22  ;;  %v2536_v44 = vld [vmem:[%s6486_s7 + $0x160] sm:$0xff]  ;;  %v2619_v56 = vld [vmem:[%s6486_s7 + $0x3f8] sm:$0xff] }
 0x2be   :  { %3148 = vmatpush3.msra.mxu1 %v2538_v12  ;;  %3109 = vmatprep.subr.mxu0 %v2522_v59 }
 0x2bf   :  { %3149 = vmatprep.subr.mxu1 %v2553_v4  ;;  %3110 = vmatpush3.msra.mxu0 %v2506_v47  ;;  %v6207_v4 = vpop.permute.xlu1 %2082 }
 0x2c0   :  { %3150 = vmatpush3.msra.mxu1 %v2537_v20  ;;  %3111 = vmatprep.subr.mxu0 %v2521_v35 }
 0x2c1   :  { %3151 = vmatprep.subr.mxu1 %v2552_v9  ;;  %3112 = vmatpush3.msra.mxu0 %v2505_v61 }
 0x2c2   :  { %3152 = vmatpush3.msra.mxu1 %v2536_v44  ;;  %3113 = vmatprep.subr.mxu0 %v2520_v53  ;;  %v2603_v44 = vld [vmem:[%s6486_s7 + $0x378] sm:$0xff] }
 0x2c3   :  { %3153 = vmatprep.subr.mxu1 %v2551_v8  ;;  %3114 = vmatpush3.msra.mxu0 %v2504_v24  ;;  %v2618_v8 = vld [vmem:[%s6486_s7 + $0x3f0] sm:$0xff] }
 0x2c4   :  { %3154 = vmatpush3.msra.mxu1 %v2535_v58  ;;  %3115 = vmatprep.subr.mxu0 %v2519_v6  ;;  %v2602_v58 = vld [vmem:[%s6486_s7 + $0x370] sm:$0xff] }
 0x2c5   :  { %3155 = vmatprep.subr.mxu1 %v2550_v18  ;;  %3116 = vmatpush3.msra.mxu0 %v2503_v23  ;;  %v2617_v18 = vld [vmem:[%s6486_s7 + $0x3e8] sm:$0xff] }
 0x2c6   :  { %3156 = vmatpush3.msra.mxu1 %v2534_v3  ;;  %3117 = vmatprep.subr.mxu0 %v2518_v31  ;;  %v2601_v23 = vld [vmem:[%s6486_s7 + $0x368] sm:$0xff]  ;;  %v2616_v3 = vld [vmem:[%s6486_s7 + $0x3e0] sm:$0xff] }
 0x2c7   :  { %3157 = vmatprep.subr.mxu1 %v2549_v46  ;;  %3118 = vmatpush3.msra.mxu0 %v2502_v14  ;;  %v2600_v31 = vld [vmem:[%s6486_s7 + $0x360] sm:$0xff]  ;;  %v2615_v46 = vld [vmem:[%s6486_s7 + $0x3d8] sm:$0xff] }
 0x2c8   :  { %3158 = vmatpush3.msra.mxu1 %v2533_v36  ;;  %3119 = vmatprep.subr.mxu0 %v2517_v5  ;;  %v2599_v14 = vld [vmem:[%s6486_s7 + $0x358] sm:$0xff]  ;;  %v2614_v36 = vld [vmem:[%s6486_s7 + $0x3d0] sm:$0xff] }
 0x2c9   :  { %3159 = vmatprep.subr.mxu1 %v2548_v13  ;;  %3120 = vmatpush3.msra.mxu0 %v2501_v45  ;;  %v2598_v5 = vld [vmem:[%s6486_s7 + $0x350] sm:$0xff]  ;;  %v2613_v13 = vld [vmem:[%s6486_s7 + $0x3c8] sm:$0xff] }
 0x2ca   :  { %3160 = vmatpush3.msra.mxu1 %v2532_v62  ;;  %3121 = vmatprep.subr.mxu0 %v2516_v39  ;;  %v2597_v45 = vld [vmem:[%s6486_s7 + $0x348] sm:$0xff]  ;;  %v2612_v62 = vld [vmem:[%s6486_s7 + $0x3c0] sm:$0xff] }
 0x2cb   :  { %3161 = vmatprep.subr.mxu1 %v2547_v49  ;;  %3122 = vmatpush3.msra.mxu0 %v2500_v32  ;;  %v2596_v49 = vld [vmem:[%s6486_s7 + $0x340] sm:$0xff]  ;;  %v2611_v32 = vld [vmem:[%s6486_s7 + $0x3b8] sm:$0xff] }
 0x2cc   :  { %3162 = vmatpush3.msra.mxu1 %v2531_v7  ;;  %3123 = vmatprep.subr.mxu0 %v2515_v60 }
 0x2cd   :  { %3163 = vmatprep.subr.mxu1 %v2546_v1  ;;  %3124 = vmatpush3.msra.mxu0 %v2499_v63  ;;  %v2595_v1 = vld [vmem:[%s6486_s7 + $0x338] sm:$0xff] }
 0x2ce   :  { %3164 = vmatpush3.msra.mxu1 %v2530_v25  ;;  %3125 = vmatprep.subr.mxu0 %v2514_v26  ;;  %v2610_v25 = vld [vmem:[%s6486_s7 + $0x3b0] sm:$0xff] }
 0x2cf   :  { %3165 = vmatprep.subr.mxu1 %v2545_v10  ;;  %3126 = vmatpush3.msra.mxu0 %v2498_v55  ;;  %v2594_v10 = vld [vmem:[%s6486_s7 + $0x330] sm:$0xff] }
 0x2d0   :  { %3166 = vmatpush3.msra.mxu1 %v2529_v40  ;;  %3127 = vmatprep.subr.mxu0 %v2513_v52  ;;  %v2609_v52 = vld [vmem:[%s6486_s7 + $0x3a8] sm:$0xff] }
 0x2d1   :  { %3167 = vmatprep.subr.mxu1 %v2544_v41  ;;  %3128 = vmatpush3.msra.mxu0 %v2497_v57  ;;  %v2571_v57 = vld [vmem:[%s6486_s7 + $0x278] sm:$0xff] }
 0x2d2   :  { %3168 = vmatpush3.msra.mxu1 %v2528_v30  ;;  %3129 = vmatprep.subr.mxu0 %v2512_v19  ;;  %v2593_v19 = vld [vmem:[%s6486_s7 + $0x328] sm:$0xff] }
 0x2d3   :  { %3169 = vmatprep.subr.mxu1 %v2543_v54  ;;  %3130 = vmatpush3.msra.mxu0 %v2496_v50  ;;  %v2586_v54 = vld [vmem:[%s6486_s7 + $0x2f0] sm:$0xff] }
 0x2d4   :  { %3170 = vmatpush3.msra.mxu1 %v2527_v48  ;;  %3131 = vmatprep.subr.mxu0 %v2511_v27  ;;  %v2608_v48 = vld [vmem:[%s6486_s7 + $0x3a0] sm:$0xff]  ;;  %v2570_v27 = vld [vmem:[%s6486_s7 + $0x270] sm:$0xff] }
 0x2d5   :  { %3171 = vmatprep.subr.mxu1 %v2542_v33  ;;  %3132 = vmatpush3.msra.mxu0 %v2495_v17  ;;  %v2585_v17 = vld [vmem:[%s6486_s7 + $0x2e8] sm:$0xff] }
 0x2d6   :  { %3172 = vmatpush3.msra.mxu1 %v2526_v51  ;;  %3133 = vmatprep.subr.mxu0 %v2510_v38  ;;  %v2569_v38 = vld [vmem:[%s6486_s7 + $0x268] sm:$0xff] }
 0x2d7   :  { %3173 = vmatprep.subr.mxu1 %v2541_v15  ;;  %3134 = vmatpush3.msra.mxu0 %v2494_v34  ;;  %v2592_v15 = vld [vmem:[%s6486_s7 + $0x320] sm:$0xff] }
 0x2d8   :  { %3174 = vmatpush3.msra.mxu1 %v2525_v16  ;;  %3135 = vmatprep.subr.mxu0 %v2509_v42  ;;  %v2584_v34 = vld [vmem:[%s6486_s7 + $0x2e0] sm:$0xff]  ;;  %v2607_v16 = vld [vmem:[%s6486_s7 + $0x398] sm:$0xff] }
 0x2d9   :  { %3175 = vmatprep.subr.mxu1 %v2540_v37  ;;  %3136 = vmatpush3.msra.mxu0 %v2493_v2  ;;  %v2568_v42 = vld [vmem:[%s6486_s7 + $0x260] sm:$0xff]  ;;  %v2591_v37 = vld [vmem:[%s6486_s7 + $0x318] sm:$0xff] }
 0x2da   :  { %3176 = vmatpush3.msra.mxu1 %v2524_v29  ;;  %3137 = vmatprep.subr.mxu0 %v2508_v0  ;;  %v2583_v2 = vld [vmem:[%s6486_s7 + $0x2d8] sm:$0xff]  ;;  %v2606_v29 = vld [vmem:[%s6486_s7 + $0x390] sm:$0xff] }
 0x2db   :  { %3138 = vmatpush3.msra.mxu0 %v2492_v43  ;;  %3221 = vmatprep.subr.mxu1 %v2619_v56  ;;  %v2567_v0 = vld [vmem:[%s6486_s7 + $0x258] sm:$0xff]  ;;  %v2590_v43 = vld [vmem:[%s6486_s7 + $0x310] sm:$0xff]  ;;  %v2605_v56 = vld [vmem:[%s6486_s7 + $0x388] sm:$0xff] }
 0x2dc   :  { %3183 = vmatprep.subr.mxu0 %v2587_v11  ;;  %v2582_v11 = vld [vmem:[%s6486_s7 + $0x2d0] sm:$0xff] }
 0x31b   :  { %v2234_v21 = vpop.f32.mrf.mxu0 }
 0x31c   :  { %v2235_v22 = vadd.f32 %v2234_v21, %v6203_v28  ;;  %v2566_v21 = vld [vmem:[%s6486_s7 + $0x250] sm:$0xff] }
 0x31d   :  { %v2236_v12 = vpop.f32.mrf.mxu0 }
 0x31e   :  { %v2237_v59 = vadd.f32 %v2236_v12, %v6203_v28  ;;  %v2476_v9 = vmul.f32 0.5, %v2235_v22  ;;  %v2589_v22 = vld [vmem:[%s6486_s7 + $0x308] sm:$0xff] }
 0x31f   :  { %v2240_v47 = vpop.f32.mrf.mxu0  ;;  %v2581_v12 = vld [vmem:[%s6486_s7 + $0x2c8] sm:$0xff] }
 0x320   :  { %v2477_v20 = vmul.f32 0.5, %v2237_v59  ;;  %v2241_v35 = vadd.f32 %v2240_v47, %v6207_v4  ;;  %v2604_v59 = vld [vmem:[%s6486_s7 + $0x380] sm:$0xff]  ;;  %v2565_v47 = vld [vmem:[%s6486_s7 + $0x248] sm:$0xff] }
 0x321   :  { %v2242_v61 = vpop.f32.mrf.mxu0 }
 0x322   :  { %2777 = vmatprep.mubr.f32.mxu1 %v2477_v20  ;;  %v2243_v53 = vadd.f32 %v2242_v61, %v6207_v4  ;;  %v2485_v24 = vmul.f32 0.5, %v2241_v35  ;;  %v2588_v20 = vld [vmem:[%s6486_s7 + $0x300] sm:$0xff]  ;;  %v2579_v61 = vld [vmem:[%s6486_s7 + $0x2b8] sm:$0xff] }
 0x323   :  { %2778 = vmatmul.mubr.f32.vlgmr.msra.gmra.mxu1 %v2476_v9  ;;  %v2580_v35 = vld [vmem:[%s6486_s7 + $0x2c0] sm:$0xff] }
 0x324   :  { %v2486_v6 = vmul.f32 0.5, %v2243_v53  ;;  %3222 = vmatpush3.msra.mxu1 %v2603_v44  ;;  %v2564_v9 = vld [vmem:[%s6486_s7 + $0x240] sm:$0xff]  ;;  %v2563_v44 = vld [vmem:[%s6486_s7 + $0x238] sm:$0xff]  ;;  %v2578_v53 = vld [vmem:[%s6486_s7 + $0x2b0] sm:$0xff] }
 0x325   :  { %3223 = vmatprep.subr.mxu1 %v2618_v8  ;;  %v2562_v8 = vld [vmem:[%s6486_s7 + $0x230] sm:$0xff] }
 0x326   :  { %2782 = vmatprep.mubr.f32.mxu1 %v2486_v6  ;;  %3224 = vmatpush3.msra.mxu1 %v2602_v58  ;;  %v2561_v58 = vld [vmem:[%s6486_s7 + $0x228] sm:$0xff]  ;;  %v2576_v6 = vld [vmem:[%s6486_s7 + $0x2a0] sm:$0xff] }
 0x327   :  { %2783 = vmatmul.mubr.f32.gmra.mxu1 %v2485_v24  ;;  %3225 = vmatprep.subr.mxu1 %v2617_v18  ;;  %v2577_v24 = vld [vmem:[%s6486_s7 + $0x2a8] sm:$0xff]  ;;  %v2560_v18 = vld [vmem:[%s6486_s7 + $0x220] sm:$0xff] }
 0x328   :  { %3226 = vmatpush3.msra.mxu1 %v2601_v23  ;;  %v2575_v23 = vld [vmem:[%s6486_s7 + $0x298] sm:$0xff] }
 0x329   :  { %3227 = vmatprep.subr.mxu1 %v2616_v3  ;;  %v2559_v3 = vld [vmem:[%s6486_s7 + $0x218] sm:$0xff] }
 0x32a   :  { %3228 = vmatpush3.msra.mxu1 %v2600_v31  ;;  %v2574_v31 = vld [vmem:[%s6486_s7 + $0x290] sm:$0xff] }
 0x32b   :  { %3229 = vmatprep.subr.mxu1 %v2615_v46  ;;  %v2558_v46 = vld [vmem:[%s6486_s7 + $0x210] sm:$0xff] }
 0x32c   :  { %3230 = vmatpush3.msra.mxu1 %v2599_v14  ;;  %v2573_v14 = vld [vmem:[%s6486_s7 + $0x288] sm:$0xff] }
 0x32d   :  { %3231 = vmatprep.subr.mxu1 %v2614_v36  ;;  %v2557_v36 = vld [vmem:[%s6486_s7 + $0x208] sm:$0xff] }
 0x32e   :  { %3232 = vmatpush3.msra.mxu1 %v2598_v5  ;;  %v2572_v5 = vld [vmem:[%s6486_s7 + $0x280] sm:$0xff] }
 0x32f   :  { %v2157_v39 = vpop.f32.mrf.mxu1  ;;  %3233 = vmatprep.subr.mxu1 %v2613_v13 }
 0x330   :  { %3234 = vmatpush3.msra.mxu1 %v2597_v45  ;;  %v2158_v7 = vadd.f32 %v2157_v39, %v6203_v28  ;;  %v2556_v45 = vld [vmem:[%s6486_s7 + $0x200] sm:$0xff] }
 0x331   :  { %v2159_v60 = vpop.f32.mrf.mxu1  ;;  %3235 = vmatprep.subr.mxu1 %v2612_v62  ;;  %v2635_v62 = vld [vmem:[%s6486_s7 + $0x478] sm:$0xff] }
 0x332   :  { %v2160_v63 = vadd.f32 %v2159_v60, %v6203_v28  ;;  %3236 = vmatpush3.msra.mxu1 %v2596_v49  ;;  %v2474_v41 = vmul.f32 0.5, %v2158_v7 }
 0x333   :  { %v2163_v26 = vpop.f32.mrf.mxu1  ;;  %3237 = vmatprep.subr.mxu1 %v2611_v32 }
 0x334   :  { %v2475_v55 = vmul.f32 0.5, %v2160_v63  ;;  %v2164_v40 = vadd.f32 %v2163_v26, %v6207_v4  ;;  %3238 = vmatpush3.msra.mxu1 %v2595_v1  ;;  %v2634_v26 = vld [vmem:[%s6486_s7 + $0x470] sm:$0xff] }
 0x335   :  { %v2165_v30 = vpop.f32.mrf.mxu1  ;;  %3239 = vmatprep.subr.mxu1 %v2610_v25 }
 0x336   :  { %2702 = vmatprep.mubr.f32.mxu0 %v2475_v55  ;;  %v2166_v50 = vadd.f32 %v2165_v30, %v6207_v4  ;;  %3240 = vmatpush3.msra.mxu1 %v2594_v10  ;;  %v2483_v33 = vmul.f32 0.5, %v2164_v40  ;;  %v2633_v40 = vld [vmem:[%s6486_s7 + $0x468] sm:$0xff]  ;;  %v2630_v30 = vld [vmem:[%s6486_s7 + $0x450] sm:$0xff] }
 0x337   :  { %2703 = vmatmul.mubr.f32.vlgmr.msra.gmra.mxu0 %v2474_v41  ;;  %3241 = vmatprep.subr.mxu1 %v2609_v52  ;;  %v2632_v41 = vld [vmem:[%s6486_s7 + $0x460] sm:$0xff] }
 0x338   :  { %3184 = vmatpush3.msra.mxu0 %v2571_v57  ;;  %v2484_v51 = vmul.f32 0.5, %v2166_v50  ;;  %3242 = vmatpush3.msra.mxu1 %v2593_v19  ;;  %v2631_v57 = vld [vmem:[%s6486_s7 + $0x458] sm:$0xff]  ;;  %v2629_v19 = vld [vmem:[%s6486_s7 + $0x448] sm:$0xff] }
 0x339   :  { %3185 = vmatprep.subr.mxu0 %v2586_v54  ;;  %3243 = vmatprep.subr.mxu1 %v2608_v48  ;;  %v2628_v54 = vld [vmem:[%s6486_s7 + $0x440] sm:$0xff]  ;;  %v2627_v50 = vld [vmem:[%s6486_s7 + $0x438] sm:$0xff]  ;;  %v2626_v48 = vld [vmem:[%s6486_s7 + $0x430] sm:$0xff] }
 0x33a   :  { %3186 = vmatpush3.msra.mxu0 %v2570_v27  ;;  %2707 = vmatprep.mubr.f32.mxu0 %v2484_v51  ;;  %v2625_v27 = vld [vmem:[%s6486_s7 + $0x428] sm:$0xff]  ;;  %v2622_v51 = vld [vmem:[%s6486_s7 + $0x410] sm:$0xff] }
 0x33b   :  { %3187 = vmatprep.subr.mxu0 %v2585_v17  ;;  %2708 = vmatmul.mubr.f32.gmra.mxu0 %v2483_v33  ;;  %v2624_v33 = vld [vmem:[%s6486_s7 + $0x420] sm:$0xff]  ;;  %v2623_v17 = vld [vmem:[%s6486_s7 + $0x418] sm:$0xff] }
 0x33c   :  { %3188 = vmatpush3.msra.mxu0 %v2569_v38  ;;  %3244 = vmatpush3.msra.mxu1 %v2592_v15  ;;  %v2621_v38 = vld [vmem:[%s6486_s7 + $0x408] sm:$0xff]  ;;  %v2620_v15 = vld [vmem:[%s6486_s7 + $0x400] sm:$0xff] }
 0x33d   :  { %3189 = vmatprep.subr.mxu0 %v2584_v34  ;;  %3245 = vmatprep.subr.mxu1 %v2607_v16 }
 0x33e   :  { %3190 = vmatpush3.msra.mxu0 %v2568_v42  ;;  %3246 = vmatpush3.msra.mxu1 %v2591_v37 }
 0x33f   :  { %3191 = vmatprep.subr.mxu0 %v2583_v2  ;;  %3247 = vmatprep.subr.mxu1 %v2606_v29 }
 0x340   :  { %3192 = vmatpush3.msra.mxu0 %v2567_v0  ;;  %3248 = vmatpush3.msra.mxu1 %v2590_v43 }
 0x341   :  { %3193 = vmatprep.subr.mxu0 %v2582_v11  ;;  %3249 = vmatprep.subr.mxu1 %v2605_v56 }
 0x342   :  { %3194 = vmatpush3.msra.mxu0 %v2566_v21  ;;  %3250 = vmatpush3.msra.mxu1 %v2589_v22 }
 0x343   :  { %3195 = vmatprep.subr.mxu0 %v2581_v12  ;;  %3251 = vmatprep.subr.mxu1 %v2604_v59 }
 0x344   :  { %3196 = vmatpush3.msra.mxu0 %v2565_v47  ;;  %3252 = vmatpush3.msra.mxu1 %v2588_v20 }
 0x345   :  { %3197 = vmatprep.subr.mxu0 %v2580_v35 }
 0x346   :  { %3198 = vmatpush3.msra.mxu0 %v2564_v9 }
 0x347   :  { %3199 = vmatprep.subr.mxu0 %v2579_v61 }
 0x348   :  { %3200 = vmatpush3.msra.mxu0 %v2563_v44 }
 0x349   :  { %3201 = vmatprep.subr.mxu0 %v2578_v53 }
 0x34a   :  { %3202 = vmatpush3.msra.mxu0 %v2562_v8 }
 0x34b   :  { %3203 = vmatprep.subr.mxu0 %v2577_v24 }
 0x34c   :  { %3204 = vmatpush3.msra.mxu0 %v2561_v58 }
 0x34d   :  { %3205 = vmatprep.subr.mxu0 %v2576_v6 }
 0x34e   :  { %3206 = vmatpush3.msra.mxu0 %v2560_v18 }
 0x34f   :  { %3207 = vmatprep.subr.mxu0 %v2575_v23 }
 0x350   :  { %3208 = vmatpush3.msra.mxu0 %v2559_v3 }
 0x351   :  { %3209 = vmatprep.subr.mxu0 %v2574_v31 }
 0x352   :  { %3210 = vmatpush3.msra.mxu0 %v2558_v46 }
 0x353   :  { %v2311_v13 = vpop.f32.mrf.mxu1  ;;  %3211 = vmatprep.subr.mxu0 %v2573_v14  ;;  %v2637_v14 = vld [vmem:[%s6487_s8 + $0x8] sm:$0xff] }
 0x354   :  { %3212 = vmatpush3.msra.mxu0 %v2557_v36  ;;  %v2312_v39 = vadd.f32 %v2311_v13, %v6203_v28 }
 0x355   :  { %v2313_v49 = vpop.f32.mrf.mxu1  ;;  %3213 = vmatprep.subr.mxu0 %v2572_v5 }
 0x356   :  { %v2314_v32 = vadd.f32 %v2313_v49, %v6203_v28  ;;  %3214 = vmatpush3.msra.mxu0 %v2556_v45  ;;  %v2478_v1 = vmul.f32 0.5, %v2312_v39 }
 0x357   :  { %3277 = vmatprep.subr.mxu0 %v2635_v62 }
 0x358   :  { %v2479_v7 = vmul.f32 0.5, %v2314_v32  ;;  %v2317_v60 = vpop.f32.mrf.mxu1 }
 0x359   :  { %v2318_v63 = vadd.f32 %v2317_v60, %v6207_v4 }
 0x35a   :  { %v2319_v25 = vpop.f32.mrf.mxu1  ;;  %2852 = vmatprep.mubr.f32.mxu0 %v2479_v7 }
 0x35b   :  { %v2320_v10 = vadd.f32 %v2319_v25, %v6207_v4  ;;  %2853 = vmatmul.mubr.f32.vlgmr.msra.gmra.mxu0 %v2478_v1  ;;  %v2487_v55 = vmul.f32 0.5, %v2318_v63 }
 0x35c   :  { %3278 = vmatpush3.msra.mxu0 %v2635_v62 }
 0x35d   :  { %v2488_v52 = vmul.f32 0.5, %v2320_v10  ;;  %3279 = vmatprep.subr.mxu0 %v2634_v26 }
 0x35e   :  { %3280 = vmatpush3.msra.mxu0 %v2634_v26 }
 0x35f   :  { %2857 = vmatprep.mubr.f32.mxu0 %v2488_v52  ;;  %3281 = vmatprep.subr.mxu0 %v2633_v40 }
 0x360   :  { %2858 = vmatmul.mubr.f32.gmra.mxu0 %v2487_v55 }
 0x361   :  { %3282 = vmatpush3.msra.mxu0 %v2633_v40 }
 0x362   :  { %3283 = vmatprep.subr.mxu0 %v2632_v41 }
 0x363   :  { %3284 = vmatpush3.msra.mxu0 %v2632_v41 }
 0x364   :  { %3285 = vmatprep.subr.mxu0 %v2631_v57 }
 0x365   :  { %3286 = vmatpush3.msra.mxu0 %v2631_v57 }
 0x366   :  { %3287 = vmatprep.subr.mxu0 %v2630_v30 }
 0x367   :  { %3288 = vmatpush3.msra.mxu0 %v2630_v30 }
 0x368   :  { %3289 = vmatprep.subr.mxu0 %v2629_v19 }
 0x369   :  { %3290 = vmatpush3.msra.mxu0 %v2629_v19 }
 0x36a   :  { %3291 = vmatprep.subr.mxu0 %v2628_v54 }
 0x36b   :  { %3292 = vmatpush3.msra.mxu0 %v2628_v54 }
 0x36c   :  { %3293 = vmatprep.subr.mxu0 %v2627_v50 }
 0x36d   :  { %3294 = vmatpush3.msra.mxu0 %v2627_v50 }
 0x36e   :  { %3295 = vmatprep.subr.mxu0 %v2626_v48 }
 0x36f   :  { %3296 = vmatpush3.msra.mxu0 %v2626_v48 }
 0x370   :  { %3297 = vmatprep.subr.mxu0 %v2625_v27 }
 0x371   :  { %3298 = vmatpush3.msra.mxu0 %v2625_v27 }
 0x372   :  { %3299 = vmatprep.subr.mxu0 %v2624_v33 }
 0x373   :  { %3300 = vmatpush3.msra.mxu0 %v2624_v33 }
 0x374   :  { %3301 = vmatprep.subr.mxu0 %v2623_v17 }
 0x375   :  { %3302 = vmatpush3.msra.mxu0 %v2623_v17 }
 0x376   :  { %3303 = vmatprep.subr.mxu0 %v2622_v51 }
 0x377   :  { %3304 = vmatpush3.msra.mxu0 %v2622_v51 }
 0x378   :  { %v2388_v34 = vpop.f32.mrf.mxu0  ;;  %3305 = vmatprep.subr.mxu0 %v2621_v38 }
 0x379   :  { %v2465_v16 = vpop.f32.mrf.mxu1  ;;  %3306 = vmatpush3.msra.mxu0 %v2621_v38  ;;  %v2389_v37 = vadd.f32 %v2388_v34, %v6203_v28 }
 0x37a   :  { %v2466_v42 = vadd.f32 %v2465_v16, %v6203_v28  ;;  %v2390_v2 = vpop.f32.mrf.mxu0  ;;  %3307 = vmatprep.subr.mxu0 %v2620_v15 }
 0x37b   :  { %v2467_v29 = vpop.f32.mrf.mxu1  ;;  %v2391_v0 = vadd.f32 %v2390_v2, %v6203_v28  ;;  %3308 = vmatpush3.msra.mxu0 %v2620_v15  ;;  %v2480_v22 = vmul.f32 0.5, %v2389_v37 }
 0x37c   :  { %v2482_v43 = vmul.f32 0.5, %v2466_v42  ;;  %v2394_v11 = vpop.f32.mrf.mxu0 }
 0x37d   :  { %v2481_v56 = vmul.f32 0.5, %v2391_v0  ;;  %v2470_v21 = vpop.f32.mrf.mxu1  ;;  %v2395_v59 = vadd.f32 %v2394_v11, %v6207_v4 }
 0x37e   :  { %v2471_v12 = vadd.f32 %v2470_v21, %v6207_v4  ;;  %3309 = vmatprep.mubr.f32.mxu0 %v2482_v43  ;;  %v2396_v47 = vpop.f32.mrf.mxu0 }
 0x37f   :  { %v2397_v20 = vadd.f32 %v2396_v47, %v6207_v4  ;;  %2927 = vmatprep.mubr.f32.mxu1 %v2481_v56  ;;  %v2472_v35 = vpop.f32.mrf.mxu1  ;;  %v2489_v28 = vmul.f32 0.5, %v2395_v59  ;;  %v2636_v4 = vld [vmem:[%s6487_s8] sm:$0xff] }
 0x380   :  { %v2491_v9 = vmul.f32 0.5, %v2471_v12  ;;  %2928 = vmatmul.mubr.f32.vlgmr.msra.gmra.mxu1 %v2480_v22 }
 0x381   :  { %v2490_v61 = vmul.f32 0.5, %v2397_v20 }
 0x382   :  { %3310 = vmatmul.mubr.f32.vlgmr.msra.gmra.mxu0 %v2491_v9 }
 0x383   :  { %2932 = vmatprep.mubr.f32.mxu1 %v2490_v61 }
 0x384   :  { %2933 = vmatmul.mubr.f32.gmra.mxu1 %v2489_v28  ;;  %v3048_v28 = vpop.permute.xlu0 %3047 }
 0x3e3   :  { %v3177_v58 = vpop.f32.mrf.mxu1 }
 0x3e5   :  { %v3178_v18 = vpop.f32.mrf.mxu1 }
 0x3e6   :  { %v3179_v45 = vadd.f32 %v3178_v18, %v3177_v58  ;;  %v3062_v18 = vpop.permute.xlu0 %3061 }
 0x3e7   :  { %v3180_v23 = vpop.f32.mrf.mxu1 }
 0x3e9   :  { %v3181_v36 = vpop.f32.mrf.mxu1 }
 0x3ea   :  { %v3182_v49 = vadd.f32 %v3181_v36, %v3180_v23 }
 0x3f7   :  { %v3139_v44 = vpop.f32.mrf.mxu0 }
 0x3f9   :  { %v3140_v53 = vpop.f32.mrf.mxu0 }
 0x3fa   :  { %v3141_v31 = vadd.f32 %v3140_v53, %v3139_v44  ;;  %v3053_v44 = vpop.permute.xlu1 %3052 }
 0x3fb   :  { %v3142_v8 = vpop.f32.mrf.mxu0 }
 0x3fc   :  { %v2705_v13 = vadd.f32 %v3141_v31, %v2636_v4 }
 0x3fd   :  { %v3143_v24 = vpop.f32.mrf.mxu0 }
 0x3fe   :  { %v3144_v46 = vadd.f32 %v3143_v24, %v3142_v8  ;;  %v2780_v60 = vadd.f32 %v3179_v45, %v2705_v13  ;;  %v3067_v23 = vpop.permute.xlu1 %3066 }
 0x400   :  { %v2710_v62 = vadd.f32 %v3144_v46, %v2637_v14 }
 0x402   :  { %v2785_v25 = vadd.f32 %v3182_v49, %v2710_v62 }
 0x41b   :  { %v3215_v6 = vpop.f32.mrf.mxu0 }
 0x41d   :  { %v3216_v3 = vpop.f32.mrf.mxu0 }
 0x41e   :  { %v3217_v39 = vadd.f32 %v3216_v3, %v3215_v6 }
 0x420   :  { %v3218_v5 = vpop.f32.mrf.mxu0  ;;  %v2855_v63 = vadd.f32 %v3217_v39, %v2780_v60 }
 0x422   :  { %v3219_v32 = vpop.f32.mrf.mxu0 }
 0x423   :  { %v3220_v26 = vadd.f32 %v3219_v32, %v3218_v5 }
 0x425   :  { %v2860_v57 = vadd.f32 %v3220_v26, %v2785_v25 }
 0x440   :  { %v3253_v7 = vpop.f32.mrf.mxu1 }
 0x442   :  { %v3254_v1 = vpop.f32.mrf.mxu1  ;;  %v3311_v55 = vpop.f32.mrf.mxu0 }
 0x443   :  { %v3255_v10 = vadd.f32 %v3254_v1, %v3253_v7 }
 0x444   :  { %v3256_v40 = vpop.f32.mrf.mxu1  ;;  %v3004_v19 = vpop.f32.mrf.mxu0 }
 0x445   :  { %v2930_v52 = vadd.f32 %v3255_v10, %v2855_v63 }
 0x446   :  { %v3257_v41 = vpop.f32.mrf.mxu1 }
 0x447   :  { %v3258_v30 = vadd.f32 %v3257_v41, %v3256_v40  ;;  %v3005_v54 = vadd.f32 %v3004_v19, %v2930_v52 }
 0x449   :  { %v2935_v50 = vadd.f32 %v3258_v30, %v2860_v57  ;;  %v3014_v27 = vsel %vm3013_vm0, %v3005_v54, 0.0 }
 0x44b   :  { %v3010_v48 = vadd.f32 %v3311_v55, %v2935_v50 }
 0x44d   :  { %v3015_v33 = vsel %vm3013_vm0, %v3010_v48, 0.0 }
 0x44e   :  { %v3016_v17 = vadd.f32 %v3015_v33, %v3014_v27 }
 0x450   :  { %v3017_v51 = vrot.slane %v3016_v17, 4 }
 0x452   :  { %v3018_v38 = vadd.f32 %v3017_v51, %v3016_v17 }
 0x454   :  { %v3019_v15 = vrot.slane %v3018_v38, 2 }
 0x456   :  { %v3020_v34 = vadd.f32 %v3019_v15, %v3018_v38 }
 0x458   :  { %v3021_v16 = vrot.slane %v3020_v34, 1 }
 0x45a   :  { %v3022_v42 = vadd.f32 %v3021_v16, %v3020_v34 }
 0x45c   :  { %v3024_v37 = vmul.f32 0.0625, %v3022_v42 }
 0x45e   :  { %v3025_v2 = vsub.f32 %v3005_v54, %v3024_v37  ;;  %v3026_v29 = vsub.f32 %v3010_v48, %v3024_v37 }
 0x460   :  { %v3027_v0 = vmul.f32 %v3025_v2, %v3025_v2  ;;  %v3028_v43 = vmul.f32 %v3026_v29, %v3026_v29 }
 0x462   :  { %v3029_v11 = vsel %vm3013_vm0, %v3027_v0, 0.0  ;;  %v3030_v56 = vsel %vm3013_vm0, %v3028_v43, 0.0 }
 0x463   :  { %v3031_v21 = vadd.f32 %v3030_v56, %v3029_v11 }
 0x465   :  { %v3032_v22 = vrot.slane %v3031_v21, 4 }
 0x467   :  { %v3033_v12 = vadd.f32 %v3032_v22, %v3031_v21 }
 0x469   :  { %v3034_v59 = vrot.slane %v3033_v12, 2 }
 0x46b   :  { %v3035_v47 = vadd.f32 %v3034_v59, %v3033_v12 }
 0x46d   :  { %v3036_v20 = vrot.slane %v3035_v47, 1 }
 0x46f   :  { %v3037_v35 = vadd.f32 %v3036_v20, %v3035_v47 }
 0x471   :  { %v3038_v9 = vmul.f32 0.0625, %v3037_v35 }
 0x473   :  { %v3039_v61 = vadd.f32 1e-05, %v3038_v9 }
 0x475   :  { %3397 = vrsqrt.f32 %v3039_v61 }
 0x482   :  { %v3398_v53 = vpop.eup %3397 }
 0x483   :  { %v3041_v8 = vmul.f32 %v3398_v53, %v3025_v2  ;;  %v3042_v24 = vmul.f32 %v3398_v53, %v3026_v29 }
 0x485   :  { %v3055_v58 = vmul.f32 %v3048_v28, %v3041_v8  ;;  %v3056_v6 = vmul.f32 %v3053_v44, %v3042_v24 }
 0x487   :  { %v3069_v3 = vadd.f32 %v3062_v18, %v3055_v58  ;;  %v3070_v31 = vadd.f32 %v3067_v23, %v3056_v6 }
 0x489   :  { %3071 = vst.msk [vmem:[%s6488_s11] sm:$0xff] %vm3013_vm0, %v3069_v3  ;;  %3072 = vst.msk [vmem:[%s6488_s11 + $0x8] sm:$0xff] %vm3013_vm0, %v3070_v31 }

</bundles_post_ra>
